<compile_context>
chip_gen: v6e
topology: v6e:2x2x1
jax: 0.10.0
libtpu: 0.0.40
codegen_flags: <defaults>
</compile_context>

<pallas_src>
import functools

import numpy as np
import jax
import jax.numpy as jnp
from jax.experimental import pallas as pl
from jax.experimental.pallas import tpu as pltpu

LANE = 128      # vreg lane width
SUBLANE = 8     # f32 vreg sublane count


def _round_up(x, m):
    return ((x + m - 1) // m) * m


# ----------------------------------------------------------------------------
# Fused kernel: all LSTM layers + FC head in one pallas_call
# ----------------------------------------------------------------------------
def _bilstm_fused_kernel(*refs, num_layers, seq_len, batch_pad, hidden,
                         gate_pad):
    """Whole BiLSTMSentiment forward in one kernel.

    Ref layout (positional):
      refs[0]                      x          (T*Bp, Ep)   time-major flat
      refs[1+3l .. 3+3l]           per layer: w_ih (Din_pad, 2*Gp)
                                              w_hh (2*Gp, 2*Gp)   block-diag
                                              b    (1, 2*Gp)      b_ih + b_hh
      refs[1+3L], refs[2+3L]       w_fc (2*Gp, Op), b_fc (1, Op)
      refs[3+3L]                   out (Bp, Op)
      refs[4+3L]                   gx scratch (T*Bp, 2*Gp)
      refs[5+3L ..]                inter-layer sequence scratch(es)

    Packed per-direction layout: the 4*H gate columns (i|f|g|o) share one
    Gp = round_up(4H, 128)-lane block; h / c carry real values in lanes [0:H]
    of that block.  Lanes [H:Gp] hold bounded don't-care values that only ever
    meet zero rows of W_hh / next-layer W_ih / W_fc.
    """
    T, Bp, H, Gp = seq_len, batch_pad, hidden, gate_pad

    x_ref = refs[0]
    layer_refs = [refs[1 + 3 * l: 4 + 3 * l] for l in range(num_layers)]
    w_fc_ref = refs[1 + 3 * num_layers]
    b_fc_ref = refs[2 + 3 * num_layers]
    out_ref = refs[3 + 3 * num_layers]
    gx_scr = refs[4 + 3 * num_layers]
    seq_scr = refs[5 + 3 * num_layers:]

    # Full unroll only for short sequences; cap at long T to avoid the
    # vreg-pressure / code-size cliff while keeping LLO scheduling visibility.
    unroll = True if T <= 16 else 4

    # Lane shifts that bring the f / g / o sub-blocks onto lanes [0:H], where
    # i, c and h live.  jnp.roll convention: out[j] = in[(j - shift) mod Gp].
    shift_f = Gp - H
    shift_g = Gp - 2 * H
    shift_o = Gp - 3 * H

    def cell(gates, c_prev):
        # gates, c_prev: (Bp, Gp).  Full-vreg sigmoid/tanh (EUP), then XLU
        # rolls for alignment; lanes [0:H] of the results are the real cell.
        sig = jax.nn.sigmoid(gates)                 # lanes [0:H] == i
        th = jnp.tanh(gates)
        f_al = pltpu.roll(sig, shift_f, axis=1)     # f  -> lanes [0:H]
        g_al = pltpu.roll(th, shift_g, axis=1)      # g  -> lanes [0:H]
        o_al = pltpu.roll(sig, shift_o, axis=1)     # o  -> lanes [0:H]
        c_new = f_al * c_prev + sig * g_al
        h_new = o_al * jnp.tanh(c_new)
        return h_new, c_new

    def run_layer(w_hh_ref, seq_out):
        """Fused fwd+bwd recurrence over gx_scr; returns final [h_fwd|h_bwd]."""
        def step(t, carry):
            h, c = carry                                   # (Bp, 2*Gp) in vregs
            row_f = pl.multiple_of(t * Bp, Bp)             # forward: time t
            row_b = pl.multiple_of((T - 1 - t) * Bp, Bp)   # backward: T-1-t
            # One block-diagonal matmul serves both directions' h @ W_hh.
            # TODO(synk): hold W_hh MXU-weight-stationary across the unrolled
            # steps (matmul_push_rhs / matmul_acc_lhs) on v6e/v7x.
            gh = jnp.dot(h, w_hh_ref[...],
                         preferred_element_type=jnp.float32)      # (Bp, 2*Gp)
            gates_f = gx_scr[pl.ds(row_f, Bp), pl.ds(0, Gp)] + gh[:, :Gp]
            gates_b = gx_scr[pl.ds(row_b, Bp), pl.ds(Gp, Gp)] + gh[:, Gp:]
            h_f, c_f = cell(gates_f, c[:, :Gp])
            h_b, c_b = cell(gates_b, c[:, Gp:])
            if seq_out is not None:      # final layer never emits the sequence
                seq_out[pl.ds(row_f, Bp), pl.ds(0, Gp)] = h_f
                seq_out[pl.ds(row_b, Bp), pl.ds(Gp, Gp)] = h_b
            return (jnp.concatenate([h_f, h_b], axis=1),
                    jnp.concatenate([c_f, c_b], axis=1))

        zeros = jnp.zeros((Bp, 2 * Gp), jnp.float32)
        h_last, _ = jax.lax.fori_loop(0, T, step, (zeros, zeros),
                                      unroll=unroll)
        return h_last

    h_last = None
    for l in range(num_layers):
        w_ih_ref, w_hh_ref, b_ref = layer_refs[l]
        src = x_ref if l == 0 else seq_scr[(l - 1) % len(seq_scr)]
        dst = None if l == num_layers - 1 else seq_scr[l % len(seq_scr)]
        # Hoisted input projection for BOTH directions: one MXU matmul over
        # all T*Bp rows instead of T tiny matmuls inside the serial loop.
        # TODO(synk): at production T, chunk gx / seq along time and overlap
        # this projection with the recurrence; at demo sizes it all fits VMEM.
        gx_scr[...] = (
            jnp.dot(src[...], w_ih_ref[...],
                    preferred_element_type=jnp.float32) + b_ref[...])
        h_last = run_layer(w_hh_ref, dst)
        # TODO(synk): inter-layer dropout(p=0.55) omitted — eval-mode identity.

    # hidden[-2] ++ hidden[-1] -> dropout (eval identity) -> Linear -> tanh,
    # fused into the kernel tail.  Zero rows of w_fc kill the padded lanes.
    out_ref[...] = jnp.tanh(
        jnp.dot(h_last, w_fc_ref[...], preferred_element_type=jnp.float32)
        + b_fc_ref[...])


# ----------------------------------------------------------------------------
# Parameters: PyTorch-layout init + repacking into the packed fused layout
# ----------------------------------------------------------------------------
def init_params(key, embedding_dim, hidden_dim, output_dim, num_layers):
    """PyTorch-layout parameters, uniform(-1/sqrt(H), 1/sqrt(H))."""
    H = hidden_dim
    k = 1.0 / float(np.sqrt(H))
    params = {}
    for layer in range(num_layers):
        din = embedding_dim if layer == 0 else 2 * H
        for d in ("fwd", "bwd"):
            key, k1, k2, k3, k4 = jax.random.split(key, 5)
            params[f"l{layer}_{d}"] = (
                jax.random.uniform(k1, (4 * H, din), jnp.float32, -k, k),  # w_ih
                jax.random.uniform(k2, (4 * H, H), jnp.float32, -k, k),    # w_hh
                jax.random.uniform(k3, (4 * H,), jnp.float32, -k, k),      # b_ih
                jax.random.uniform(k4, (4 * H,), jnp.float32, -k, k))      # b_hh
    key, k5, k6 = jax.random.split(key, 3)
    kf = 1.0 / float(np.sqrt(2 * H))
    params["fc_w"] = jax.random.uniform(k5, (output_dim, 2 * H),
                                        jnp.float32, -kf, kf)
    params["fc_b"] = jax.random.uniform(k6, (output_dim,), jnp.float32, -kf, kf)
    return params


def pack_params(params, embedding_dim, hidden_dim, output_dim, num_layers):
    """Repack PyTorch-layout weights into the packed fused-kernel layout.

    Per direction, the 4*H gate columns (i|f|g|o) share one Gp-lane block
    (Gp = round_up(4H, 128)); fwd/bwd blocks are concatenated along the gate
    axis and W_hh is block-diagonal so one matmul serves both directions.
    h/c live in lanes [0:H] of each direction block; all rows addressing
    lanes [H:Gp] are zero, so don't-care lanes never leak into real outputs.
    """
    H = hidden_dim
    Gp = _round_up(4 * H, LANE)
    Op = _round_up(output_dim, LANE)
    Ep = _round_up(embedding_dim, LANE)

    packed = {}
    for layer in range(num_layers):
        if layer == 0:
            din_pad = Ep
            row_blocks = [(0, embedding_dim, 0)]        # (src_row, len, dst_row)
        else:
            din_pad = 2 * Gp
            row_blocks = [(0, H, 0), (H, H, Gp)]        # fwd half, bwd half
        w_ih_cat = np.zeros((din_pad, 2 * Gp), np.float32)
        w_hh_blk = np.zeros((2 * Gp, 2 * Gp), np.float32)
        b_cat = np.zeros((1, 2 * Gp), np.float32)
        for d, dname in enumerate(("fwd", "bwd")):
            w_ih, w_hh, b_ih, b_hh = (np.asarray(a)
                                      for a in params[f"l{layer}_{dname}"])
            col0 = d * Gp
            for (src, length, dst) in row_blocks:
                w_ih_cat[dst:dst + length, col0:col0 + 4 * H] = \
                    w_ih.T[src:src + length]
            w_hh_blk[col0:col0 + H, col0:col0 + 4 * H] = w_hh.T
            b_cat[0, col0:col0 + 4 * H] = b_ih + b_hh
        packed[f"l{layer}"] = (jnp.asarray(w_ih_cat), jnp.asarray(w_hh_blk),
                               jnp.asarray(b_cat))

    w_fc = np.zeros((2 * Gp, Op), np.float32)
    b_fc = np.zeros((1, Op), np.float32)
    fc_w_t = np.asarray(params["fc_w"]).T               # (2H, O)
    w_fc[0:H, 0:output_dim] = fc_w_t[0:H]               # hidden[-2] (fwd)
    w_fc[Gp:Gp + H, 0:output_dim] = fc_w_t[H:2 * H]     # hidden[-1] (bwd)
    b_fc[0, 0:output_dim] = np.asarray(params["fc_b"])
    packed["fc"] = (jnp.asarray(w_fc), jnp.asarray(b_fc))
    return packed


# ----------------------------------------------------------------------------
# Full forward pass (mirrors BiLSTMSentiment.forward, eval mode)
# ----------------------------------------------------------------------------
@functools.partial(jax.jit,
                   static_argnames=("hidden_dim", "output_dim", "num_layers"))
def bilstm_sentiment_forward(packed, text_bte, *, hidden_dim, output_dim,
                             num_layers):
    """text_bte: (B, T, E) batch-first, like PyTorch with batch_first=True."""
    B, T, E = text_bte.shape
    H = hidden_dim
    Gp = _round_up(4 * H, LANE)
    Op = _round_up(output_dim, LANE)
    Ep = _round_up(E, LANE)
    Bp = _round_up(max(B, SUBLANE), SUBLANE)

    # Time-major, batch/feature padded, flattened to (T*Bp, Ep) so the hoisted
    # input projection is one MXU-shaped matmul.
    # TODO(synk): fold this transpose/pad into the layer-0 DMA pattern to
    # avoid an extra HBM pass at production sizes.
    x = jnp.transpose(text_bte.astype(jnp.float32), (1, 0, 2))     # (T, B, E)
    x = jnp.pad(x, ((0, 0), (0, Bp - B), (0, Ep - E))).reshape(T * Bp, Ep)

    args = [x]
    for l in range(num_layers):
        args.extend(packed[f"l{l}"])
    args.extend(packed["fc"])

    n_seq = min(max(num_layers - 1, 0), 2)      # ping-pong inter-layer buffers
    scratch_shapes = [pltpu.VMEM((T * Bp, 2 * Gp), jnp.float32)]       # gx
    scratch_shapes += [pltpu.VMEM((T * Bp, 2 * Gp), jnp.float32)
                       for _ in range(n_seq)]                          # seq

    # Explicit VMEM budget: everything is resident (no grid / pipelining), so
    # residency = inputs + output + scratch; add headroom, cap at v7x's 64 MiB.
    resident = sum(int(np.prod(a.shape)) * 4 for a in args)
    resident += Bp * Op * 4 + (1 + n_seq) * T * Bp * 2 * Gp * 4
    vmem_limit = int(min(2 * resident + (16 << 20), 64 << 20))

    kern = functools.partial(_bilstm_fused_kernel, num_layers=num_layers,
                             seq_len=T, batch_pad=Bp, hidden=H, gate_pad=Gp)
    vmem_spec = pl.BlockSpec(memory_space=pltpu.MemorySpace.VMEM)
    out = pl.pallas_call(
        kern,
        out_shape=jax.ShapeDtypeStruct((Bp, Op), jnp.float32),
        in_specs=[vmem_spec] * len(args),
        out_specs=vmem_spec,
        scratch_shapes=scratch_shapes,
        compiler_params=pltpu.CompilerParams(vmem_limit_bytes=vmem_limit),
    )(*args)
    return out[:B, :output_dim]


# ----------------------------------------------------------------------------
# Pure-JAX reference (PyTorch eval-mode semantics) for correctness checking
# ----------------------------------------------------------------------------
def reference_forward(params, text_bte, hidden_dim, num_layers):
    H = hidden_dim
    B = text_bte.shape[0]
    layer_in = jnp.transpose(text_bte.astype(jnp.float32), (1, 0, 2))  # (T,B,E)

    def run_dir(x_seq, w_ih, w_hh, b_ih, b_hh):
        def step(carry, x_t):
            h, c = carry
            gates = x_t @ w_ih.T + h @ w_hh.T + b_ih + b_hh
            i = jax.nn.sigmoid(gates[:, 0 * H:1 * H])
            f = jax.nn.sigmoid(gates[:, 1 * H:2 * H])
            g = jnp.tanh(gates[:, 2 * H:3 * H])
            o = jax.nn.sigmoid(gates[:, 3 * H:4 * H])
            c = f * c + i * g
            h = o * jnp.tanh(c)
            return (h, c), h
        init = (jnp.zeros((B, H), jnp.float32), jnp.zeros((B, H), jnp.float32))
        (h_last, _), h_seq = jax.lax.scan(step, init, x_seq)
        return h_seq, h_last

    finals = None
    for layer in range(num_layers):
        hf_seq, hf_last = run_dir(layer_in, *params[f"l{layer}_fwd"])
        hb_seq_rev, hb_last = run_dir(layer_in[::-1], *params[f"l{layer}_bwd"])
        layer_in = jnp.concatenate([hf_seq, hb_seq_rev[::-1]], axis=-1)
        finals = (hf_last, hb_last)

    hidden_cat = jnp.concatenate(finals, axis=-1)
    return jnp.tanh(hidden_cat @ params["fc_w"].T + params["fc_b"])


# ----------------------------------------------------------------------------
if __name__ == "__main__":
    EMBEDDING_DIM = 16
    HIDDEN_DIM = 32
    OUTPUT_DIM = 1
    NUM_LAYERS = 2
    BATCH = 2
    SEQ = 8

    key = jax.random.PRNGKey(0)
    key, pkey, xkey = jax.random.split(key, 3)

    params = init_params(pkey, EMBEDDING_DIM, HIDDEN_DIM, OUTPUT_DIM,
                         NUM_LAYERS)
    packed = pack_params(params, EMBEDDING_DIM, HIDDEN_DIM, OUTPUT_DIM,
                         NUM_LAYERS)
    text = jax.random.normal(xkey, (BATCH, SEQ, EMBEDDING_DIM), jnp.float32)

    out = bilstm_sentiment_forward(packed, text, hidden_dim=HIDDEN_DIM,
                                   output_dim=OUTPUT_DIM,
                                   num_layers=NUM_LAYERS)
    out = jax.block_until_ready(out)

    ref = jax.block_until_ready(
        reference_forward(params, text, HIDDEN_DIM, NUM_LAYERS))

    assert out.shape == (BATCH, OUTPUT_DIM)
    assert bool(jnp.all(jnp.isfinite(out)))
    assert float(jnp.max(jnp.abs(out - ref))) < 5e-3
    print("KERNEL_OK")
</pallas_src>

<mosaic_0001>
module attributes {stable_mosaic.version = 11 : i64} {
  func.func @_bilstm_fused_kernel(%arg0: memref<64x128xf32, #tpu.memory_space<vmem>>, %arg1: memref<128x256xf32, #tpu.memory_space<vmem>>, %arg2: memref<256x256xf32, #tpu.memory_space<vmem>>, %arg3: memref<1x256xf32, #tpu.memory_space<vmem>>, %arg4: memref<256x256xf32, #tpu.memory_space<vmem>>, %arg5: memref<256x256xf32, #tpu.memory_space<vmem>>, %arg6: memref<1x256xf32, #tpu.memory_space<vmem>>, %arg7: memref<256x128xf32, #tpu.memory_space<vmem>>, %arg8: memref<1x128xf32, #tpu.memory_space<vmem>>, %arg9: memref<8x128xf32, #tpu.memory_space<vmem>>, %arg10: memref<64x256xf32, #tpu.memory_space<vmem>>, %arg11: memref<64x256xf32, #tpu.memory_space<vmem>>) attributes {dimension_semantics = [], scalar_prefetch = 0 : i64, scratch_operands = 2 : i64, tpu.core_type = #tpu.core_type<tc>} {
    %c0 = arith.constant 0 : index
    %c0_0 = arith.constant 0 : index
    %0 = vector.load %arg0[%c0, %c0_0] : memref<64x128xf32, #tpu.memory_space<vmem>>, vector<64x128xf32>
    %c0_1 = arith.constant 0 : index
    %c0_2 = arith.constant 0 : index
    %1 = vector.load %arg1[%c0_1, %c0_2] : memref<128x256xf32, #tpu.memory_space<vmem>>, vector<128x256xf32>
    %cst = arith.constant dense<0.000000e+00> : vector<64x256xf32>
    %2 = tpu.matmul %0, %1, %cst {dimension_numbers = #tpu.dot_dimension_numbers<[1], [0], [0], [1], [0, 0, 1, 1], [], []>} : vector<64x128xf32>, vector<128x256xf32>, vector<64x256xf32> -> vector<64x256xf32>
    %c0_3 = arith.constant 0 : index
    %c0_4 = arith.constant 0 : index
    %3 = vector.load %arg3[%c0_3, %c0_4] : memref<1x256xf32, #tpu.memory_space<vmem>>, vector<1x256xf32>
    %4 = vector.broadcast %3 : vector<1x256xf32> to vector<64x256xf32>
    %5 = arith.addf %2, %4 : vector<64x256xf32>
    %c0_5 = arith.constant 0 : index
    %c0_6 = arith.constant 0 : index
    %6 = vector.load %arg10[%c0_5, %c0_6] : memref<64x256xf32, #tpu.memory_space<vmem>>, vector<64x256xf32>
    tpu.vector_store %arg10[%c0_5, %c0_6], %5 {strides = array<i32>} : memref<64x256xf32, #tpu.memory_space<vmem>>, vector<64x256xf32>,
    %cst_7 = arith.constant 0.000000e+00 : f32
    %7 = vector.broadcast %cst_7 : f32 to vector<8x256xf32>
    %c0_i32 = arith.constant 0 : i32
    %c8_i32 = arith.constant 8 : i32
    %8 = arith.muli %c0_i32, %c8_i32 : i32
    %9 = tpu.assume_multiple %8, 8 : i32
    %c7_i32 = arith.constant 7 : i32
    %10 = arith.subi %c7_i32, %c0_i32 : i32
    %c8_i32_8 = arith.constant 8 : i32
    %11 = arith.muli %10, %c8_i32_8 : i32
    %12 = tpu.assume_multiple %11, 8 : i32
    %c0_9 = arith.constant 0 : index
    %c0_10 = arith.constant 0 : index
    %13 = vector.load %arg2[%c0_9, %c0_10] : memref<256x256xf32, #tpu.memory_space<vmem>>, vector<256x256xf32>
    %cst_11 = arith.constant dense<0.000000e+00> : vector<8x256xf32>
    %14 = tpu.matmul %7, %13, %cst_11 {dimension_numbers = #tpu.dot_dimension_numbers<[1], [0], [0], [1], [0, 0, 1, 1], [], []>} : vector<8x256xf32>, vector<256x256xf32>, vector<8x256xf32> -> vector<8x256xf32>
    %15 = arith.index_cast %9 : i32 to index
    %c0_12 = arith.constant 0 : index
    %16 = vector.load %arg10[%15, %c0_12] : memref<64x256xf32, #tpu.memory_space<vmem>>, vector<8x128xf32>
    %17 = vector.extract_strided_slice %14 {offsets = [0, 0], sizes = [8, 128], strides = [1, 1]} : vector<8x256xf32> to vector<8x128xf32>
    %18 = arith.addf %16, %17 : vector<8x128xf32>
    %19 = arith.index_cast %12 : i32 to index
    %c128 = arith.constant 128 : index
    %20 = vector.load %arg10[%19, %c128] : memref<64x256xf32, #tpu.memory_space<vmem>>, vector<8x128xf32>
    %21 = vector.extract_strided_slice %14 {offsets = [0, 128], sizes = [8, 128], strides = [1, 1]} : vector<8x256xf32> to vector<8x128xf32>
    %22 = arith.addf %20, %21 : vector<8x128xf32>
    %23 = vector.extract_strided_slice %7 {offsets = [0, 0], sizes = [8, 128], strides = [1, 1]} : vector<8x256xf32> to vector<8x128xf32>
    %24 = arith.negf %18 : vector<8x128xf32>
    %25 = math.exp %24 : vector<8x128xf32>
    %cst_13 = arith.constant 1.000000e+00 : f32
    %26 = vector.broadcast %cst_13 : f32 to vector<8x128xf32>
    %27 = arith.addf %26, %25 : vector<8x128xf32>
    %28 = arith.divf %26, %27 : vector<8x128xf32>
    %29 = math.tanh %18 : vector<8x128xf32>
    %c96_i32 = arith.constant 96 : i32
    %30 = tpu.dynamic_rotate %28 by %c96_i32 dim 1 : vector<8x128xf32>, i32 -> vector<8x128xf32>
    %c64_i32 = arith.constant 64 : i32
    %31 = tpu.dynamic_rotate %29 by %c64_i32 dim 1 : vector<8x128xf32>, i32 -> vector<8x128xf32>
    %c32_i32 = arith.constant 32 : i32
    %32 = tpu.dynamic_rotate %28 by %c32_i32 dim 1 : vector<8x128xf32>, i32 -> vector<8x128xf32>
    %33 = arith.mulf %30, %23 : vector<8x128xf32>
    %34 = arith.mulf %28, %31 : vector<8x128xf32>
    %35 = arith.addf %33, %34 : vector<8x128xf32>
    %36 = math.tanh %35 : vector<8x128xf32>
    %37 = arith.mulf %32, %36 : vector<8x128xf32>
    %38 = vector.extract_strided_slice %7 {offsets = [0, 128], sizes = [8, 128], strides = [1, 1]} : vector<8x256xf32> to vector<8x128xf32>
    %39 = arith.negf %22 : vector<8x128xf32>
    %40 = math.exp %39 : vector<8x128xf32>
    %cst_14 = arith.constant 1.000000e+00 : f32
    %41 = vector.broadcast %cst_14 : f32 to vector<8x128xf32>
    %42 = arith.addf %41, %40 : vector<8x128xf32>
    %43 = arith.divf %41, %42 : vector<8x128xf32>
    %44 = math.tanh %22 : vector<8x128xf32>
    %c96_i32_15 = arith.constant 96 : i32
    %45 = tpu.dynamic_rotate %43 by %c96_i32_15 dim 1 : vector<8x128xf32>, i32 -> vector<8x128xf32>
    %c64_i32_16 = arith.constant 64 : i32
    %46 = tpu.dynamic_rotate %44 by %c64_i32_16 dim 1 : vector<8x128xf32>, i32 -> vector<8x128xf32>
    %c32_i32_17 = arith.constant 32 : i32
    %47 = tpu.dynamic_rotate %43 by %c32_i32_17 dim 1 : vector<8x128xf32>, i32 -> vector<8x128xf32>
    %48 = arith.mulf %45, %38 : vector<8x128xf32>
    %49 = arith.mulf %43, %46 : vector<8x128xf32>
    %50 = arith.addf %48, %49 : vector<8x128xf32>
    %51 = math.tanh %50 : vector<8x128xf32>
    %52 = arith.mulf %47, %51 : vector<8x128xf32>
    %53 = arith.index_cast %9 : i32 to index
    %c0_18 = arith.constant 0 : index
    %54 = vector.load %arg11[%53, %c0_18] : memref<64x256xf32, #tpu.memory_space<vmem>>, vector<8x128xf32>
    tpu.vector_store %arg11[%53, %c0_18], %37 {strides = array<i32>} : memref<64x256xf32, #tpu.memory_space<vmem>>, vector<8x128xf32>,
    %55 = arith.index_cast %12 : i32 to index
    %c128_19 = arith.constant 128 : index
    %56 = vector.load %arg11[%55, %c128_19] : memref<64x256xf32, #tpu.memory_space<vmem>>, vector<8x128xf32>
    tpu.vector_store %arg11[%55, %c128_19], %52 {strides = array<i32>} : memref<64x256xf32, #tpu.memory_space<vmem>>, vector<8x128xf32>,
    %57 = tpu.concatenate %37, %52 in 1 : vector<8x128xf32>, vector<8x128xf32> -> vector<8x256xf32>
    %58 = tpu.concatenate %35, %50 in 1 : vector<8x128xf32>, vector<8x128xf32> -> vector<8x256xf32>
    %c1_i32 = arith.constant 1 : i32
    %c8_i32_20 = arith.constant 8 : i32
    %59 = arith.muli %c1_i32, %c8_i32_20 : i32
    %60 = tpu.assume_multiple %59, 8 : i32
    %c7_i32_21 = arith.constant 7 : i32
    %61 = arith.subi %c7_i32_21, %c1_i32 : i32
    %c8_i32_22 = arith.constant 8 : i32
    %62 = arith.muli %61, %c8_i32_22 : i32
    %63 = tpu.assume_multiple %62, 8 : i32
    %c0_23 = arith.constant 0 : index
    %c0_24 = arith.constant 0 : index
    %64 = vector.load %arg2[%c0_23, %c0_24] : memref<256x256xf32, #tpu.memory_space<vmem>>, vector<256x256xf32>
    %cst_25 = arith.constant dense<0.000000e+00> : vector<8x256xf32>
    %65 = tpu.matmul %57, %64, %cst_25 {dimension_numbers = #tpu.dot_dimension_numbers<[1], [0], [0], [1], [0, 0, 1, 1], [], []>} : vector<8x256xf32>, vector<256x256xf32>, vector<8x256xf32> -> vector<8x256xf32>
    %66 = arith.index_cast %60 : i32 to index
    %c0_26 = arith.constant 0 : index
    %67 = vector.load %arg10[%66, %c0_26] : memref<64x256xf32, #tpu.memory_space<vmem>>, vector<8x128xf32>
    %68 = vector.extract_strided_slice %65 {offsets = [0, 0], sizes = [8, 128], strides = [1, 1]} : vector<8x256xf32> to vector<8x128xf32>
    %69 = arith.addf %67, %68 : vector<8x128xf32>
    %70 = arith.index_cast %63 : i32 to index
    %c128_27 = arith.constant 128 : index
    %71 = vector.load %arg10[%70, %c128_27] : memref<64x256xf32, #tpu.memory_space<vmem>>, vector<8x128xf32>
    %72 = vector.extract_strided_slice %65 {offsets = [0, 128], sizes = [8, 128], strides = [1, 1]} : vector<8x256xf32> to vector<8x128xf32>
    %73 = arith.addf %71, %72 : vector<8x128xf32>
    %74 = vector.extract_strided_slice %58 {offsets = [0, 0], sizes = [8, 128], strides = [1, 1]} : vector<8x256xf32> to vector<8x128xf32>
    %75 = arith.negf %69 : vector<8x128xf32>
    %76 = math.exp %75 : vector<8x128xf32>
    %cst_28 = arith.constant 1.000000e+00 : f32
    %77 = vector.broadcast %cst_28 : f32 to vector<8x128xf32>
    %78 = arith.addf %77, %76 : vector<8x128xf32>
    %79 = arith.divf %77, %78 : vector<8x128xf32>
    %80 = math.tanh %69 : vector<8x128xf32>
    %c96_i32_29 = arith.constant 96 : i32
    %81 = tpu.dynamic_rotate %79 by %c96_i32_29 dim 1 : vector<8x128xf32>, i32 -> vector<8x128xf32>
    %c64_i32_30 = arith.constant 64 : i32
    %82 = tpu.dynamic_rotate %80 by %c64_i32_30 dim 1 : vector<8x128xf32>, i32 -> vector<8x128xf32>
    %c32_i32_31 = arith.constant 32 : i32
    %83 = tpu.dynamic_rotate %79 by %c32_i32_31 dim 1 : vector<8x128xf32>, i32 -> vector<8x128xf32>
    %84 = arith.mulf %81, %74 : vector<8x128xf32>
    %85 = arith.mulf %79, %82 : vector<8x128xf32>
    %86 = arith.addf %84, %85 : vector<8x128xf32>
    %87 = math.tanh %86 : vector<8x128xf32>
    %88 = arith.mulf %83, %87 : vector<8x128xf32>
    %89 = vector.extract_strided_slice %58 {offsets = [0, 128], sizes = [8, 128], strides = [1, 1]} : vector<8x256xf32> to vector<8x128xf32>
    %90 = arith.negf %73 : vector<8x128xf32>
    %91 = math.exp %90 : vector<8x128xf32>
    %cst_32 = arith.constant 1.000000e+00 : f32
    %92 = vector.broadcast %cst_32 : f32 to vector<8x128xf32>
    %93 = arith.addf %92, %91 : vector<8x128xf32>
    %94 = arith.divf %92, %93 : vector<8x128xf32>
    %95 = math.tanh %73 : vector<8x128xf32>
    %c96_i32_33 = arith.constant 96 : i32
    %96 = tpu.dynamic_rotate %94 by %c96_i32_33 dim 1 : vector<8x128xf32>, i32 -> vector<8x128xf32>
    %c64_i32_34 = arith.constant 64 : i32
    %97 = tpu.dynamic_rotate %95 by %c64_i32_34 dim 1 : vector<8x128xf32>, i32 -> vector<8x128xf32>
    %c32_i32_35 = arith.constant 32 : i32
    %98 = tpu.dynamic_rotate %94 by %c32_i32_35 dim 1 : vector<8x128xf32>, i32 -> vector<8x128xf32>
    %99 = arith.mulf %96, %89 : vector<8x128xf32>
    %100 = arith.mulf %94, %97 : vector<8x128xf32>
    %101 = arith.addf %99, %100 : vector<8x128xf32>
    %102 = math.tanh %101 : vector<8x128xf32>
    %103 = arith.mulf %98, %102 : vector<8x128xf32>
    %104 = arith.index_cast %60 : i32 to index
    %c0_36 = arith.constant 0 : index
    %105 = vector.load %arg11[%104, %c0_36] : memref<64x256xf32, #tpu.memory_space<vmem>>, vector<8x128xf32>
    tpu.vector_store %arg11[%104, %c0_36], %88 {strides = array<i32>} : memref<64x256xf32, #tpu.memory_space<vmem>>, vector<8x128xf32>,
    %106 = arith.index_cast %63 : i32 to index
    %c128_37 = arith.constant 128 : index
    %107 = vector.load %arg11[%106, %c128_37] : memref<64x256xf32, #tpu.memory_space<vmem>>, vector<8x128xf32>
    tpu.vector_store %arg11[%106, %c128_37], %103 {strides = array<i32>} : memref<64x256xf32, #tpu.memory_space<vmem>>, vector<8x128xf32>,
    %108 = tpu.concatenate %88, %103 in 1 : vector<8x128xf32>, vector<8x128xf32> -> vector<8x256xf32>
    %109 = tpu.concatenate %86, %101 in 1 : vector<8x128xf32>, vector<8x128xf32> -> vector<8x256xf32>
    %c2_i32 = arith.constant 2 : i32
    %c8_i32_38 = arith.constant 8 : i32
    %110 = arith.muli %c2_i32, %c8_i32_38 : i32
    %111 = tpu.assume_multiple %110, 8 : i32
    %c7_i32_39 = arith.constant 7 : i32
    %112 = arith.subi %c7_i32_39, %c2_i32 : i32
    %c8_i32_40 = arith.constant 8 : i32
    %113 = arith.muli %112, %c8_i32_40 : i32
    %114 = tpu.assume_multiple %113, 8 : i32
    %c0_41 = arith.constant 0 : index
    %c0_42 = arith.constant 0 : index
    %115 = vector.load %arg2[%c0_41, %c0_42] : memref<256x256xf32, #tpu.memory_space<vmem>>, vector<256x256xf32>
    %cst_43 = arith.constant dense<0.000000e+00> : vector<8x256xf32>
    %116 = tpu.matmul %108, %115, %cst_43 {dimension_numbers = #tpu.dot_dimension_numbers<[1], [0], [0], [1], [0, 0, 1, 1], [], []>} : vector<8x256xf32>, vector<256x256xf32>, vector<8x256xf32> -> vector<8x256xf32>
    %117 = arith.index_cast %111 : i32 to index
    %c0_44 = arith.constant 0 : index
    %118 = vector.load %arg10[%117, %c0_44] : memref<64x256xf32, #tpu.memory_space<vmem>>, vector<8x128xf32>
    %119 = vector.extract_strided_slice %116 {offsets = [0, 0], sizes = [8, 128], strides = [1, 1]} : vector<8x256xf32> to vector<8x128xf32>
    %120 = arith.addf %118, %119 : vector<8x128xf32>
    %121 = arith.index_cast %114 : i32 to index
    %c128_45 = arith.constant 128 : index
    %122 = vector.load %arg10[%121, %c128_45] : memref<64x256xf32, #tpu.memory_space<vmem>>, vector<8x128xf32>
    %123 = vector.extract_strided_slice %116 {offsets = [0, 128], sizes = [8, 128], strides = [1, 1]} : vector<8x256xf32> to vector<8x128xf32>
    %124 = arith.addf %122, %123 : vector<8x128xf32>
    %125 = vector.extract_strided_slice %109 {offsets = [0, 0], sizes = [8, 128], strides = [1, 1]} : vector<8x256xf32> to vector<8x128xf32>
    %126 = arith.negf %120 : vector<8x128xf32>
    %127 = math.exp %126 : vector<8x128xf32>
    %cst_46 = arith.constant 1.000000e+00 : f32
    %128 = vector.broadcast %cst_46 : f32 to vector<8x128xf32>
    %129 = arith.addf %128, %127 : vector<8x128xf32>
    %130 = arith.divf %128, %129 : vector<8x128xf32>
    %131 = math.tanh %120 : vector<8x128xf32>
    %c96_i32_47 = arith.constant 96 : i32
    %132 = tpu.dynamic_rotate %130 by %c96_i32_47 dim 1 : vector<8x128xf32>, i32 -> vector<8x128xf32>
    %c64_i32_48 = arith.constant 64 : i32
    %133 = tpu.dynamic_rotate %131 by %c64_i32_48 dim 1 : vector<8x128xf32>, i32 -> vector<8x128xf32>
    %c32_i32_49 = arith.constant 32 : i32
    %134 = tpu.dynamic_rotate %130 by %c32_i32_49 dim 1 : vector<8x128xf32>, i32 -> vector<8x128xf32>
    %135 = arith.mulf %132, %125 : vector<8x128xf32>
    %136 = arith.mulf %130, %133 : vector<8x128xf32>
    %137 = arith.addf %135, %136 : vector<8x128xf32>
    %138 = math.tanh %137 : vector<8x128xf32>
    %139 = arith.mulf %134, %138 : vector<8x128xf32>
    %140 = vector.extract_strided_slice %109 {offsets = [0, 128], sizes = [8, 128], strides = [1, 1]} : vector<8x256xf32> to vector<8x128xf32>
    %141 = arith.negf %124 : vector<8x128xf32>
    %142 = math.exp %141 : vector<8x128xf32>
    %cst_50 = arith.constant 1.000000e+00 : f32
    %143 = vector.broadcast %cst_50 : f32 to vector<8x128xf32>
    %144 = arith.addf %143, %142 : vector<8x128xf32>
    %145 = arith.divf %143, %144 : vector<8x128xf32>
    %146 = math.tanh %124 : vector<8x128xf32>
    %c96_i32_51 = arith.constant 96 : i32
    %147 = tpu.dynamic_rotate %145 by %c96_i32_51 dim 1 : vector<8x128xf32>, i32 -> vector<8x128xf32>
    %c64_i32_52 = arith.constant 64 : i32
    %148 = tpu.dynamic_rotate %146 by %c64_i32_52 dim 1 : vector<8x128xf32>, i32 -> vector<8x128xf32>
    %c32_i32_53 = arith.constant 32 : i32
    %149 = tpu.dynamic_rotate %145 by %c32_i32_53 dim 1 : vector<8x128xf32>, i32 -> vector<8x128xf32>
    %150 = arith.mulf %147, %140 : vector<8x128xf32>
    %151 = arith.mulf %145, %148 : vector<8x128xf32>
    %152 = arith.addf %150, %151 : vector<8x128xf32>
    %153 = math.tanh %152 : vector<8x128xf32>
    %154 = arith.mulf %149, %153 : vector<8x128xf32>
    %155 = arith.index_cast %111 : i32 to index
    %c0_54 = arith.constant 0 : index
    %156 = vector.load %arg11[%155, %c0_54] : memref<64x256xf32, #tpu.memory_space<vmem>>, vector<8x128xf32>
    tpu.vector_store %arg11[%155, %c0_54], %139 {strides = array<i32>} : memref<64x256xf32, #tpu.memory_space<vmem>>, vector<8x128xf32>,
    %157 = arith.index_cast %114 : i32 to index
    %c128_55 = arith.constant 128 : index
    %158 = vector.load %arg11[%157, %c128_55] : memref<64x256xf32, #tpu.memory_space<vmem>>, vector<8x128xf32>
    tpu.vector_store %arg11[%157, %c128_55], %154 {strides = array<i32>} : memref<64x256xf32, #tpu.memory_space<vmem>>, vector<8x128xf32>,
    %159 = tpu.concatenate %139, %154 in 1 : vector<8x128xf32>, vector<8x128xf32> -> vector<8x256xf32>
    %160 = tpu.concatenate %137, %152 in 1 : vector<8x128xf32>, vector<8x128xf32> -> vector<8x256xf32>
    %c3_i32 = arith.constant 3 : i32
    %c8_i32_56 = arith.constant 8 : i32
    %161 = arith.muli %c3_i32, %c8_i32_56 : i32
    %162 = tpu.assume_multiple %161, 8 : i32
    %c7_i32_57 = arith.constant 7 : i32
    %163 = arith.subi %c7_i32_57, %c3_i32 : i32
    %c8_i32_58 = arith.constant 8 : i32
    %164 = arith.muli %163, %c8_i32_58 : i32
    %165 = tpu.assume_multiple %164, 8 : i32
    %c0_59 = arith.constant 0 : index
    %c0_60 = arith.constant 0 : index
    %166 = vector.load %arg2[%c0_59, %c0_60] : memref<256x256xf32, #tpu.memory_space<vmem>>, vector<256x256xf32>
    %cst_61 = arith.constant dense<0.000000e+00> : vector<8x256xf32>
    %167 = tpu.matmul %159, %166, %cst_61 {dimension_numbers = #tpu.dot_dimension_numbers<[1], [0], [0], [1], [0, 0, 1, 1], [], []>} : vector<8x256xf32>, vector<256x256xf32>, vector<8x256xf32> -> vector<8x256xf32>
    %168 = arith.index_cast %162 : i32 to index
    %c0_62 = arith.constant 0 : index
    %169 = vector.load %arg10[%168, %c0_62] : memref<64x256xf32, #tpu.memory_space<vmem>>, vector<8x128xf32>
    %170 = vector.extract_strided_slice %167 {offsets = [0, 0], sizes = [8, 128], strides = [1, 1]} : vector<8x256xf32> to vector<8x128xf32>
    %171 = arith.addf %169, %170 : vector<8x128xf32>
    %172 = arith.index_cast %165 : i32 to index
    %c128_63 = arith.constant 128 : index
    %173 = vector.load %arg10[%172, %c128_63] : memref<64x256xf32, #tpu.memory_space<vmem>>, vector<8x128xf32>
    %174 = vector.extract_strided_slice %167 {offsets = [0, 128], sizes = [8, 128], strides = [1, 1]} : vector<8x256xf32> to vector<8x128xf32>
    %175 = arith.addf %173, %174 : vector<8x128xf32>
    %176 = vector.extract_strided_slice %160 {offsets = [0, 0], sizes = [8, 128], strides = [1, 1]} : vector<8x256xf32> to vector<8x128xf32>
    %177 = arith.negf %171 : vector<8x128xf32>
    %178 = math.exp %177 : vector<8x128xf32>
    %cst_64 = arith.constant 1.000000e+00 : f32
    %179 = vector.broadcast %cst_64 : f32 to vector<8x128xf32>
    %180 = arith.addf %179, %178 : vector<8x128xf32>
    %181 = arith.divf %179, %180 : vector<8x128xf32>
    %182 = math.tanh %171 : vector<8x128xf32>
    %c96_i32_65 = arith.constant 96 : i32
    %183 = tpu.dynamic_rotate %181 by %c96_i32_65 dim 1 : vector<8x128xf32>, i32 -> vector<8x128xf32>
    %c64_i32_66 = arith.constant 64 : i32
    %184 = tpu.dynamic_rotate %182 by %c64_i32_66 dim 1 : vector<8x128xf32>, i32 -> vector<8x128xf32>
    %c32_i32_67 = arith.constant 32 : i32
    %185 = tpu.dynamic_rotate %181 by %c32_i32_67 dim 1 : vector<8x128xf32>, i32 -> vector<8x128xf32>
    %186 = arith.mulf %183, %176 : vector<8x128xf32>
    %187 = arith.mulf %181, %184 : vector<8x128xf32>
    %188 = arith.addf %186, %187 : vector<8x128xf32>
    %189 = math.tanh %188 : vector<8x128xf32>
    %190 = arith.mulf %185, %189 : vector<8x128xf32>
    %191 = vector.extract_strided_slice %160 {offsets = [0, 128], sizes = [8, 128], strides = [1, 1]} : vector<8x256xf32> to vector<8x128xf32>
    %192 = arith.negf %175 : vector<8x128xf32>
    %193 = math.exp %192 : vector<8x128xf32>
    %cst_68 = arith.constant 1.000000e+00 : f32
    %194 = vector.broadcast %cst_68 : f32 to vector<8x128xf32>
    %195 = arith.addf %194, %193 : vector<8x128xf32>
    %196 = arith.divf %194, %195 : vector<8x128xf32>
    %197 = math.tanh %175 : vector<8x128xf32>
    %c96_i32_69 = arith.constant 96 : i32
    %198 = tpu.dynamic_rotate %196 by %c96_i32_69 dim 1 : vector<8x128xf32>, i32 -> vector<8x128xf32>
    %c64_i32_70 = arith.constant 64 : i32
    %199 = tpu.dynamic_rotate %197 by %c64_i32_70 dim 1 : vector<8x128xf32>, i32 -> vector<8x128xf32>
    %c32_i32_71 = arith.constant 32 : i32
    %200 = tpu.dynamic_rotate %196 by %c32_i32_71 dim 1 : vector<8x128xf32>, i32 -> vector<8x128xf32>
    %201 = arith.mulf %198, %191 : vector<8x128xf32>
    %202 = arith.mulf %196, %199 : vector<8x128xf32>
    %203 = arith.addf %201, %202 : vector<8x128xf32>
    %204 = math.tanh %203 : vector<8x128xf32>
    %205 = arith.mulf %200, %204 : vector<8x128xf32>
    %206 = arith.index_cast %162 : i32 to index
    %c0_72 = arith.constant 0 : index
    %207 = vector.load %arg11[%206, %c0_72] : memref<64x256xf32, #tpu.memory_space<vmem>>, vector<8x128xf32>
    tpu.vector_store %arg11[%206, %c0_72], %190 {strides = array<i32>} : memref<64x256xf32, #tpu.memory_space<vmem>>, vector<8x128xf32>,
    %208 = arith.index_cast %165 : i32 to index
    %c128_73 = arith.constant 128 : index
    %209 = vector.load %arg11[%208, %c128_73] : memref<64x256xf32, #tpu.memory_space<vmem>>, vector<8x128xf32>
    tpu.vector_store %arg11[%208, %c128_73], %205 {strides = array<i32>} : memref<64x256xf32, #tpu.memory_space<vmem>>, vector<8x128xf32>,
    %210 = tpu.concatenate %190, %205 in 1 : vector<8x128xf32>, vector<8x128xf32> -> vector<8x256xf32>
    %211 = tpu.concatenate %188, %203 in 1 : vector<8x128xf32>, vector<8x128xf32> -> vector<8x256xf32>
    %c4_i32 = arith.constant 4 : i32
    %c8_i32_74 = arith.constant 8 : i32
    %212 = arith.muli %c4_i32, %c8_i32_74 : i32
    %213 = tpu.assume_multiple %212, 8 : i32
    %c7_i32_75 = arith.constant 7 : i32
    %214 = arith.subi %c7_i32_75, %c4_i32 : i32
    %c8_i32_76 = arith.constant 8 : i32
    %215 = arith.muli %214, %c8_i32_76 : i32
    %216 = tpu.assume_multiple %215, 8 : i32
    %c0_77 = arith.constant 0 : index
    %c0_78 = arith.constant 0 : index
    %217 = vector.load %arg2[%c0_77, %c0_78] : memref<256x256xf32, #tpu.memory_space<vmem>>, vector<256x256xf32>
    %cst_79 = arith.constant dense<0.000000e+00> : vector<8x256xf32>
    %218 = tpu.matmul %210, %217, %cst_79 {dimension_numbers = #tpu.dot_dimension_numbers<[1], [0], [0], [1], [0, 0, 1, 1], [], []>} : vector<8x256xf32>, vector<256x256xf32>, vector<8x256xf32> -> vector<8x256xf32>
    %219 = arith.index_cast %213 : i32 to index
    %c0_80 = arith.constant 0 : index
    %220 = vector.load %arg10[%219, %c0_80] : memref<64x256xf32, #tpu.memory_space<vmem>>, vector<8x128xf32>
    %221 = vector.extract_strided_slice %218 {offsets = [0, 0], sizes = [8, 128], strides = [1, 1]} : vector<8x256xf32> to vector<8x128xf32>
    %222 = arith.addf %220, %221 : vector<8x128xf32>
    %223 = arith.index_cast %216 : i32 to index
    %c128_81 = arith.constant 128 : index
    %224 = vector.load %arg10[%223, %c128_81] : memref<64x256xf32, #tpu.memory_space<vmem>>, vector<8x128xf32>
    %225 = vector.extract_strided_slice %218 {offsets = [0, 128], sizes = [8, 128], strides = [1, 1]} : vector<8x256xf32> to vector<8x128xf32>
    %226 = arith.addf %224, %225 : vector<8x128xf32>
    %227 = vector.extract_strided_slice %211 {offsets = [0, 0], sizes = [8, 128], strides = [1, 1]} : vector<8x256xf32> to vector<8x128xf32>
    %228 = arith.negf %222 : vector<8x128xf32>
    %229 = math.exp %228 : vector<8x128xf32>
    %cst_82 = arith.constant 1.000000e+00 : f32
    %230 = vector.broadcast %cst_82 : f32 to vector<8x128xf32>
    %231 = arith.addf %230, %229 : vector<8x128xf32>
    %232 = arith.divf %230, %231 : vector<8x128xf32>
    %233 = math.tanh %222 : vector<8x128xf32>
    %c96_i32_83 = arith.constant 96 : i32
    %234 = tpu.dynamic_rotate %232 by %c96_i32_83 dim 1 : vector<8x128xf32>, i32 -> vector<8x128xf32>
    %c64_i32_84 = arith.constant 64 : i32
    %235 = tpu.dynamic_rotate %233 by %c64_i32_84 dim 1 : vector<8x128xf32>, i32 -> vector<8x128xf32>
    %c32_i32_85 = arith.constant 32 : i32
    %236 = tpu.dynamic_rotate %232 by %c32_i32_85 dim 1 : vector<8x128xf32>, i32 -> vector<8x128xf32>
    %237 = arith.mulf %234, %227 : vector<8x128xf32>
    %238 = arith.mulf %232, %235 : vector<8x128xf32>
    %239 = arith.addf %237, %238 : vector<8x128xf32>
    %240 = math.tanh %239 : vector<8x128xf32>
    %241 = arith.mulf %236, %240 : vector<8x128xf32>
    %242 = vector.extract_strided_slice %211 {offsets = [0, 128], sizes = [8, 128], strides = [1, 1]} : vector<8x256xf32> to vector<8x128xf32>
    %243 = arith.negf %226 : vector<8x128xf32>
    %244 = math.exp %243 : vector<8x128xf32>
    %cst_86 = arith.constant 1.000000e+00 : f32
    %245 = vector.broadcast %cst_86 : f32 to vector<8x128xf32>
    %246 = arith.addf %245, %244 : vector<8x128xf32>
    %247 = arith.divf %245, %246 : vector<8x128xf32>
    %248 = math.tanh %226 : vector<8x128xf32>
    %c96_i32_87 = arith.constant 96 : i32
    %249 = tpu.dynamic_rotate %247 by %c96_i32_87 dim 1 : vector<8x128xf32>, i32 -> vector<8x128xf32>
    %c64_i32_88 = arith.constant 64 : i32
    %250 = tpu.dynamic_rotate %248 by %c64_i32_88 dim 1 : vector<8x128xf32>, i32 -> vector<8x128xf32>
    %c32_i32_89 = arith.constant 32 : i32
    %251 = tpu.dynamic_rotate %247 by %c32_i32_89 dim 1 : vector<8x128xf32>, i32 -> vector<8x128xf32>
    %252 = arith.mulf %249, %242 : vector<8x128xf32>
    %253 = arith.mulf %247, %250 : vector<8x128xf32>
    %254 = arith.addf %252, %253 : vector<8x128xf32>
    %255 = math.tanh %254 : vector<8x128xf32>
    %256 = arith.mulf %251, %255 : vector<8x128xf32>
    %257 = arith.index_cast %213 : i32 to index
    %c0_90 = arith.constant 0 : index
    %258 = vector.load %arg11[%257, %c0_90] : memref<64x256xf32, #tpu.memory_space<vmem>>, vector<8x128xf32>
    tpu.vector_store %arg11[%257, %c0_90], %241 {strides = array<i32>} : memref<64x256xf32, #tpu.memory_space<vmem>>, vector<8x128xf32>,
    %259 = arith.index_cast %216 : i32 to index
    %c128_91 = arith.constant 128 : index
    %260 = vector.load %arg11[%259, %c128_91] : memref<64x256xf32, #tpu.memory_space<vmem>>, vector<8x128xf32>
    tpu.vector_store %arg11[%259, %c128_91], %256 {strides = array<i32>} : memref<64x256xf32, #tpu.memory_space<vmem>>, vector<8x128xf32>,
    %261 = tpu.concatenate %241, %256 in 1 : vector<8x128xf32>, vector<8x128xf32> -> vector<8x256xf32>
    %262 = tpu.concatenate %239, %254 in 1 : vector<8x128xf32>, vector<8x128xf32> -> vector<8x256xf32>
    %c5_i32 = arith.constant 5 : i32
    %c8_i32_92 = arith.constant 8 : i32
    %263 = arith.muli %c5_i32, %c8_i32_92 : i32
    %264 = tpu.assume_multiple %263, 8 : i32
    %c7_i32_93 = arith.constant 7 : i32
    %265 = arith.subi %c7_i32_93, %c5_i32 : i32
    %c8_i32_94 = arith.constant 8 : i32
    %266 = arith.muli %265, %c8_i32_94 : i32
    %267 = tpu.assume_multiple %266, 8 : i32
    %c0_95 = arith.constant 0 : index
    %c0_96 = arith.constant 0 : index
    %268 = vector.load %arg2[%c0_95, %c0_96] : memref<256x256xf32, #tpu.memory_space<vmem>>, vector<256x256xf32>
    %cst_97 = arith.constant dense<0.000000e+00> : vector<8x256xf32>
    %269 = tpu.matmul %261, %268, %cst_97 {dimension_numbers = #tpu.dot_dimension_numbers<[1], [0], [0], [1], [0, 0, 1, 1], [], []>} : vector<8x256xf32>, vector<256x256xf32>, vector<8x256xf32> -> vector<8x256xf32>
    %270 = arith.index_cast %264 : i32 to index
    %c0_98 = arith.constant 0 : index
    %271 = vector.load %arg10[%270, %c0_98] : memref<64x256xf32, #tpu.memory_space<vmem>>, vector<8x128xf32>
    %272 = vector.extract_strided_slice %269 {offsets = [0, 0], sizes = [8, 128], strides = [1, 1]} : vector<8x256xf32> to vector<8x128xf32>
    %273 = arith.addf %271, %272 : vector<8x128xf32>
    %274 = arith.index_cast %267 : i32 to index
    %c128_99 = arith.constant 128 : index
    %275 = vector.load %arg10[%274, %c128_99] : memref<64x256xf32, #tpu.memory_space<vmem>>, vector<8x128xf32>
    %276 = vector.extract_strided_slice %269 {offsets = [0, 128], sizes = [8, 128], strides = [1, 1]} : vector<8x256xf32> to vector<8x128xf32>
    %277 = arith.addf %275, %276 : vector<8x128xf32>
    %278 = vector.extract_strided_slice %262 {offsets = [0, 0], sizes = [8, 128], strides = [1, 1]} : vector<8x256xf32> to vector<8x128xf32>
    %279 = arith.negf %273 : vector<8x128xf32>
    %280 = math.exp %279 : vector<8x128xf32>
    %cst_100 = arith.constant 1.000000e+00 : f32
    %281 = vector.broadcast %cst_100 : f32 to vector<8x128xf32>
    %282 = arith.addf %281, %280 : vector<8x128xf32>
    %283 = arith.divf %281, %282 : vector<8x128xf32>
    %284 = math.tanh %273 : vector<8x128xf32>
    %c96_i32_101 = arith.constant 96 : i32
    %285 = tpu.dynamic_rotate %283 by %c96_i32_101 dim 1 : vector<8x128xf32>, i32 -> vector<8x128xf32>
    %c64_i32_102 = arith.constant 64 : i32
    %286 = tpu.dynamic_rotate %284 by %c64_i32_102 dim 1 : vector<8x128xf32>, i32 -> vector<8x128xf32>
    %c32_i32_103 = arith.constant 32 : i32
    %287 = tpu.dynamic_rotate %283 by %c32_i32_103 dim 1 : vector<8x128xf32>, i32 -> vector<8x128xf32>
    %288 = arith.mulf %285, %278 : vector<8x128xf32>
    %289 = arith.mulf %283, %286 : vector<8x128xf32>
    %290 = arith.addf %288, %289 : vector<8x128xf32>
    %291 = math.tanh %290 : vector<8x128xf32>
    %292 = arith.mulf %287, %291 : vector<8x128xf32>
    %293 = vector.extract_strided_slice %262 {offsets = [0, 128], sizes = [8, 128], strides = [1, 1]} : vector<8x256xf32> to vector<8x128xf32>
    %294 = arith.negf %277 : vector<8x128xf32>
    %295 = math.exp %294 : vector<8x128xf32>
    %cst_104 = arith.constant 1.000000e+00 : f32
    %296 = vector.broadcast %cst_104 : f32 to vector<8x128xf32>
    %297 = arith.addf %296, %295 : vector<8x128xf32>
    %298 = arith.divf %296, %297 : vector<8x128xf32>
    %299 = math.tanh %277 : vector<8x128xf32>
    %c96_i32_105 = arith.constant 96 : i32
    %300 = tpu.dynamic_rotate %298 by %c96_i32_105 dim 1 : vector<8x128xf32>, i32 -> vector<8x128xf32>
    %c64_i32_106 = arith.constant 64 : i32
    %301 = tpu.dynamic_rotate %299 by %c64_i32_106 dim 1 : vector<8x128xf32>, i32 -> vector<8x128xf32>
    %c32_i32_107 = arith.constant 32 : i32
    %302 = tpu.dynamic_rotate %298 by %c32_i32_107 dim 1 : vector<8x128xf32>, i32 -> vector<8x128xf32>
    %303 = arith.mulf %300, %293 : vector<8x128xf32>
    %304 = arith.mulf %298, %301 : vector<8x128xf32>
    %305 = arith.addf %303, %304 : vector<8x128xf32>
    %306 = math.tanh %305 : vector<8x128xf32>
    %307 = arith.mulf %302, %306 : vector<8x128xf32>
    %308 = arith.index_cast %264 : i32 to index
    %c0_108 = arith.constant 0 : index
    %309 = vector.load %arg11[%308, %c0_108] : memref<64x256xf32, #tpu.memory_space<vmem>>, vector<8x128xf32>
    tpu.vector_store %arg11[%308, %c0_108], %292 {strides = array<i32>} : memref<64x256xf32, #tpu.memory_space<vmem>>, vector<8x128xf32>,
    %310 = arith.index_cast %267 : i32 to index
    %c128_109 = arith.constant 128 : index
    %311 = vector.load %arg11[%310, %c128_109] : memref<64x256xf32, #tpu.memory_space<vmem>>, vector<8x128xf32>
    tpu.vector_store %arg11[%310, %c128_109], %307 {strides = array<i32>} : memref<64x256xf32, #tpu.memory_space<vmem>>, vector<8x128xf32>,
    %312 = tpu.concatenate %292, %307 in 1 : vector<8x128xf32>, vector<8x128xf32> -> vector<8x256xf32>
    %313 = tpu.concatenate %290, %305 in 1 : vector<8x128xf32>, vector<8x128xf32> -> vector<8x256xf32>
    %c6_i32 = arith.constant 6 : i32
    %c8_i32_110 = arith.constant 8 : i32
    %314 = arith.muli %c6_i32, %c8_i32_110 : i32
    %315 = tpu.assume_multiple %314, 8 : i32
    %c7_i32_111 = arith.constant 7 : i32
    %316 = arith.subi %c7_i32_111, %c6_i32 : i32
    %c8_i32_112 = arith.constant 8 : i32
    %317 = arith.muli %316, %c8_i32_112 : i32
    %318 = tpu.assume_multiple %317, 8 : i32
    %c0_113 = arith.constant 0 : index
    %c0_114 = arith.constant 0 : index
    %319 = vector.load %arg2[%c0_113, %c0_114] : memref<256x256xf32, #tpu.memory_space<vmem>>, vector<256x256xf32>
    %cst_115 = arith.constant dense<0.000000e+00> : vector<8x256xf32>
    %320 = tpu.matmul %312, %319, %cst_115 {dimension_numbers = #tpu.dot_dimension_numbers<[1], [0], [0], [1], [0, 0, 1, 1], [], []>} : vector<8x256xf32>, vector<256x256xf32>, vector<8x256xf32> -> vector<8x256xf32>
    %321 = arith.index_cast %315 : i32 to index
    %c0_116 = arith.constant 0 : index
    %322 = vector.load %arg10[%321, %c0_116] : memref<64x256xf32, #tpu.memory_space<vmem>>, vector<8x128xf32>
    %323 = vector.extract_strided_slice %320 {offsets = [0, 0], sizes = [8, 128], strides = [1, 1]} : vector<8x256xf32> to vector<8x128xf32>
    %324 = arith.addf %322, %323 : vector<8x128xf32>
    %325 = arith.index_cast %318 : i32 to index
    %c128_117 = arith.constant 128 : index
    %326 = vector.load %arg10[%325, %c128_117] : memref<64x256xf32, #tpu.memory_space<vmem>>, vector<8x128xf32>
    %327 = vector.extract_strided_slice %320 {offsets = [0, 128], sizes = [8, 128], strides = [1, 1]} : vector<8x256xf32> to vector<8x128xf32>
    %328 = arith.addf %326, %327 : vector<8x128xf32>
    %329 = vector.extract_strided_slice %313 {offsets = [0, 0], sizes = [8, 128], strides = [1, 1]} : vector<8x256xf32> to vector<8x128xf32>
    %330 = arith.negf %324 : vector<8x128xf32>
    %331 = math.exp %330 : vector<8x128xf32>
    %cst_118 = arith.constant 1.000000e+00 : f32
    %332 = vector.broadcast %cst_118 : f32 to vector<8x128xf32>
    %333 = arith.addf %332, %331 : vector<8x128xf32>
    %334 = arith.divf %332, %333 : vector<8x128xf32>
    %335 = math.tanh %324 : vector<8x128xf32>
    %c96_i32_119 = arith.constant 96 : i32
    %336 = tpu.dynamic_rotate %334 by %c96_i32_119 dim 1 : vector<8x128xf32>, i32 -> vector<8x128xf32>
    %c64_i32_120 = arith.constant 64 : i32
    %337 = tpu.dynamic_rotate %335 by %c64_i32_120 dim 1 : vector<8x128xf32>, i32 -> vector<8x128xf32>
    %c32_i32_121 = arith.constant 32 : i32
    %338 = tpu.dynamic_rotate %334 by %c32_i32_121 dim 1 : vector<8x128xf32>, i32 -> vector<8x128xf32>
    %339 = arith.mulf %336, %329 : vector<8x128xf32>
    %340 = arith.mulf %334, %337 : vector<8x128xf32>
    %341 = arith.addf %339, %340 : vector<8x128xf32>
    %342 = math.tanh %341 : vector<8x128xf32>
    %343 = arith.mulf %338, %342 : vector<8x128xf32>
    %344 = vector.extract_strided_slice %313 {offsets = [0, 128], sizes = [8, 128], strides = [1, 1]} : vector<8x256xf32> to vector<8x128xf32>
    %345 = arith.negf %328 : vector<8x128xf32>
    %346 = math.exp %345 : vector<8x128xf32>
    %cst_122 = arith.constant 1.000000e+00 : f32
    %347 = vector.broadcast %cst_122 : f32 to vector<8x128xf32>
    %348 = arith.addf %347, %346 : vector<8x128xf32>
    %349 = arith.divf %347, %348 : vector<8x128xf32>
    %350 = math.tanh %328 : vector<8x128xf32>
    %c96_i32_123 = arith.constant 96 : i32
    %351 = tpu.dynamic_rotate %349 by %c96_i32_123 dim 1 : vector<8x128xf32>, i32 -> vector<8x128xf32>
    %c64_i32_124 = arith.constant 64 : i32
    %352 = tpu.dynamic_rotate %350 by %c64_i32_124 dim 1 : vector<8x128xf32>, i32 -> vector<8x128xf32>
    %c32_i32_125 = arith.constant 32 : i32
    %353 = tpu.dynamic_rotate %349 by %c32_i32_125 dim 1 : vector<8x128xf32>, i32 -> vector<8x128xf32>
    %354 = arith.mulf %351, %344 : vector<8x128xf32>
    %355 = arith.mulf %349, %352 : vector<8x128xf32>
    %356 = arith.addf %354, %355 : vector<8x128xf32>
    %357 = math.tanh %356 : vector<8x128xf32>
    %358 = arith.mulf %353, %357 : vector<8x128xf32>
    %359 = arith.index_cast %315 : i32 to index
    %c0_126 = arith.constant 0 : index
    %360 = vector.load %arg11[%359, %c0_126] : memref<64x256xf32, #tpu.memory_space<vmem>>, vector<8x128xf32>
    tpu.vector_store %arg11[%359, %c0_126], %343 {strides = array<i32>} : memref<64x256xf32, #tpu.memory_space<vmem>>, vector<8x128xf32>,
    %361 = arith.index_cast %318 : i32 to index
    %c128_127 = arith.constant 128 : index
    %362 = vector.load %arg11[%361, %c128_127] : memref<64x256xf32, #tpu.memory_space<vmem>>, vector<8x128xf32>
    tpu.vector_store %arg11[%361, %c128_127], %358 {strides = array<i32>} : memref<64x256xf32, #tpu.memory_space<vmem>>, vector<8x128xf32>,
    %363 = tpu.concatenate %343, %358 in 1 : vector<8x128xf32>, vector<8x128xf32> -> vector<8x256xf32>
    %364 = tpu.concatenate %341, %356 in 1 : vector<8x128xf32>, vector<8x128xf32> -> vector<8x256xf32>
    %c7_i32_128 = arith.constant 7 : i32
    %c8_i32_129 = arith.constant 8 : i32
    %365 = arith.muli %c7_i32_128, %c8_i32_129 : i32
    %366 = tpu.assume_multiple %365, 8 : i32
    %c7_i32_130 = arith.constant 7 : i32
    %367 = arith.subi %c7_i32_130, %c7_i32_128 : i32
    %c8_i32_131 = arith.constant 8 : i32
    %368 = arith.muli %367, %c8_i32_131 : i32
    %369 = tpu.assume_multiple %368, 8 : i32
    %c0_132 = arith.constant 0 : index
    %c0_133 = arith.constant 0 : index
    %370 = vector.load %arg2[%c0_132, %c0_133] : memref<256x256xf32, #tpu.memory_space<vmem>>, vector<256x256xf32>
    %cst_134 = arith.constant dense<0.000000e+00> : vector<8x256xf32>
    %371 = tpu.matmul %363, %370, %cst_134 {dimension_numbers = #tpu.dot_dimension_numbers<[1], [0], [0], [1], [0, 0, 1, 1], [], []>} : vector<8x256xf32>, vector<256x256xf32>, vector<8x256xf32> -> vector<8x256xf32>
    %372 = arith.index_cast %366 : i32 to index
    %c0_135 = arith.constant 0 : index
    %373 = vector.load %arg10[%372, %c0_135] : memref<64x256xf32, #tpu.memory_space<vmem>>, vector<8x128xf32>
    %374 = vector.extract_strided_slice %371 {offsets = [0, 0], sizes = [8, 128], strides = [1, 1]} : vector<8x256xf32> to vector<8x128xf32>
    %375 = arith.addf %373, %374 : vector<8x128xf32>
    %376 = arith.index_cast %369 : i32 to index
    %c128_136 = arith.constant 128 : index
    %377 = vector.load %arg10[%376, %c128_136] : memref<64x256xf32, #tpu.memory_space<vmem>>, vector<8x128xf32>
    %378 = vector.extract_strided_slice %371 {offsets = [0, 128], sizes = [8, 128], strides = [1, 1]} : vector<8x256xf32> to vector<8x128xf32>
    %379 = arith.addf %377, %378 : vector<8x128xf32>
    %380 = vector.extract_strided_slice %364 {offsets = [0, 0], sizes = [8, 128], strides = [1, 1]} : vector<8x256xf32> to vector<8x128xf32>
    %381 = arith.negf %375 : vector<8x128xf32>
    %382 = math.exp %381 : vector<8x128xf32>
    %cst_137 = arith.constant 1.000000e+00 : f32
    %383 = vector.broadcast %cst_137 : f32 to vector<8x128xf32>
    %384 = arith.addf %383, %382 : vector<8x128xf32>
    %385 = arith.divf %383, %384 : vector<8x128xf32>
    %386 = math.tanh %375 : vector<8x128xf32>
    %c96_i32_138 = arith.constant 96 : i32
    %387 = tpu.dynamic_rotate %385 by %c96_i32_138 dim 1 : vector<8x128xf32>, i32 -> vector<8x128xf32>
    %c64_i32_139 = arith.constant 64 : i32
    %388 = tpu.dynamic_rotate %386 by %c64_i32_139 dim 1 : vector<8x128xf32>, i32 -> vector<8x128xf32>
    %c32_i32_140 = arith.constant 32 : i32
    %389 = tpu.dynamic_rotate %385 by %c32_i32_140 dim 1 : vector<8x128xf32>, i32 -> vector<8x128xf32>
    %390 = arith.mulf %387, %380 : vector<8x128xf32>
    %391 = arith.mulf %385, %388 : vector<8x128xf32>
    %392 = arith.addf %390, %391 : vector<8x128xf32>
    %393 = math.tanh %392 : vector<8x128xf32>
    %394 = arith.mulf %389, %393 : vector<8x128xf32>
    %395 = vector.extract_strided_slice %364 {offsets = [0, 128], sizes = [8, 128], strides = [1, 1]} : vector<8x256xf32> to vector<8x128xf32>
    %396 = arith.negf %379 : vector<8x128xf32>
    %397 = math.exp %396 : vector<8x128xf32>
    %cst_141 = arith.constant 1.000000e+00 : f32
    %398 = vector.broadcast %cst_141 : f32 to vector<8x128xf32>
    %399 = arith.addf %398, %397 : vector<8x128xf32>
    %400 = arith.divf %398, %399 : vector<8x128xf32>
    %401 = math.tanh %379 : vector<8x128xf32>
    %c96_i32_142 = arith.constant 96 : i32
    %402 = tpu.dynamic_rotate %400 by %c96_i32_142 dim 1 : vector<8x128xf32>, i32 -> vector<8x128xf32>
    %c64_i32_143 = arith.constant 64 : i32
    %403 = tpu.dynamic_rotate %401 by %c64_i32_143 dim 1 : vector<8x128xf32>, i32 -> vector<8x128xf32>
    %c32_i32_144 = arith.constant 32 : i32
    %404 = tpu.dynamic_rotate %400 by %c32_i32_144 dim 1 : vector<8x128xf32>, i32 -> vector<8x128xf32>
    %405 = arith.mulf %402, %395 : vector<8x128xf32>
    %406 = arith.mulf %400, %403 : vector<8x128xf32>
    %407 = arith.addf %405, %406 : vector<8x128xf32>
    %408 = math.tanh %407 : vector<8x128xf32>
    %409 = arith.mulf %404, %408 : vector<8x128xf32>
    %410 = arith.index_cast %366 : i32 to index
    %c0_145 = arith.constant 0 : index
    %411 = vector.load %arg11[%410, %c0_145] : memref<64x256xf32, #tpu.memory_space<vmem>>, vector<8x128xf32>
    tpu.vector_store %arg11[%410, %c0_145], %394 {strides = array<i32>} : memref<64x256xf32, #tpu.memory_space<vmem>>, vector<8x128xf32>,
    %412 = arith.index_cast %369 : i32 to index
    %c128_146 = arith.constant 128 : index
    %413 = vector.load %arg11[%412, %c128_146] : memref<64x256xf32, #tpu.memory_space<vmem>>, vector<8x128xf32>
    tpu.vector_store %arg11[%412, %c128_146], %409 {strides = array<i32>} : memref<64x256xf32, #tpu.memory_space<vmem>>, vector<8x128xf32>,
    %414 = tpu.concatenate %394, %409 in 1 : vector<8x128xf32>, vector<8x128xf32> -> vector<8x256xf32>
    %415 = tpu.concatenate %392, %407 in 1 : vector<8x128xf32>, vector<8x128xf32> -> vector<8x256xf32>
    %c8_i32_147 = arith.constant 8 : i32
    %c0_148 = arith.constant 0 : index
    %c0_149 = arith.constant 0 : index
    %416 = vector.load %arg11[%c0_148, %c0_149] : memref<64x256xf32, #tpu.memory_space<vmem>>, vector<64x256xf32>
    %c0_150 = arith.constant 0 : index
    %c0_151 = arith.constant 0 : index
    %417 = vector.load %arg4[%c0_150, %c0_151] : memref<256x256xf32, #tpu.memory_space<vmem>>, vector<256x256xf32>
    %cst_152 = arith.constant dense<0.000000e+00> : vector<64x256xf32>
    %418 = tpu.matmul %416, %417, %cst_152 {dimension_numbers = #tpu.dot_dimension_numbers<[1], [0], [0], [1], [0, 0, 1, 1], [], []>} : vector<64x256xf32>, vector<256x256xf32>, vector<64x256xf32> -> vector<64x256xf32>
    %c0_153 = arith.constant 0 : index
    %c0_154 = arith.constant 0 : index
    %419 = vector.load %arg6[%c0_153, %c0_154] : memref<1x256xf32, #tpu.memory_space<vmem>>, vector<1x256xf32>
    %420 = vector.broadcast %419 : vector<1x256xf32> to vector<64x256xf32>
    %421 = arith.addf %418, %420 : vector<64x256xf32>
    %c0_155 = arith.constant 0 : index
    %c0_156 = arith.constant 0 : index
    %422 = vector.load %arg10[%c0_155, %c0_156] : memref<64x256xf32, #tpu.memory_space<vmem>>, vector<64x256xf32>
    tpu.vector_store %arg10[%c0_155, %c0_156], %421 {strides = array<i32>} : memref<64x256xf32, #tpu.memory_space<vmem>>, vector<64x256xf32>,
    %cst_157 = arith.constant 0.000000e+00 : f32
    %423 = vector.broadcast %cst_157 : f32 to vector<8x256xf32>
    %c0_i32_158 = arith.constant 0 : i32
    %c8_i32_159 = arith.constant 8 : i32
    %424 = arith.muli %c0_i32_158, %c8_i32_159 : i32
    %425 = tpu.assume_multiple %424, 8 : i32
    %c7_i32_160 = arith.constant 7 : i32
    %426 = arith.subi %c7_i32_160, %c0_i32_158 : i32
    %c8_i32_161 = arith.constant 8 : i32
    %427 = arith.muli %426, %c8_i32_161 : i32
    %428 = tpu.assume_multiple %427, 8 : i32
    %c0_162 = arith.constant 0 : index
    %c0_163 = arith.constant 0 : index
    %429 = vector.load %arg5[%c0_162, %c0_163] : memref<256x256xf32, #tpu.memory_space<vmem>>, vector<256x256xf32>
    %cst_164 = arith.constant dense<0.000000e+00> : vector<8x256xf32>
    %430 = tpu.matmul %423, %429, %cst_164 {dimension_numbers = #tpu.dot_dimension_numbers<[1], [0], [0], [1], [0, 0, 1, 1], [], []>} : vector<8x256xf32>, vector<256x256xf32>, vector<8x256xf32> -> vector<8x256xf32>
    %431 = arith.index_cast %425 : i32 to index
    %c0_165 = arith.constant 0 : index
    %432 = vector.load %arg10[%431, %c0_165] : memref<64x256xf32, #tpu.memory_space<vmem>>, vector<8x128xf32>
    %433 = vector.extract_strided_slice %430 {offsets = [0, 0], sizes = [8, 128], strides = [1, 1]} : vector<8x256xf32> to vector<8x128xf32>
    %434 = arith.addf %432, %433 : vector<8x128xf32>
    %435 = arith.index_cast %428 : i32 to index
    %c128_166 = arith.constant 128 : index
    %436 = vector.load %arg10[%435, %c128_166] : memref<64x256xf32, #tpu.memory_space<vmem>>, vector<8x128xf32>
    %437 = vector.extract_strided_slice %430 {offsets = [0, 128], sizes = [8, 128], strides = [1, 1]} : vector<8x256xf32> to vector<8x128xf32>
    %438 = arith.addf %436, %437 : vector<8x128xf32>
    %439 = vector.extract_strided_slice %423 {offsets = [0, 0], sizes = [8, 128], strides = [1, 1]} : vector<8x256xf32> to vector<8x128xf32>
    %440 = arith.negf %434 : vector<8x128xf32>
    %441 = math.exp %440 : vector<8x128xf32>
    %cst_167 = arith.constant 1.000000e+00 : f32
    %442 = vector.broadcast %cst_167 : f32 to vector<8x128xf32>
    %443 = arith.addf %442, %441 : vector<8x128xf32>
    %444 = arith.divf %442, %443 : vector<8x128xf32>
    %445 = math.tanh %434 : vector<8x128xf32>
    %c96_i32_168 = arith.constant 96 : i32
    %446 = tpu.dynamic_rotate %444 by %c96_i32_168 dim 1 : vector<8x128xf32>, i32 -> vector<8x128xf32>
    %c64_i32_169 = arith.constant 64 : i32
    %447 = tpu.dynamic_rotate %445 by %c64_i32_169 dim 1 : vector<8x128xf32>, i32 -> vector<8x128xf32>
    %c32_i32_170 = arith.constant 32 : i32
    %448 = tpu.dynamic_rotate %444 by %c32_i32_170 dim 1 : vector<8x128xf32>, i32 -> vector<8x128xf32>
    %449 = arith.mulf %446, %439 : vector<8x128xf32>
    %450 = arith.mulf %444, %447 : vector<8x128xf32>
    %451 = arith.addf %449, %450 : vector<8x128xf32>
    %452 = math.tanh %451 : vector<8x128xf32>
    %453 = arith.mulf %448, %452 : vector<8x128xf32>
    %454 = vector.extract_strided_slice %423 {offsets = [0, 128], sizes = [8, 128], strides = [1, 1]} : vector<8x256xf32> to vector<8x128xf32>
    %455 = arith.negf %438 : vector<8x128xf32>
    %456 = math.exp %455 : vector<8x128xf32>
    %cst_171 = arith.constant 1.000000e+00 : f32
    %457 = vector.broadcast %cst_171 : f32 to vector<8x128xf32>
    %458 = arith.addf %457, %456 : vector<8x128xf32>
    %459 = arith.divf %457, %458 : vector<8x128xf32>
    %460 = math.tanh %438 : vector<8x128xf32>
    %c96_i32_172 = arith.constant 96 : i32
    %461 = tpu.dynamic_rotate %459 by %c96_i32_172 dim 1 : vector<8x128xf32>, i32 -> vector<8x128xf32>
    %c64_i32_173 = arith.constant 64 : i32
    %462 = tpu.dynamic_rotate %460 by %c64_i32_173 dim 1 : vector<8x128xf32>, i32 -> vector<8x128xf32>
    %c32_i32_174 = arith.constant 32 : i32
    %463 = tpu.dynamic_rotate %459 by %c32_i32_174 dim 1 : vector<8x128xf32>, i32 -> vector<8x128xf32>
    %464 = arith.mulf %461, %454 : vector<8x128xf32>
    %465 = arith.mulf %459, %462 : vector<8x128xf32>
    %466 = arith.addf %464, %465 : vector<8x128xf32>
    %467 = math.tanh %466 : vector<8x128xf32>
    %468 = arith.mulf %463, %467 : vector<8x128xf32>
    %469 = tpu.concatenate %453, %468 in 1 : vector<8x128xf32>, vector<8x128xf32> -> vector<8x256xf32>
    %470 = tpu.concatenate %451, %466 in 1 : vector<8x128xf32>, vector<8x128xf32> -> vector<8x256xf32>
    %c1_i32_175 = arith.constant 1 : i32
    %c8_i32_176 = arith.constant 8 : i32
    %471 = arith.muli %c1_i32_175, %c8_i32_176 : i32
    %472 = tpu.assume_multiple %471, 8 : i32
    %c7_i32_177 = arith.constant 7 : i32
    %473 = arith.subi %c7_i32_177, %c1_i32_175 : i32
    %c8_i32_178 = arith.constant 8 : i32
    %474 = arith.muli %473, %c8_i32_178 : i32
    %475 = tpu.assume_multiple %474, 8 : i32
    %c0_179 = arith.constant 0 : index
    %c0_180 = arith.constant 0 : index
    %476 = vector.load %arg5[%c0_179, %c0_180] : memref<256x256xf32, #tpu.memory_space<vmem>>, vector<256x256xf32>
    %cst_181 = arith.constant dense<0.000000e+00> : vector<8x256xf32>
    %477 = tpu.matmul %469, %476, %cst_181 {dimension_numbers = #tpu.dot_dimension_numbers<[1], [0], [0], [1], [0, 0, 1, 1], [], []>} : vector<8x256xf32>, vector<256x256xf32>, vector<8x256xf32> -> vector<8x256xf32>
    %478 = arith.index_cast %472 : i32 to index
    %c0_182 = arith.constant 0 : index
    %479 = vector.load %arg10[%478, %c0_182] : memref<64x256xf32, #tpu.memory_space<vmem>>, vector<8x128xf32>
    %480 = vector.extract_strided_slice %477 {offsets = [0, 0], sizes = [8, 128], strides = [1, 1]} : vector<8x256xf32> to vector<8x128xf32>
    %481 = arith.addf %479, %480 : vector<8x128xf32>
    %482 = arith.index_cast %475 : i32 to index
    %c128_183 = arith.constant 128 : index
    %483 = vector.load %arg10[%482, %c128_183] : memref<64x256xf32, #tpu.memory_space<vmem>>, vector<8x128xf32>
    %484 = vector.extract_strided_slice %477 {offsets = [0, 128], sizes = [8, 128], strides = [1, 1]} : vector<8x256xf32> to vector<8x128xf32>
    %485 = arith.addf %483, %484 : vector<8x128xf32>
    %486 = vector.extract_strided_slice %470 {offsets = [0, 0], sizes = [8, 128], strides = [1, 1]} : vector<8x256xf32> to vector<8x128xf32>
    %487 = arith.negf %481 : vector<8x128xf32>
    %488 = math.exp %487 : vector<8x128xf32>
    %cst_184 = arith.constant 1.000000e+00 : f32
    %489 = vector.broadcast %cst_184 : f32 to vector<8x128xf32>
    %490 = arith.addf %489, %488 : vector<8x128xf32>
    %491 = arith.divf %489, %490 : vector<8x128xf32>
    %492 = math.tanh %481 : vector<8x128xf32>
    %c96_i32_185 = arith.constant 96 : i32
    %493 = tpu.dynamic_rotate %491 by %c96_i32_185 dim 1 : vector<8x128xf32>, i32 -> vector<8x128xf32>
    %c64_i32_186 = arith.constant 64 : i32
    %494 = tpu.dynamic_rotate %492 by %c64_i32_186 dim 1 : vector<8x128xf32>, i32 -> vector<8x128xf32>
    %c32_i32_187 = arith.constant 32 : i32
    %495 = tpu.dynamic_rotate %491 by %c32_i32_187 dim 1 : vector<8x128xf32>, i32 -> vector<8x128xf32>
    %496 = arith.mulf %493, %486 : vector<8x128xf32>
    %497 = arith.mulf %491, %494 : vector<8x128xf32>
    %498 = arith.addf %496, %497 : vector<8x128xf32>
    %499 = math.tanh %498 : vector<8x128xf32>
    %500 = arith.mulf %495, %499 : vector<8x128xf32>
    %501 = vector.extract_strided_slice %470 {offsets = [0, 128], sizes = [8, 128], strides = [1, 1]} : vector<8x256xf32> to vector<8x128xf32>
    %502 = arith.negf %485 : vector<8x128xf32>
    %503 = math.exp %502 : vector<8x128xf32>
    %cst_188 = arith.constant 1.000000e+00 : f32
    %504 = vector.broadcast %cst_188 : f32 to vector<8x128xf32>
    %505 = arith.addf %504, %503 : vector<8x128xf32>
    %506 = arith.divf %504, %505 : vector<8x128xf32>
    %507 = math.tanh %485 : vector<8x128xf32>
    %c96_i32_189 = arith.constant 96 : i32
    %508 = tpu.dynamic_rotate %506 by %c96_i32_189 dim 1 : vector<8x128xf32>, i32 -> vector<8x128xf32>
    %c64_i32_190 = arith.constant 64 : i32
    %509 = tpu.dynamic_rotate %507 by %c64_i32_190 dim 1 : vector<8x128xf32>, i32 -> vector<8x128xf32>
    %c32_i32_191 = arith.constant 32 : i32
    %510 = tpu.dynamic_rotate %506 by %c32_i32_191 dim 1 : vector<8x128xf32>, i32 -> vector<8x128xf32>
    %511 = arith.mulf %508, %501 : vector<8x128xf32>
    %512 = arith.mulf %506, %509 : vector<8x128xf32>
    %513 = arith.addf %511, %512 : vector<8x128xf32>
    %514 = math.tanh %513 : vector<8x128xf32>
    %515 = arith.mulf %510, %514 : vector<8x128xf32>
    %516 = tpu.concatenate %500, %515 in 1 : vector<8x128xf32>, vector<8x128xf32> -> vector<8x256xf32>
    %517 = tpu.concatenate %498, %513 in 1 : vector<8x128xf32>, vector<8x128xf32> -> vector<8x256xf32>
    %c2_i32_192 = arith.constant 2 : i32
    %c8_i32_193 = arith.constant 8 : i32
    %518 = arith.muli %c2_i32_192, %c8_i32_193 : i32
    %519 = tpu.assume_multiple %518, 8 : i32
    %c7_i32_194 = arith.constant 7 : i32
    %520 = arith.subi %c7_i32_194, %c2_i32_192 : i32
    %c8_i32_195 = arith.constant 8 : i32
    %521 = arith.muli %520, %c8_i32_195 : i32
    %522 = tpu.assume_multiple %521, 8 : i32
    %c0_196 = arith.constant 0 : index
    %c0_197 = arith.constant 0 : index
    %523 = vector.load %arg5[%c0_196, %c0_197] : memref<256x256xf32, #tpu.memory_space<vmem>>, vector<256x256xf32>
    %cst_198 = arith.constant dense<0.000000e+00> : vector<8x256xf32>
    %524 = tpu.matmul %516, %523, %cst_198 {dimension_numbers = #tpu.dot_dimension_numbers<[1], [0], [0], [1], [0, 0, 1, 1], [], []>} : vector<8x256xf32>, vector<256x256xf32>, vector<8x256xf32> -> vector<8x256xf32>
    %525 = arith.index_cast %519 : i32 to index
    %c0_199 = arith.constant 0 : index
    %526 = vector.load %arg10[%525, %c0_199] : memref<64x256xf32, #tpu.memory_space<vmem>>, vector<8x128xf32>
    %527 = vector.extract_strided_slice %524 {offsets = [0, 0], sizes = [8, 128], strides = [1, 1]} : vector<8x256xf32> to vector<8x128xf32>
    %528 = arith.addf %526, %527 : vector<8x128xf32>
    %529 = arith.index_cast %522 : i32 to index
    %c128_200 = arith.constant 128 : index
    %530 = vector.load %arg10[%529, %c128_200] : memref<64x256xf32, #tpu.memory_space<vmem>>, vector<8x128xf32>
    %531 = vector.extract_strided_slice %524 {offsets = [0, 128], sizes = [8, 128], strides = [1, 1]} : vector<8x256xf32> to vector<8x128xf32>
    %532 = arith.addf %530, %531 : vector<8x128xf32>
    %533 = vector.extract_strided_slice %517 {offsets = [0, 0], sizes = [8, 128], strides = [1, 1]} : vector<8x256xf32> to vector<8x128xf32>
    %534 = arith.negf %528 : vector<8x128xf32>
    %535 = math.exp %534 : vector<8x128xf32>
    %cst_201 = arith.constant 1.000000e+00 : f32
    %536 = vector.broadcast %cst_201 : f32 to vector<8x128xf32>
    %537 = arith.addf %536, %535 : vector<8x128xf32>
    %538 = arith.divf %536, %537 : vector<8x128xf32>
    %539 = math.tanh %528 : vector<8x128xf32>
    %c96_i32_202 = arith.constant 96 : i32
    %540 = tpu.dynamic_rotate %538 by %c96_i32_202 dim 1 : vector<8x128xf32>, i32 -> vector<8x128xf32>
    %c64_i32_203 = arith.constant 64 : i32
    %541 = tpu.dynamic_rotate %539 by %c64_i32_203 dim 1 : vector<8x128xf32>, i32 -> vector<8x128xf32>
    %c32_i32_204 = arith.constant 32 : i32
    %542 = tpu.dynamic_rotate %538 by %c32_i32_204 dim 1 : vector<8x128xf32>, i32 -> vector<8x128xf32>
    %543 = arith.mulf %540, %533 : vector<8x128xf32>
    %544 = arith.mulf %538, %541 : vector<8x128xf32>
    %545 = arith.addf %543, %544 : vector<8x128xf32>
    %546 = math.tanh %545 : vector<8x128xf32>
    %547 = arith.mulf %542, %546 : vector<8x128xf32>
    %548 = vector.extract_strided_slice %517 {offsets = [0, 128], sizes = [8, 128], strides = [1, 1]} : vector<8x256xf32> to vector<8x128xf32>
    %549 = arith.negf %532 : vector<8x128xf32>
    %550 = math.exp %549 : vector<8x128xf32>
    %cst_205 = arith.constant 1.000000e+00 : f32
    %551 = vector.broadcast %cst_205 : f32 to vector<8x128xf32>
    %552 = arith.addf %551, %550 : vector<8x128xf32>
    %553 = arith.divf %551, %552 : vector<8x128xf32>
    %554 = math.tanh %532 : vector<8x128xf32>
    %c96_i32_206 = arith.constant 96 : i32
    %555 = tpu.dynamic_rotate %553 by %c96_i32_206 dim 1 : vector<8x128xf32>, i32 -> vector<8x128xf32>
    %c64_i32_207 = arith.constant 64 : i32
    %556 = tpu.dynamic_rotate %554 by %c64_i32_207 dim 1 : vector<8x128xf32>, i32 -> vector<8x128xf32>
    %c32_i32_208 = arith.constant 32 : i32
    %557 = tpu.dynamic_rotate %553 by %c32_i32_208 dim 1 : vector<8x128xf32>, i32 -> vector<8x128xf32>
    %558 = arith.mulf %555, %548 : vector<8x128xf32>
    %559 = arith.mulf %553, %556 : vector<8x128xf32>
    %560 = arith.addf %558, %559 : vector<8x128xf32>
    %561 = math.tanh %560 : vector<8x128xf32>
    %562 = arith.mulf %557, %561 : vector<8x128xf32>
    %563 = tpu.concatenate %547, %562 in 1 : vector<8x128xf32>, vector<8x128xf32> -> vector<8x256xf32>
    %564 = tpu.concatenate %545, %560 in 1 : vector<8x128xf32>, vector<8x128xf32> -> vector<8x256xf32>
    %c3_i32_209 = arith.constant 3 : i32
    %c8_i32_210 = arith.constant 8 : i32
    %565 = arith.muli %c3_i32_209, %c8_i32_210 : i32
    %566 = tpu.assume_multiple %565, 8 : i32
    %c7_i32_211 = arith.constant 7 : i32
    %567 = arith.subi %c7_i32_211, %c3_i32_209 : i32
    %c8_i32_212 = arith.constant 8 : i32
    %568 = arith.muli %567, %c8_i32_212 : i32
    %569 = tpu.assume_multiple %568, 8 : i32
    %c0_213 = arith.constant 0 : index
    %c0_214 = arith.constant 0 : index
    %570 = vector.load %arg5[%c0_213, %c0_214] : memref<256x256xf32, #tpu.memory_space<vmem>>, vector<256x256xf32>
    %cst_215 = arith.constant dense<0.000000e+00> : vector<8x256xf32>
    %571 = tpu.matmul %563, %570, %cst_215 {dimension_numbers = #tpu.dot_dimension_numbers<[1], [0], [0], [1], [0, 0, 1, 1], [], []>} : vector<8x256xf32>, vector<256x256xf32>, vector<8x256xf32> -> vector<8x256xf32>
    %572 = arith.index_cast %566 : i32 to index
    %c0_216 = arith.constant 0 : index
    %573 = vector.load %arg10[%572, %c0_216] : memref<64x256xf32, #tpu.memory_space<vmem>>, vector<8x128xf32>
    %574 = vector.extract_strided_slice %571 {offsets = [0, 0], sizes = [8, 128], strides = [1, 1]} : vector<8x256xf32> to vector<8x128xf32>
    %575 = arith.addf %573, %574 : vector<8x128xf32>
    %576 = arith.index_cast %569 : i32 to index
    %c128_217 = arith.constant 128 : index
    %577 = vector.load %arg10[%576, %c128_217] : memref<64x256xf32, #tpu.memory_space<vmem>>, vector<8x128xf32>
    %578 = vector.extract_strided_slice %571 {offsets = [0, 128], sizes = [8, 128], strides = [1, 1]} : vector<8x256xf32> to vector<8x128xf32>
    %579 = arith.addf %577, %578 : vector<8x128xf32>
    %580 = vector.extract_strided_slice %564 {offsets = [0, 0], sizes = [8, 128], strides = [1, 1]} : vector<8x256xf32> to vector<8x128xf32>
    %581 = arith.negf %575 : vector<8x128xf32>
    %582 = math.exp %581 : vector<8x128xf32>
    %cst_218 = arith.constant 1.000000e+00 : f32
    %583 = vector.broadcast %cst_218 : f32 to vector<8x128xf32>
    %584 = arith.addf %583, %582 : vector<8x128xf32>
    %585 = arith.divf %583, %584 : vector<8x128xf32>
    %586 = math.tanh %575 : vector<8x128xf32>
    %c96_i32_219 = arith.constant 96 : i32
    %587 = tpu.dynamic_rotate %585 by %c96_i32_219 dim 1 : vector<8x128xf32>, i32 -> vector<8x128xf32>
    %c64_i32_220 = arith.constant 64 : i32
    %588 = tpu.dynamic_rotate %586 by %c64_i32_220 dim 1 : vector<8x128xf32>, i32 -> vector<8x128xf32>
    %c32_i32_221 = arith.constant 32 : i32
    %589 = tpu.dynamic_rotate %585 by %c32_i32_221 dim 1 : vector<8x128xf32>, i32 -> vector<8x128xf32>
    %590 = arith.mulf %587, %580 : vector<8x128xf32>
    %591 = arith.mulf %585, %588 : vector<8x128xf32>
    %592 = arith.addf %590, %591 : vector<8x128xf32>
    %593 = math.tanh %592 : vector<8x128xf32>
    %594 = arith.mulf %589, %593 : vector<8x128xf32>
    %595 = vector.extract_strided_slice %564 {offsets = [0, 128], sizes = [8, 128], strides = [1, 1]} : vector<8x256xf32> to vector<8x128xf32>
    %596 = arith.negf %579 : vector<8x128xf32>
    %597 = math.exp %596 : vector<8x128xf32>
    %cst_222 = arith.constant 1.000000e+00 : f32
    %598 = vector.broadcast %cst_222 : f32 to vector<8x128xf32>
    %599 = arith.addf %598, %597 : vector<8x128xf32>
    %600 = arith.divf %598, %599 : vector<8x128xf32>
    %601 = math.tanh %579 : vector<8x128xf32>
    %c96_i32_223 = arith.constant 96 : i32
    %602 = tpu.dynamic_rotate %600 by %c96_i32_223 dim 1 : vector<8x128xf32>, i32 -> vector<8x128xf32>
    %c64_i32_224 = arith.constant 64 : i32
    %603 = tpu.dynamic_rotate %601 by %c64_i32_224 dim 1 : vector<8x128xf32>, i32 -> vector<8x128xf32>
    %c32_i32_225 = arith.constant 32 : i32
    %604 = tpu.dynamic_rotate %600 by %c32_i32_225 dim 1 : vector<8x128xf32>, i32 -> vector<8x128xf32>
    %605 = arith.mulf %602, %595 : vector<8x128xf32>
    %606 = arith.mulf %600, %603 : vector<8x128xf32>
    %607 = arith.addf %605, %606 : vector<8x128xf32>
    %608 = math.tanh %607 : vector<8x128xf32>
    %609 = arith.mulf %604, %608 : vector<8x128xf32>
    %610 = tpu.concatenate %594, %609 in 1 : vector<8x128xf32>, vector<8x128xf32> -> vector<8x256xf32>
    %611 = tpu.concatenate %592, %607 in 1 : vector<8x128xf32>, vector<8x128xf32> -> vector<8x256xf32>
    %c4_i32_226 = arith.constant 4 : i32
    %c8_i32_227 = arith.constant 8 : i32
    %612 = arith.muli %c4_i32_226, %c8_i32_227 : i32
    %613 = tpu.assume_multiple %612, 8 : i32
    %c7_i32_228 = arith.constant 7 : i32
    %614 = arith.subi %c7_i32_228, %c4_i32_226 : i32
    %c8_i32_229 = arith.constant 8 : i32
    %615 = arith.muli %614, %c8_i32_229 : i32
    %616 = tpu.assume_multiple %615, 8 : i32
    %c0_230 = arith.constant 0 : index
    %c0_231 = arith.constant 0 : index
    %617 = vector.load %arg5[%c0_230, %c0_231] : memref<256x256xf32, #tpu.memory_space<vmem>>, vector<256x256xf32>
    %cst_232 = arith.constant dense<0.000000e+00> : vector<8x256xf32>
    %618 = tpu.matmul %610, %617, %cst_232 {dimension_numbers = #tpu.dot_dimension_numbers<[1], [0], [0], [1], [0, 0, 1, 1], [], []>} : vector<8x256xf32>, vector<256x256xf32>, vector<8x256xf32> -> vector<8x256xf32>
    %619 = arith.index_cast %613 : i32 to index
    %c0_233 = arith.constant 0 : index
    %620 = vector.load %arg10[%619, %c0_233] : memref<64x256xf32, #tpu.memory_space<vmem>>, vector<8x128xf32>
    %621 = vector.extract_strided_slice %618 {offsets = [0, 0], sizes = [8, 128], strides = [1, 1]} : vector<8x256xf32> to vector<8x128xf32>
    %622 = arith.addf %620, %621 : vector<8x128xf32>
    %623 = arith.index_cast %616 : i32 to index
    %c128_234 = arith.constant 128 : index
    %624 = vector.load %arg10[%623, %c128_234] : memref<64x256xf32, #tpu.memory_space<vmem>>, vector<8x128xf32>
    %625 = vector.extract_strided_slice %618 {offsets = [0, 128], sizes = [8, 128], strides = [1, 1]} : vector<8x256xf32> to vector<8x128xf32>
    %626 = arith.addf %624, %625 : vector<8x128xf32>
    %627 = vector.extract_strided_slice %611 {offsets = [0, 0], sizes = [8, 128], strides = [1, 1]} : vector<8x256xf32> to vector<8x128xf32>
    %628 = arith.negf %622 : vector<8x128xf32>
    %629 = math.exp %628 : vector<8x128xf32>
    %cst_235 = arith.constant 1.000000e+00 : f32
    %630 = vector.broadcast %cst_235 : f32 to vector<8x128xf32>
    %631 = arith.addf %630, %629 : vector<8x128xf32>
    %632 = arith.divf %630, %631 : vector<8x128xf32>
    %633 = math.tanh %622 : vector<8x128xf32>
    %c96_i32_236 = arith.constant 96 : i32
    %634 = tpu.dynamic_rotate %632 by %c96_i32_236 dim 1 : vector<8x128xf32>, i32 -> vector<8x128xf32>
    %c64_i32_237 = arith.constant 64 : i32
    %635 = tpu.dynamic_rotate %633 by %c64_i32_237 dim 1 : vector<8x128xf32>, i32 -> vector<8x128xf32>
    %c32_i32_238 = arith.constant 32 : i32
    %636 = tpu.dynamic_rotate %632 by %c32_i32_238 dim 1 : vector<8x128xf32>, i32 -> vector<8x128xf32>
    %637 = arith.mulf %634, %627 : vector<8x128xf32>
    %638 = arith.mulf %632, %635 : vector<8x128xf32>
    %639 = arith.addf %637, %638 : vector<8x128xf32>
    %640 = math.tanh %639 : vector<8x128xf32>
    %641 = arith.mulf %636, %640 : vector<8x128xf32>
    %642 = vector.extract_strided_slice %611 {offsets = [0, 128], sizes = [8, 128], strides = [1, 1]} : vector<8x256xf32> to vector<8x128xf32>
    %643 = arith.negf %626 : vector<8x128xf32>
    %644 = math.exp %643 : vector<8x128xf32>
    %cst_239 = arith.constant 1.000000e+00 : f32
    %645 = vector.broadcast %cst_239 : f32 to vector<8x128xf32>
    %646 = arith.addf %645, %644 : vector<8x128xf32>
    %647 = arith.divf %645, %646 : vector<8x128xf32>
    %648 = math.tanh %626 : vector<8x128xf32>
    %c96_i32_240 = arith.constant 96 : i32
    %649 = tpu.dynamic_rotate %647 by %c96_i32_240 dim 1 : vector<8x128xf32>, i32 -> vector<8x128xf32>
    %c64_i32_241 = arith.constant 64 : i32
    %650 = tpu.dynamic_rotate %648 by %c64_i32_241 dim 1 : vector<8x128xf32>, i32 -> vector<8x128xf32>
    %c32_i32_242 = arith.constant 32 : i32
    %651 = tpu.dynamic_rotate %647 by %c32_i32_242 dim 1 : vector<8x128xf32>, i32 -> vector<8x128xf32>
    %652 = arith.mulf %649, %642 : vector<8x128xf32>
    %653 = arith.mulf %647, %650 : vector<8x128xf32>
    %654 = arith.addf %652, %653 : vector<8x128xf32>
    %655 = math.tanh %654 : vector<8x128xf32>
    %656 = arith.mulf %651, %655 : vector<8x128xf32>
    %657 = tpu.concatenate %641, %656 in 1 : vector<8x128xf32>, vector<8x128xf32> -> vector<8x256xf32>
    %658 = tpu.concatenate %639, %654 in 1 : vector<8x128xf32>, vector<8x128xf32> -> vector<8x256xf32>
    %c5_i32_243 = arith.constant 5 : i32
    %c8_i32_244 = arith.constant 8 : i32
    %659 = arith.muli %c5_i32_243, %c8_i32_244 : i32
    %660 = tpu.assume_multiple %659, 8 : i32
    %c7_i32_245 = arith.constant 7 : i32
    %661 = arith.subi %c7_i32_245, %c5_i32_243 : i32
    %c8_i32_246 = arith.constant 8 : i32
    %662 = arith.muli %661, %c8_i32_246 : i32
    %663 = tpu.assume_multiple %662, 8 : i32
    %c0_247 = arith.constant 0 : index
    %c0_248 = arith.constant 0 : index
    %664 = vector.load %arg5[%c0_247, %c0_248] : memref<256x256xf32, #tpu.memory_space<vmem>>, vector<256x256xf32>
    %cst_249 = arith.constant dense<0.000000e+00> : vector<8x256xf32>
    %665 = tpu.matmul %657, %664, %cst_249 {dimension_numbers = #tpu.dot_dimension_numbers<[1], [0], [0], [1], [0, 0, 1, 1], [], []>} : vector<8x256xf32>, vector<256x256xf32>, vector<8x256xf32> -> vector<8x256xf32>
    %666 = arith.index_cast %660 : i32 to index
    %c0_250 = arith.constant 0 : index
    %667 = vector.load %arg10[%666, %c0_250] : memref<64x256xf32, #tpu.memory_space<vmem>>, vector<8x128xf32>
    %668 = vector.extract_strided_slice %665 {offsets = [0, 0], sizes = [8, 128], strides = [1, 1]} : vector<8x256xf32> to vector<8x128xf32>
    %669 = arith.addf %667, %668 : vector<8x128xf32>
    %670 = arith.index_cast %663 : i32 to index
    %c128_251 = arith.constant 128 : index
    %671 = vector.load %arg10[%670, %c128_251] : memref<64x256xf32, #tpu.memory_space<vmem>>, vector<8x128xf32>
    %672 = vector.extract_strided_slice %665 {offsets = [0, 128], sizes = [8, 128], strides = [1, 1]} : vector<8x256xf32> to vector<8x128xf32>
    %673 = arith.addf %671, %672 : vector<8x128xf32>
    %674 = vector.extract_strided_slice %658 {offsets = [0, 0], sizes = [8, 128], strides = [1, 1]} : vector<8x256xf32> to vector<8x128xf32>
    %675 = arith.negf %669 : vector<8x128xf32>
    %676 = math.exp %675 : vector<8x128xf32>
    %cst_252 = arith.constant 1.000000e+00 : f32
    %677 = vector.broadcast %cst_252 : f32 to vector<8x128xf32>
    %678 = arith.addf %677, %676 : vector<8x128xf32>
    %679 = arith.divf %677, %678 : vector<8x128xf32>
    %680 = math.tanh %669 : vector<8x128xf32>
    %c96_i32_253 = arith.constant 96 : i32
    %681 = tpu.dynamic_rotate %679 by %c96_i32_253 dim 1 : vector<8x128xf32>, i32 -> vector<8x128xf32>
    %c64_i32_254 = arith.constant 64 : i32
    %682 = tpu.dynamic_rotate %680 by %c64_i32_254 dim 1 : vector<8x128xf32>, i32 -> vector<8x128xf32>
    %c32_i32_255 = arith.constant 32 : i32
    %683 = tpu.dynamic_rotate %679 by %c32_i32_255 dim 1 : vector<8x128xf32>, i32 -> vector<8x128xf32>
    %684 = arith.mulf %681, %674 : vector<8x128xf32>
    %685 = arith.mulf %679, %682 : vector<8x128xf32>
    %686 = arith.addf %684, %685 : vector<8x128xf32>
    %687 = math.tanh %686 : vector<8x128xf32>
    %688 = arith.mulf %683, %687 : vector<8x128xf32>
    %689 = vector.extract_strided_slice %658 {offsets = [0, 128], sizes = [8, 128], strides = [1, 1]} : vector<8x256xf32> to vector<8x128xf32>
    %690 = arith.negf %673 : vector<8x128xf32>
    %691 = math.exp %690 : vector<8x128xf32>
    %cst_256 = arith.constant 1.000000e+00 : f32
    %692 = vector.broadcast %cst_256 : f32 to vector<8x128xf32>
    %693 = arith.addf %692, %691 : vector<8x128xf32>
    %694 = arith.divf %692, %693 : vector<8x128xf32>
    %695 = math.tanh %673 : vector<8x128xf32>
    %c96_i32_257 = arith.constant 96 : i32
    %696 = tpu.dynamic_rotate %694 by %c96_i32_257 dim 1 : vector<8x128xf32>, i32 -> vector<8x128xf32>
    %c64_i32_258 = arith.constant 64 : i32
    %697 = tpu.dynamic_rotate %695 by %c64_i32_258 dim 1 : vector<8x128xf32>, i32 -> vector<8x128xf32>
    %c32_i32_259 = arith.constant 32 : i32
    %698 = tpu.dynamic_rotate %694 by %c32_i32_259 dim 1 : vector<8x128xf32>, i32 -> vector<8x128xf32>
    %699 = arith.mulf %696, %689 : vector<8x128xf32>
    %700 = arith.mulf %694, %697 : vector<8x128xf32>
    %701 = arith.addf %699, %700 : vector<8x128xf32>
    %702 = math.tanh %701 : vector<8x128xf32>
    %703 = arith.mulf %698, %702 : vector<8x128xf32>
    %704 = tpu.concatenate %688, %703 in 1 : vector<8x128xf32>, vector<8x128xf32> -> vector<8x256xf32>
    %705 = tpu.concatenate %686, %701 in 1 : vector<8x128xf32>, vector<8x128xf32> -> vector<8x256xf32>
    %c6_i32_260 = arith.constant 6 : i32
    %c8_i32_261 = arith.constant 8 : i32
    %706 = arith.muli %c6_i32_260, %c8_i32_261 : i32
    %707 = tpu.assume_multiple %706, 8 : i32
    %c7_i32_262 = arith.constant 7 : i32
    %708 = arith.subi %c7_i32_262, %c6_i32_260 : i32
    %c8_i32_263 = arith.constant 8 : i32
    %709 = arith.muli %708, %c8_i32_263 : i32
    %710 = tpu.assume_multiple %709, 8 : i32
    %c0_264 = arith.constant 0 : index
    %c0_265 = arith.constant 0 : index
    %711 = vector.load %arg5[%c0_264, %c0_265] : memref<256x256xf32, #tpu.memory_space<vmem>>, vector<256x256xf32>
    %cst_266 = arith.constant dense<0.000000e+00> : vector<8x256xf32>
    %712 = tpu.matmul %704, %711, %cst_266 {dimension_numbers = #tpu.dot_dimension_numbers<[1], [0], [0], [1], [0, 0, 1, 1], [], []>} : vector<8x256xf32>, vector<256x256xf32>, vector<8x256xf32> -> vector<8x256xf32>
    %713 = arith.index_cast %707 : i32 to index
    %c0_267 = arith.constant 0 : index
    %714 = vector.load %arg10[%713, %c0_267] : memref<64x256xf32, #tpu.memory_space<vmem>>, vector<8x128xf32>
    %715 = vector.extract_strided_slice %712 {offsets = [0, 0], sizes = [8, 128], strides = [1, 1]} : vector<8x256xf32> to vector<8x128xf32>
    %716 = arith.addf %714, %715 : vector<8x128xf32>
    %717 = arith.index_cast %710 : i32 to index
    %c128_268 = arith.constant 128 : index
    %718 = vector.load %arg10[%717, %c128_268] : memref<64x256xf32, #tpu.memory_space<vmem>>, vector<8x128xf32>
    %719 = vector.extract_strided_slice %712 {offsets = [0, 128], sizes = [8, 128], strides = [1, 1]} : vector<8x256xf32> to vector<8x128xf32>
    %720 = arith.addf %718, %719 : vector<8x128xf32>
    %721 = vector.extract_strided_slice %705 {offsets = [0, 0], sizes = [8, 128], strides = [1, 1]} : vector<8x256xf32> to vector<8x128xf32>
    %722 = arith.negf %716 : vector<8x128xf32>
    %723 = math.exp %722 : vector<8x128xf32>
    %cst_269 = arith.constant 1.000000e+00 : f32
    %724 = vector.broadcast %cst_269 : f32 to vector<8x128xf32>
    %725 = arith.addf %724, %723 : vector<8x128xf32>
    %726 = arith.divf %724, %725 : vector<8x128xf32>
    %727 = math.tanh %716 : vector<8x128xf32>
    %c96_i32_270 = arith.constant 96 : i32
    %728 = tpu.dynamic_rotate %726 by %c96_i32_270 dim 1 : vector<8x128xf32>, i32 -> vector<8x128xf32>
    %c64_i32_271 = arith.constant 64 : i32
    %729 = tpu.dynamic_rotate %727 by %c64_i32_271 dim 1 : vector<8x128xf32>, i32 -> vector<8x128xf32>
    %c32_i32_272 = arith.constant 32 : i32
    %730 = tpu.dynamic_rotate %726 by %c32_i32_272 dim 1 : vector<8x128xf32>, i32 -> vector<8x128xf32>
    %731 = arith.mulf %728, %721 : vector<8x128xf32>
    %732 = arith.mulf %726, %729 : vector<8x128xf32>
    %733 = arith.addf %731, %732 : vector<8x128xf32>
    %734 = math.tanh %733 : vector<8x128xf32>
    %735 = arith.mulf %730, %734 : vector<8x128xf32>
    %736 = vector.extract_strided_slice %705 {offsets = [0, 128], sizes = [8, 128], strides = [1, 1]} : vector<8x256xf32> to vector<8x128xf32>
    %737 = arith.negf %720 : vector<8x128xf32>
    %738 = math.exp %737 : vector<8x128xf32>
    %cst_273 = arith.constant 1.000000e+00 : f32
    %739 = vector.broadcast %cst_273 : f32 to vector<8x128xf32>
    %740 = arith.addf %739, %738 : vector<8x128xf32>
    %741 = arith.divf %739, %740 : vector<8x128xf32>
    %742 = math.tanh %720 : vector<8x128xf32>
    %c96_i32_274 = arith.constant 96 : i32
    %743 = tpu.dynamic_rotate %741 by %c96_i32_274 dim 1 : vector<8x128xf32>, i32 -> vector<8x128xf32>
    %c64_i32_275 = arith.constant 64 : i32
    %744 = tpu.dynamic_rotate %742 by %c64_i32_275 dim 1 : vector<8x128xf32>, i32 -> vector<8x128xf32>
    %c32_i32_276 = arith.constant 32 : i32
    %745 = tpu.dynamic_rotate %741 by %c32_i32_276 dim 1 : vector<8x128xf32>, i32 -> vector<8x128xf32>
    %746 = arith.mulf %743, %736 : vector<8x128xf32>
    %747 = arith.mulf %741, %744 : vector<8x128xf32>
    %748 = arith.addf %746, %747 : vector<8x128xf32>
    %749 = math.tanh %748 : vector<8x128xf32>
    %750 = arith.mulf %745, %749 : vector<8x128xf32>
    %751 = tpu.concatenate %735, %750 in 1 : vector<8x128xf32>, vector<8x128xf32> -> vector<8x256xf32>
    %752 = tpu.concatenate %733, %748 in 1 : vector<8x128xf32>, vector<8x128xf32> -> vector<8x256xf32>
    %c7_i32_277 = arith.constant 7 : i32
    %c8_i32_278 = arith.constant 8 : i32
    %753 = arith.muli %c7_i32_277, %c8_i32_278 : i32
    %754 = tpu.assume_multiple %753, 8 : i32
    %c7_i32_279 = arith.constant 7 : i32
    %755 = arith.subi %c7_i32_279, %c7_i32_277 : i32
    %c8_i32_280 = arith.constant 8 : i32
    %756 = arith.muli %755, %c8_i32_280 : i32
    %757 = tpu.assume_multiple %756, 8 : i32
    %c0_281 = arith.constant 0 : index
    %c0_282 = arith.constant 0 : index
    %758 = vector.load %arg5[%c0_281, %c0_282] : memref<256x256xf32, #tpu.memory_space<vmem>>, vector<256x256xf32>
    %cst_283 = arith.constant dense<0.000000e+00> : vector<8x256xf32>
    %759 = tpu.matmul %751, %758, %cst_283 {dimension_numbers = #tpu.dot_dimension_numbers<[1], [0], [0], [1], [0, 0, 1, 1], [], []>} : vector<8x256xf32>, vector<256x256xf32>, vector<8x256xf32> -> vector<8x256xf32>
    %760 = arith.index_cast %754 : i32 to index
    %c0_284 = arith.constant 0 : index
    %761 = vector.load %arg10[%760, %c0_284] : memref<64x256xf32, #tpu.memory_space<vmem>>, vector<8x128xf32>
    %762 = vector.extract_strided_slice %759 {offsets = [0, 0], sizes = [8, 128], strides = [1, 1]} : vector<8x256xf32> to vector<8x128xf32>
    %763 = arith.addf %761, %762 : vector<8x128xf32>
    %764 = arith.index_cast %757 : i32 to index
    %c128_285 = arith.constant 128 : index
    %765 = vector.load %arg10[%764, %c128_285] : memref<64x256xf32, #tpu.memory_space<vmem>>, vector<8x128xf32>
    %766 = vector.extract_strided_slice %759 {offsets = [0, 128], sizes = [8, 128], strides = [1, 1]} : vector<8x256xf32> to vector<8x128xf32>
    %767 = arith.addf %765, %766 : vector<8x128xf32>
    %768 = vector.extract_strided_slice %752 {offsets = [0, 0], sizes = [8, 128], strides = [1, 1]} : vector<8x256xf32> to vector<8x128xf32>
    %769 = arith.negf %763 : vector<8x128xf32>
    %770 = math.exp %769 : vector<8x128xf32>
    %cst_286 = arith.constant 1.000000e+00 : f32
    %771 = vector.broadcast %cst_286 : f32 to vector<8x128xf32>
    %772 = arith.addf %771, %770 : vector<8x128xf32>
    %773 = arith.divf %771, %772 : vector<8x128xf32>
    %774 = math.tanh %763 : vector<8x128xf32>
    %c96_i32_287 = arith.constant 96 : i32
    %775 = tpu.dynamic_rotate %773 by %c96_i32_287 dim 1 : vector<8x128xf32>, i32 -> vector<8x128xf32>
    %c64_i32_288 = arith.constant 64 : i32
    %776 = tpu.dynamic_rotate %774 by %c64_i32_288 dim 1 : vector<8x128xf32>, i32 -> vector<8x128xf32>
    %c32_i32_289 = arith.constant 32 : i32
    %777 = tpu.dynamic_rotate %773 by %c32_i32_289 dim 1 : vector<8x128xf32>, i32 -> vector<8x128xf32>
    %778 = arith.mulf %775, %768 : vector<8x128xf32>
    %779 = arith.mulf %773, %776 : vector<8x128xf32>
    %780 = arith.addf %778, %779 : vector<8x128xf32>
    %781 = math.tanh %780 : vector<8x128xf32>
    %782 = arith.mulf %777, %781 : vector<8x128xf32>
    %783 = vector.extract_strided_slice %752 {offsets = [0, 128], sizes = [8, 128], strides = [1, 1]} : vector<8x256xf32> to vector<8x128xf32>
    %784 = arith.negf %767 : vector<8x128xf32>
    %785 = math.exp %784 : vector<8x128xf32>
    %cst_290 = arith.constant 1.000000e+00 : f32
    %786 = vector.broadcast %cst_290 : f32 to vector<8x128xf32>
    %787 = arith.addf %786, %785 : vector<8x128xf32>
    %788 = arith.divf %786, %787 : vector<8x128xf32>
    %789 = math.tanh %767 : vector<8x128xf32>
    %c96_i32_291 = arith.constant 96 : i32
    %790 = tpu.dynamic_rotate %788 by %c96_i32_291 dim 1 : vector<8x128xf32>, i32 -> vector<8x128xf32>
    %c64_i32_292 = arith.constant 64 : i32
    %791 = tpu.dynamic_rotate %789 by %c64_i32_292 dim 1 : vector<8x128xf32>, i32 -> vector<8x128xf32>
    %c32_i32_293 = arith.constant 32 : i32
    %792 = tpu.dynamic_rotate %788 by %c32_i32_293 dim 1 : vector<8x128xf32>, i32 -> vector<8x128xf32>
    %793 = arith.mulf %790, %783 : vector<8x128xf32>
    %794 = arith.mulf %788, %791 : vector<8x128xf32>
    %795 = arith.addf %793, %794 : vector<8x128xf32>
    %796 = math.tanh %795 : vector<8x128xf32>
    %797 = arith.mulf %792, %796 : vector<8x128xf32>
    %798 = tpu.concatenate %782, %797 in 1 : vector<8x128xf32>, vector<8x128xf32> -> vector<8x256xf32>
    %799 = tpu.concatenate %780, %795 in 1 : vector<8x128xf32>, vector<8x128xf32> -> vector<8x256xf32>
    %c8_i32_294 = arith.constant 8 : i32
    %c0_295 = arith.constant 0 : index
    %c0_296 = arith.constant 0 : index
    %800 = vector.load %arg7[%c0_295, %c0_296] : memref<256x128xf32, #tpu.memory_space<vmem>>, vector<256x128xf32>
    %cst_297 = arith.constant dense<0.000000e+00> : vector<8x128xf32>
    %801 = tpu.matmul %798, %800, %cst_297 {dimension_numbers = #tpu.dot_dimension_numbers<[1], [0], [0], [1], [0, 0, 1, 1], [], []>} : vector<8x256xf32>, vector<256x128xf32>, vector<8x128xf32> -> vector<8x128xf32>
    %c0_298 = arith.constant 0 : index
    %c0_299 = arith.constant 0 : index
    %802 = vector.load %arg8[%c0_298, %c0_299] : memref<1x128xf32, #tpu.memory_space<vmem>>, vector<1x128xf32>
    %803 = vector.broadcast %802 : vector<1x128xf32> to vector<8x128xf32>
    %804 = arith.addf %801, %803 : vector<8x128xf32>
    %805 = math.tanh %804 : vector<8x128xf32>
    %c0_300 = arith.constant 0 : index
    %c0_301 = arith.constant 0 : index
    %806 = vector.load %arg9[%c0_300, %c0_301] : memref<8x128xf32, #tpu.memory_space<vmem>>, vector<8x128xf32>
    tpu.vector_store %arg9[%c0_300, %c0_301], %805 {strides = array<i32>} : memref<8x128xf32, #tpu.memory_space<vmem>>, vector<8x128xf32>,
    return
  }
}

</mosaic_0001>

<bundles_post_ra>
// kernel: bilstm_sentiment_forward.1
= control target key start
LH: loop header
LB: loop body
LE: loop exit
PB: predicated region body
PF: predicated region fallthrough
CT: control target
= control target key end

     0   :  { %14 = vsyncpa [#allocation5], 0  ;;  %s5508_s0 = inlined_call_operand.vmem [shape: f32[64,128], index: 0, kind: input, shape index: {}]   ;;  %s5509_s1 = inlined_call_operand.hbm [shape: f32[128,256], index: 1, kind: input, shape index: {}]   ;;  %s5510_s2 = inlined_call_operand.hbm [shape: f32[256,256], index: 2, kind: input, shape index: {}]   ;;  %s5511_s3 = inlined_call_operand.vmem [shape: f32[1,256], index: 3, kind: input, shape index: {}]   ;;  %s5512_s4 = inlined_call_operand.hbm [shape: f32[256,256], index: 4, kind: input, shape index: {}]   ;;  %s5513_s5 = inlined_call_operand.hbm [shape: f32[256,256], index: 5, kind: input, shape index: {}]   ;;  %s5514_s6 = inlined_call_operand.vmem [shape: f32[1,256], index: 6, kind: input, shape index: {}]   ;;  %s5515_s7 = inlined_call_operand.hbm [shape: f32[256,128], index: 7, kind: input, shape index: {}]   ;;  %s5516_s8 = inlined_call_operand.vmem [shape: f32[1,128], index: 8, kind: input, shape index: {}]   ;;  %s5517_s9 = inlined_call_operand.vmem [shape: f32[8,128], index: 9, kind: output, shape index: {}]  }
   0x1   :  { %15 = vsyncpa [#allocation7], 0 }
   0x2   :  { %16 = vsyncpa [#allocation10], 0  ;;  %s3551_s30 = smov [#allocation6]   ;;  %s3552_s11 = smov [#allocation9]  }
   0x3   :  { %s36_s10 = sshll.u32 %s3551_s30, 4  ;;  %s62_s12 = sshll.u32 %s3552_s11, 4  ;;  %s37_s10 = int_to_ptr.vmem [resolvable:$true] %s36_s10  ;;  %s63_s12 = int_to_ptr.vmem [resolvable:$true] %s62_s12 }
   0x4   :  { %s3453_s13 = scalar_lea.vmem %s37_s10, 8192  ;;  %p3458_p1 = scmp.lt.s32.totalorder %s37_s10, %s37_s10 }
   0x5   :  { %p3454_p0 = scmp.ne.s32.totalorder %s37_s10, %s3453_s13  ;;  %p3459_p2 = scmp.lt.s32.totalorder %s3453_s13, %s3453_s13 }
   0x7   :  { %p3460_p3 = por %p3459_p2, %p3458_p1 }
   0x9   :  { %p3461_p4 = pnand %p3460_p3, %p3454_p0 }
   0xb   :  { %3464 = shalt.err (!%p3461_p4)
}
   0xc   :  { %s3553_s14 = smov 256   ;;  %s3554_s15 = smov 16  }
   0xd   :  { %42 = dma.hbm_to_vmem [thread:$0]  %s5510_s2, 8192, %s37_s10, [#allocation7], %s3553_s14, %s3553_s14, %s3554_s15  }
   0xe   :  { %s3473_s18 = scalar_lea.vmem %s63_s12, 8192  ;;  %p3478_p6 = scmp.lt.s32.totalorder %s63_s12, %s63_s12 }
   0xf   :  { %p3474_p5 = scmp.ne.s32.totalorder %s63_s12, %s3473_s18  ;;  %p3479_p7 = scmp.lt.s32.totalorder %s3473_s18, %s3473_s18 }
  0x11   :  { %p3480_p8 = por %p3479_p7, %p3478_p6 }
  0x13   :  { %p3481_p9 = pnand %p3480_p8, %p3474_p5 }
  0x15   :  { %3484 = shalt.err (!%p3481_p9)
}
  0x16   :  { %68 = dma.hbm_to_vmem [thread:$0]  %s5513_s5, 8192, %s63_s12, [#allocation10], %s3553_s14, %s3553_s14, %s3554_s15  }
  0x17   :  { %s3555_s21 = smov [#allocation4]   ;;  %s3556_s23 = smov [#allocation8]  }
  0x18   :  { %s24_s22 = sshll.u32 %s3555_s21, 4  ;;  %s50_s24 = sshll.u32 %s3556_s23, 4  ;;  %s25_s22 = int_to_ptr.vmem [resolvable:$true] %s24_s22  ;;  %s51_s24 = int_to_ptr.vmem [resolvable:$true] %s50_s24 }
  0x19   :  { %s3493_s2 = scalar_lea.vmem %s25_s22, 4096  ;;  %p3498_p11 = scmp.lt.s32.totalorder %s25_s22, %s25_s22 }
  0x1a   :  { %p3494_p10 = scmp.ne.s32.totalorder %s25_s22, %s3493_s2  ;;  %p3499_p12 = scmp.lt.s32.totalorder %s3493_s2, %s3493_s2 }
  0x1c   :  { %p3500_p13 = por %p3499_p12, %p3498_p11 }
  0x1e   :  { %p3501_p0 = pnand %p3500_p13, %p3494_p10 }
  0x20   :  { %3504 = shalt.err (!%p3501_p0)
}
  0x21   :  { %30 = dma.hbm_to_vmem [thread:$0]  %s5509_s1, 4096, %s25_s22, [#allocation5], %s3553_s14, %s3553_s14, %s3554_s15  }
  0x22   :  { %s3513_s5 = scalar_lea.vmem %s51_s24, 8192  ;;  %p3518_p2 = scmp.lt.s32.totalorder %s51_s24, %s51_s24 }
  0x23   :  { %p3514_p1 = scmp.ne.s32.totalorder %s51_s24, %s3513_s5  ;;  %p3519_p3 = scmp.lt.s32.totalorder %s3513_s5, %s3513_s5 }
  0x25   :  { %p3520_p4 = por %p3519_p3, %p3518_p2 }
  0x27   :  { %p3521_p5 = pnand %p3520_p4, %p3514_p1 }
  0x29   :  { %3524 = shalt.err (!%p3521_p5)
}
  0x2a   :  { %56 = dma.hbm_to_vmem [thread:$0]  %s5512_s4, 8192, %s51_s24, [#allocation7], %s3553_s14, %s3553_s14, %s3554_s15  }
  0x2b   :  { %s3557_s29 = smov [#allocation11]  }
  0x2c   :  { %s76_s30 = sshll.u32 %s3557_s29, 4  ;;  %s77_s30 = int_to_ptr.vmem [resolvable:$true] %s76_s30 }
  0x2d   :  { %s3533_s10 = scalar_lea.vmem %s77_s30, 4096  ;;  %p3538_p7 = scmp.lt.s32.totalorder %s77_s30, %s77_s30 }
  0x2e   :  { %p3534_p6 = scmp.ne.s32.totalorder %s77_s30, %s3533_s10  ;;  %p3539_p8 = scmp.lt.s32.totalorder %s3533_s10, %s3533_s10 }
  0x30   :  { %p3540_p9 = por %p3539_p8, %p3538_p7 }
  0x32   :  { %p3541_p10 = pnand %p3540_p9, %p3534_p6 }
  0x34   :  { %3544 = shalt.err (!%p3541_p10)
}
  0x35   :  { %s3558_s1 = smov 128   ;;  %s3559_s11 = smov 8  }
  0x36   :  { %82 = dma.hbm_to_vmem [thread:$0]  %s5515_s7, 4096, %s77_s30, [#allocation10], %s3558_s1, %s3558_s1, %s3559_s11  }
  0x37   :  { %3545 = dma.done.wait [#allocation5], 4096  }
  0x38   :  { %3546 = vsyncadd [#allocation5], 4294963200 }
  0x39   :  { %3547 = dma.done.wait [#allocation7], 16384  }
  0x3a   :  { %3548 = vsyncadd [#allocation7], 4294950912 }
  0x3b   :  { %3549 = dma.done.wait [#allocation10], 12288  }
  0x3c   :  { %3550 = vsyncadd [#allocation10], 4294955008  ;;  %v5520_v0 = vmov 0.0   ;;  %v139_v1 = vld [vmem:[#allocation4 + $0xf8] sm:$0xff]  ;;  %v138_v3 = vld [vmem:[#allocation4 + $0xf0] sm:$0xff]  ;;  %s3562_s27 = smov 64  }
  0x3d   :  { %216 = vmatprep.mubr.f32.mxu0 %v5520_v0  ;;  %409 = vmatprep.mubr.f32.mxu1 %v5520_v0  ;;  %v3643_v2 = vld [vmem:[#allocation6 + $0xf8] sm:$0xff]  ;;  %v3646_v4 = vld [vmem:[#allocation6 + $0xf0] sm:$0xff]  ;;  %v137_v5 = vld [vmem:[#allocation4 + $0xe8] sm:$0xff]  ;;  %s3563_s28 = smov 32  }
  0x3e   :  { %152 = vmatprep.subr.mxu0 %v139_v1  ;;  %345 = vmatprep.subr.mxu1 %v3643_v2  ;;  %v3648_v6 = vld [vmem:[#allocation6 + $0xe8] sm:$0xff]  ;;  %v136_v7 = vld [vmem:[#allocation4 + $0xe0] sm:$0xff]  ;;  %v135_v9 = vld [vmem:[#allocation4 + $0xd8] sm:$0xff] }
  0x3f   :  { %153 = vmatpush1.msra.mxu0 %v138_v3  ;;  %346 = vmatpush1.msra.mxu1 %v3646_v4  ;;  %v3651_v8 = vld [vmem:[#allocation6 + $0xe0] sm:$0xff]  ;;  %v3654_v10 = vld [vmem:[#allocation6 + $0xd8] sm:$0xff]  ;;  %v134_v11 = vld [vmem:[#allocation4 + $0xd0] sm:$0xff] }
  0x40   :  { %154 = vmatprep.subr.mxu0 %v137_v5  ;;  %347 = vmatprep.subr.mxu1 %v3648_v6  ;;  %v3656_v12 = vld [vmem:[#allocation6 + $0xd0] sm:$0xff]  ;;  %v133_v13 = vld [vmem:[#allocation4 + $0xc8] sm:$0xff]  ;;  %v132_v15 = vld [vmem:[#allocation4 + $0xc0] sm:$0xff] }
  0x41   :  { %155 = vmatpush1.msra.mxu0 %v136_v7  ;;  %348 = vmatpush1.msra.mxu1 %v3651_v8  ;;  %v3659_v14 = vld [vmem:[#allocation6 + $0xc8] sm:$0xff]  ;;  %v3662_v16 = vld [vmem:[#allocation6 + $0xc0] sm:$0xff]  ;;  %v131_v17 = vld [vmem:[#allocation4 + $0xb8] sm:$0xff] }
  0x42   :  { %156 = vmatprep.subr.mxu0 %v135_v9  ;;  %349 = vmatprep.subr.mxu1 %v3654_v10  ;;  %v3665_v18 = vld [vmem:[#allocation6 + $0xb8] sm:$0xff]  ;;  %v130_v19 = vld [vmem:[#allocation4 + $0xb0] sm:$0xff]  ;;  %v129_v21 = vld [vmem:[#allocation4 + $0xa8] sm:$0xff] }
  0x43   :  { %157 = vmatpush1.msra.mxu0 %v134_v11  ;;  %350 = vmatpush1.msra.mxu1 %v3656_v12  ;;  %v3668_v20 = vld [vmem:[#allocation6 + $0xb0] sm:$0xff]  ;;  %v3671_v22 = vld [vmem:[#allocation6 + $0xa8] sm:$0xff]  ;;  %v128_v23 = vld [vmem:[#allocation4 + $0xa0] sm:$0xff] }
  0x44   :  { %158 = vmatprep.subr.mxu0 %v133_v13  ;;  %351 = vmatprep.subr.mxu1 %v3659_v14  ;;  %v3674_v24 = vld [vmem:[#allocation6 + $0xa0] sm:$0xff]  ;;  %v127_v25 = vld [vmem:[#allocation4 + $0x98] sm:$0xff]  ;;  %v126_v27 = vld [vmem:[#allocation4 + $0x90] sm:$0xff] }
  0x45   :  { %159 = vmatpush1.msra.mxu0 %v132_v15  ;;  %352 = vmatpush1.msra.mxu1 %v3662_v16  ;;  %v3677_v26 = vld [vmem:[#allocation6 + $0x98] sm:$0xff]  ;;  %v3680_v28 = vld [vmem:[#allocation6 + $0x90] sm:$0xff]  ;;  %v125_v29 = vld [vmem:[#allocation4 + $0x88] sm:$0xff] }
  0x46   :  { %160 = vmatprep.subr.mxu0 %v131_v17  ;;  %353 = vmatprep.subr.mxu1 %v3665_v18  ;;  %v3683_v30 = vld [vmem:[#allocation6 + $0x88] sm:$0xff]  ;;  %v124_v31 = vld [vmem:[#allocation4 + $0x80] sm:$0xff]  ;;  %v123_v33 = vld [vmem:[#allocation4 + $0x78] sm:$0xff] }
  0x47   :  { %161 = vmatpush1.msra.mxu0 %v130_v19  ;;  %354 = vmatpush1.msra.mxu1 %v3668_v20  ;;  %v3686_v32 = vld [vmem:[#allocation6 + $0x80] sm:$0xff]  ;;  %v3689_v34 = vld [vmem:[#allocation6 + $0x78] sm:$0xff]  ;;  %v122_v35 = vld [vmem:[#allocation4 + $0x70] sm:$0xff] }
  0x48   :  { %162 = vmatprep.subr.mxu0 %v129_v21  ;;  %355 = vmatprep.subr.mxu1 %v3671_v22  ;;  %v3692_v36 = vld [vmem:[#allocation6 + $0x70] sm:$0xff]  ;;  %v121_v37 = vld [vmem:[#allocation4 + $0x68] sm:$0xff]  ;;  %v120_v39 = vld [vmem:[#allocation4 + $0x60] sm:$0xff] }
  0x49   :  { %163 = vmatpush1.msra.mxu0 %v128_v23  ;;  %356 = vmatpush1.msra.mxu1 %v3674_v24  ;;  %v3695_v38 = vld [vmem:[#allocation6 + $0x68] sm:$0xff]  ;;  %v3698_v40 = vld [vmem:[#allocation6 + $0x60] sm:$0xff]  ;;  %v119_v41 = vld [vmem:[#allocation4 + $0x58] sm:$0xff] }
  0x4a   :  { %164 = vmatprep.subr.mxu0 %v127_v25  ;;  %357 = vmatprep.subr.mxu1 %v3677_v26  ;;  %v3701_v42 = vld [vmem:[#allocation6 + $0x58] sm:$0xff]  ;;  %v118_v43 = vld [vmem:[#allocation4 + $0x50] sm:$0xff]  ;;  %v117_v45 = vld [vmem:[#allocation4 + $0x48] sm:$0xff] }
  0x4b   :  { %165 = vmatpush1.msra.mxu0 %v126_v27  ;;  %358 = vmatpush1.msra.mxu1 %v3680_v28  ;;  %v3704_v44 = vld [vmem:[#allocation6 + $0x50] sm:$0xff]  ;;  %v3707_v46 = vld [vmem:[#allocation6 + $0x48] sm:$0xff]  ;;  %v116_v47 = vld [vmem:[#allocation4 + $0x40] sm:$0xff] }
  0x4c   :  { %166 = vmatprep.subr.mxu0 %v125_v29  ;;  %359 = vmatprep.subr.mxu1 %v3683_v30  ;;  %v3710_v48 = vld [vmem:[#allocation6 + $0x40] sm:$0xff]  ;;  %v115_v49 = vld [vmem:[#allocation4 + $0x38] sm:$0xff]  ;;  %v114_v51 = vld [vmem:[#allocation4 + $0x30] sm:$0xff] }
  0x4d   :  { %167 = vmatpush1.msra.mxu0 %v124_v31  ;;  %360 = vmatpush1.msra.mxu1 %v3686_v32  ;;  %v3713_v50 = vld [vmem:[#allocation6 + $0x38] sm:$0xff]  ;;  %v3716_v52 = vld [vmem:[#allocation6 + $0x30] sm:$0xff]  ;;  %v113_v53 = vld [vmem:[#allocation4 + $0x28] sm:$0xff] }
  0x4e   :  { %168 = vmatprep.subr.mxu0 %v123_v33  ;;  %361 = vmatprep.subr.mxu1 %v3689_v34  ;;  %v3719_v54 = vld [vmem:[#allocation6 + $0x28] sm:$0xff]  ;;  %v112_v55 = vld [vmem:[#allocation4 + $0x20] sm:$0xff]  ;;  %v111_v57 = vld [vmem:[#allocation4 + $0x18] sm:$0xff] }
  0x4f   :  { %169 = vmatpush1.msra.mxu0 %v122_v35  ;;  %362 = vmatpush1.msra.mxu1 %v3692_v36  ;;  %v3722_v56 = vld [vmem:[#allocation6 + $0x20] sm:$0xff]  ;;  %v3725_v58 = vld [vmem:[#allocation6 + $0x18] sm:$0xff]  ;;  %v110_v59 = vld [vmem:[#allocation4 + $0x10] sm:$0xff] }
  0x50   :  { %170 = vmatprep.subr.mxu0 %v121_v37  ;;  %363 = vmatprep.subr.mxu1 %v3695_v38  ;;  %v3728_v60 = vld [vmem:[#allocation6 + $0x10] sm:$0xff]  ;;  %v109_v61 = vld [vmem:[#allocation4 + $0x8] sm:$0xff]  ;;  %v108_v63 = vld [vmem:[#allocation4] sm:$0xff] }
  0x51   :  { %171 = vmatpush1.msra.mxu0 %v120_v39  ;;  %364 = vmatpush1.msra.mxu1 %v3698_v40  ;;  %v3731_v62 = vld [vmem:[#allocation6 + $0x8] sm:$0xff]  ;;  %v3734_v1 = vld [vmem:[#allocation6] sm:$0xff]  ;;  %v3740_v5 = vld [vmem:[#allocation6 + $0x1f8] sm:$0xff] }
  0x52   :  { %172 = vmatprep.subr.mxu0 %v119_v41  ;;  %365 = vmatprep.subr.mxu1 %v3701_v42  ;;  %v100_v3 = vld [vmem:[%s5508_s0] sm:$0xff]  ;;  %v3743_v7 = vld [vmem:[#allocation6 + $0x1f0] sm:$0xff]  ;;  %v3746_v9 = vld [vmem:[#allocation6 + $0x1e8] sm:$0xff] }
  0x53   :  { %173 = vmatpush1.msra.mxu0 %v118_v43  ;;  %366 = vmatpush1.msra.mxu1 %v3704_v44  ;;  %v3749_v11 = vld [vmem:[#allocation6 + $0x1e0] sm:$0xff]  ;;  %v101_v13 = vld [vmem:[%s5508_s0 + $0x8] sm:$0xff]  ;;  %v3756_v15 = vld [vmem:[#allocation6 + $0x1d8] sm:$0xff] }
  0x54   :  { %174 = vmatprep.subr.mxu0 %v117_v45  ;;  %367 = vmatprep.subr.mxu1 %v3707_v46  ;;  %v3759_v17 = vld [vmem:[#allocation6 + $0x1d0] sm:$0xff]  ;;  %v3763_v19 = vld [vmem:[#allocation6 + $0x1c8] sm:$0xff]  ;;  %v3767_v21 = vld [vmem:[#allocation6 + $0x1c0] sm:$0xff] }
  0x55   :  { %175 = vmatpush1.msra.mxu0 %v116_v47  ;;  %368 = vmatpush1.msra.mxu1 %v3710_v48  ;;  %v102_v23 = vld [vmem:[%s5508_s0 + $0x10] sm:$0xff]  ;;  %v3774_v25 = vld [vmem:[#allocation6 + $0x1b8] sm:$0xff]  ;;  %v3781_v29 = vld [vmem:[#allocation6 + $0x1a8] sm:$0xff] }
  0x56   :  { %176 = vmatprep.subr.mxu0 %v115_v49  ;;  %369 = vmatprep.subr.mxu1 %v3713_v50  ;;  %v3777_v27 = vld [vmem:[#allocation6 + $0x1b0] sm:$0xff]  ;;  %v3785_v31 = vld [vmem:[#allocation6 + $0x1a0] sm:$0xff]  ;;  %v103_v33 = vld [vmem:[%s5508_s0 + $0x18] sm:$0xff] }
  0x57   :  { %177 = vmatpush1.msra.mxu0 %v114_v51  ;;  %370 = vmatpush1.msra.mxu1 %v3716_v52  ;;  %v3792_v35 = vld [vmem:[#allocation6 + $0x198] sm:$0xff]  ;;  %v3795_v37 = vld [vmem:[#allocation6 + $0x190] sm:$0xff]  ;;  %v3799_v39 = vld [vmem:[#allocation6 + $0x188] sm:$0xff] }
  0x58   :  { %178 = vmatprep.subr.mxu0 %v113_v53  ;;  %371 = vmatprep.subr.mxu1 %v3719_v54  ;;  %v3803_v41 = vld [vmem:[#allocation6 + $0x180] sm:$0xff]  ;;  %v3810_v45 = vld [vmem:[#allocation6 + $0x178] sm:$0xff]  ;;  %v3813_v47 = vld [vmem:[#allocation6 + $0x170] sm:$0xff] }
  0x59   :  { %179 = vmatpush1.msra.mxu0 %v112_v55  ;;  %372 = vmatpush1.msra.mxu1 %v3722_v56  ;;  %v104_v43 = vld [vmem:[%s5508_s0 + $0x20] sm:$0xff]  ;;  %v3817_v49 = vld [vmem:[#allocation6 + $0x168] sm:$0xff]  ;;  %v3828_v55 = vld [vmem:[#allocation6 + $0x158] sm:$0xff] }
  0x5a   :  { %180 = vmatprep.subr.mxu0 %v111_v57  ;;  %373 = vmatprep.subr.mxu1 %v3725_v58  ;;  %v3821_v51 = vld [vmem:[#allocation6 + $0x160] sm:$0xff]  ;;  %v105_v53 = vld [vmem:[%s5508_s0 + $0x28] sm:$0xff]  ;;  %v3831_v57 = vld [vmem:[#allocation6 + $0x150] sm:$0xff] }
  0x5b   :  { %181 = vmatpush1.msra.mxu0 %v110_v59  ;;  %374 = vmatpush1.msra.mxu1 %v3728_v60  ;;  %v3835_v59 = vld [vmem:[#allocation6 + $0x148] sm:$0xff] }
  0x5c   :  { %182 = vmatprep.subr.mxu0 %v109_v61  ;;  %375 = vmatprep.subr.mxu1 %v3731_v62  ;;  %v3839_v61 = vld [vmem:[#allocation6 + $0x140] sm:$0xff] }
  0x5d   :  { %183 = vmatpush1.msra.mxu0 %v108_v63  ;;  %376 = vmatpush1.msra.mxu1 %v3734_v1  ;;  %5647 = vst [vmem:[#allocation15_spill] sm:$0xff] %v3839_v61  ;;  %v106_v63 = vld [vmem:[%s5508_s0 + $0x30] sm:$0xff] }
  0x5e   :  { %217 = vmatmul.mubr.f32.vlgmr.msra.gmra.mxu0 %v100_v3  ;;  %377 = vmatprep.subr.mxu1 %v3740_v5  ;;  %v3846_v3 = vld [vmem:[#allocation6 + $0x138] sm:$0xff] }
  0x5f   :  { %378 = vmatpush2.msra.mxu1 %v3743_v7  ;;  %222 = vmatprep.mubr.f32.mxu0 %v5520_v0 }
  0x60   :  { %379 = vmatprep.subr.mxu1 %v3746_v9  ;;  %532 = vmatprep.subr.mxu0 %v3643_v2 }
  0x61   :  { %380 = vmatpush2.msra.mxu1 %v3749_v11  ;;  %533 = vmatpush1.msra.mxu0 %v3646_v4 }
  0x62   :  { %223 = vmatmul.mubr.f32.gmra.mxu0 %v101_v13  ;;  %381 = vmatprep.subr.mxu1 %v3756_v15  ;;  %v3849_v13 = vld [vmem:[#allocation6 + $0x130] sm:$0xff] }
  0x63   :  { %382 = vmatpush2.msra.mxu1 %v3759_v17  ;;  %228 = vmatprep.mubr.f32.mxu0 %v5520_v0 }
  0x64   :  { %383 = vmatprep.subr.mxu1 %v3763_v19  ;;  %534 = vmatprep.subr.mxu0 %v3648_v6 }
  0x65   :  { %384 = vmatpush2.msra.mxu1 %v3767_v21  ;;  %535 = vmatpush1.msra.mxu0 %v3651_v8 }
  0x66   :  { %229 = vmatmul.mubr.f32.gmra.mxu0 %v102_v23  ;;  %385 = vmatprep.subr.mxu1 %v3774_v25  ;;  %v3853_v23 = vld [vmem:[#allocation6 + $0x128] sm:$0xff] }
  0x67   :  { %386 = vmatpush2.msra.mxu1 %v3777_v27  ;;  %234 = vmatprep.mubr.f32.mxu0 %v5520_v0 }
  0x68   :  { %387 = vmatprep.subr.mxu1 %v3781_v29  ;;  %536 = vmatprep.subr.mxu0 %v3654_v10 }
  0x69   :  { %388 = vmatpush2.msra.mxu1 %v3785_v31  ;;  %537 = vmatpush1.msra.mxu0 %v3656_v12 }
  0x6a   :  { %235 = vmatmul.mubr.f32.gmra.mxu0 %v103_v33  ;;  %389 = vmatprep.subr.mxu1 %v3792_v35  ;;  %v3857_v33 = vld [vmem:[#allocation6 + $0x120] sm:$0xff] }
  0x6b   :  { %390 = vmatpush2.msra.mxu1 %v3795_v37  ;;  %240 = vmatprep.mubr.f32.mxu0 %v5520_v0  ;;  %5648 = vst [vmem:[#allocation16_spill] sm:$0xff] %v3857_v33 }
  0x6c   :  { %391 = vmatprep.subr.mxu1 %v3799_v39  ;;  %538 = vmatprep.subr.mxu0 %v3659_v14 }
  0x6d   :  { %392 = vmatpush2.msra.mxu1 %v3803_v41  ;;  %539 = vmatpush1.msra.mxu0 %v3662_v16 }
  0x6e   :  { %241 = vmatmul.mubr.f32.gmra.mxu0 %v104_v43  ;;  %393 = vmatprep.subr.mxu1 %v3810_v45  ;;  %v107_v43 = vld [vmem:[%s5508_s0 + $0x38] sm:$0xff] }
  0x6f   :  { %394 = vmatpush2.msra.mxu1 %v3813_v47  ;;  %246 = vmatprep.mubr.f32.mxu0 %v5520_v0 }
  0x70   :  { %395 = vmatprep.subr.mxu1 %v3817_v49  ;;  %540 = vmatprep.subr.mxu0 %v3665_v18 }
  0x71   :  { %396 = vmatpush2.msra.mxu1 %v3821_v51  ;;  %541 = vmatpush1.msra.mxu0 %v3668_v20 }
  0x72   :  { %247 = vmatmul.mubr.f32.gmra.mxu0 %v105_v53  ;;  %397 = vmatprep.subr.mxu1 %v3828_v55  ;;  %v3864_v53 = vld [vmem:[#allocation6 + $0x118] sm:$0xff] }
  0x73   :  { %398 = vmatpush2.msra.mxu1 %v3831_v57  ;;  %252 = vmatprep.mubr.f32.mxu0 %v5520_v0 }
  0x74   :  { %399 = vmatprep.subr.mxu1 %v3835_v59  ;;  %542 = vmatprep.subr.mxu0 %v3671_v22 }
  0x75   :  { %400 = vmatpush2.msra.mxu1 %v3839_v61  ;;  %543 = vmatpush1.msra.mxu0 %v3674_v24  ;;  %v3867_v61 = vld [vmem:[#allocation6 + $0x110] sm:$0xff] }
  0x76   :  { %253 = vmatmul.mubr.f32.gmra.mxu0 %v106_v63  ;;  %401 = vmatprep.subr.mxu1 %v3846_v3  ;;  %v3871_v63 = vld [vmem:[#allocation6 + $0x108] sm:$0xff] }
  0x77   :  { %402 = vmatpush2.msra.mxu1 %v3849_v13  ;;  %258 = vmatprep.mubr.f32.mxu0 %v5520_v0  ;;  %v3875_v0 = vld [vmem:[#allocation6 + $0x100] sm:$0xff] }
  0x78   :  { %403 = vmatprep.subr.mxu1 %v3853_v23  ;;  %544 = vmatprep.subr.mxu0 %v3677_v26 }
  0x79   :  { %404 = vmatpush2.msra.mxu1 %v3857_v33  ;;  %545 = vmatpush1.msra.mxu0 %v3680_v28  ;;  %v5649_v33 = vmov 0.0  }
  0x7a   :  { %259 = vmatmul.mubr.f32.gmra.mxu0 %v107_v43  ;;  %405 = vmatprep.subr.mxu1 %v3864_v53 }
  0x7b   :  { %406 = vmatpush2.msra.mxu1 %v3867_v61  ;;  %546 = vmatprep.subr.mxu0 %v3683_v30 }
  0x7c   :  { %407 = vmatprep.subr.mxu1 %v3871_v63  ;;  %547 = vmatpush1.msra.mxu0 %v3686_v32 }
  0x7d   :  { %408 = vmatpush2.msra.mxu1 %v3875_v0  ;;  %548 = vmatprep.subr.mxu0 %v3689_v34 }
  0x7e   :  { %410 = vmatmul.mubr.f32.vlgmr.msra.gmra.mxu1 %v5649_v33  ;;  %549 = vmatpush1.msra.mxu0 %v3692_v36 }
  0x7f   :  { %550 = vmatprep.subr.mxu0 %v3695_v38  ;;  %719 = vmatprep.subr.mxu1 %v3643_v2  ;;  %v5650_v2 = vld [vmem:[#allocation15_spill] sm:$0xff] }
  0x80   :  { %551 = vmatpush1.msra.mxu0 %v3698_v40  ;;  %720 = vmatpush1.msra.mxu1 %v3646_v4  ;;  %v5651_v4 = vld [vmem:[#allocation16_spill] sm:$0xff] }
  0x81   :  { %552 = vmatprep.subr.mxu0 %v3701_v42  ;;  %721 = vmatprep.subr.mxu1 %v3648_v6  ;;  %v142_v6 = vlaneseq }
  0x82   :  { %553 = vmatpush1.msra.mxu0 %v3704_v44  ;;  %722 = vmatpush1.msra.mxu1 %v3651_v8 }
  0x83   :  { %554 = vmatprep.subr.mxu0 %v3707_v46  ;;  %723 = vmatprep.subr.mxu1 %v3654_v10  ;;  %v3995_v8 = vshrl.u32 %v142_v6, 7 }
  0x84   :  { %555 = vmatpush1.msra.mxu0 %v3710_v48  ;;  %724 = vmatpush1.msra.mxu1 %v3656_v12  ;;  %v140_v12 = vld [vmem:[%s5511_s3] sm:$0x3]  ;;  %s3561_s3 = smov 96  }
  0x85   :  { %556 = vmatprep.subr.mxu0 %v3713_v50  ;;  %725 = vmatprep.subr.mxu1 %v3659_v14  ;;  %5652 = vst [vmem:[#allocation15_spill] sm:$0xff] %v3995_v8  ;;  %v5525_v10 = vsub.s32 1, %v3995_v8  ;;  %v5524_v14 = vsub.s32 0, %v3995_v8  ;;  %v4248_v8 = vld [vmem:[#allocation6 + $0x188] sm:$0xff] }
  0x86   :  { %557 = vmatpush1.msra.mxu0 %v3716_v52  ;;  %726 = vmatpush1.msra.mxu1 %v3662_v16 }
  0x87   :  { %558 = vmatprep.subr.mxu0 %v3719_v54  ;;  %727 = vmatprep.subr.mxu1 %v3665_v18  ;;  %v149_v16 = vrot.slane %v140_v12, %v5525_v10  ;;  %v4244_v10 = vld [vmem:[#allocation6 + $0x190] sm:$0xff] }
  0x88   :  { %559 = vmatpush1.msra.mxu0 %v3722_v56  ;;  %728 = vmatpush1.msra.mxu1 %v3668_v20 }
  0x89   :  { %560 = vmatprep.subr.mxu0 %v3725_v58  ;;  %729 = vmatprep.subr.mxu1 %v3671_v22  ;;  %v145_v22 = vrot.slane %v140_v12, %v5524_v14  ;;  %v4216_v14 = vld [vmem:[#allocation6 + $0x1c0] sm:$0xff] }
  0x8a   :  { %561 = vmatpush1.msra.mxu0 %v3728_v60  ;;  %730 = vmatpush1.msra.mxu1 %v3674_v24 }
  0x8b   :  { %562 = vmatprep.subr.mxu0 %v3731_v62  ;;  %731 = vmatprep.subr.mxu1 %v3677_v26 }
  0x8c   :  { %563 = vmatpush1.msra.mxu0 %v3734_v1  ;;  %732 = vmatpush1.msra.mxu1 %v3680_v28 }
  0x8d   :  { %564 = vmatprep.subr.mxu0 %v3740_v5  ;;  %733 = vmatprep.subr.mxu1 %v3683_v30 }
  0x8e   :  { %565 = vmatpush2.msra.mxu0 %v3743_v7  ;;  %734 = vmatpush1.msra.mxu1 %v3686_v32 }
  0x8f   :  { %566 = vmatprep.subr.mxu0 %v3746_v9  ;;  %735 = vmatprep.subr.mxu1 %v3689_v34 }
  0x90   :  { %567 = vmatpush2.msra.mxu0 %v3749_v11  ;;  %736 = vmatpush1.msra.mxu1 %v3692_v36 }
  0x91   :  { %568 = vmatprep.subr.mxu0 %v3756_v15  ;;  %737 = vmatprep.subr.mxu1 %v3695_v38 }
  0x92   :  { %569 = vmatpush2.msra.mxu0 %v3759_v17  ;;  %738 = vmatpush1.msra.mxu1 %v3698_v40 }
  0x93   :  { %570 = vmatprep.subr.mxu0 %v3763_v19  ;;  %739 = vmatprep.subr.mxu1 %v3701_v42 }
  0x94   :  { %571 = vmatpush2.msra.mxu0 %v3767_v21  ;;  %740 = vmatpush1.msra.mxu1 %v3704_v44 }
  0x95   :  { %572 = vmatprep.subr.mxu0 %v3774_v25  ;;  %741 = vmatprep.subr.mxu1 %v3707_v46 }
  0x96   :  { %573 = vmatpush2.msra.mxu0 %v3777_v27  ;;  %742 = vmatpush1.msra.mxu1 %v3710_v48 }
  0x97   :  { %574 = vmatprep.subr.mxu0 %v3781_v29  ;;  %743 = vmatprep.subr.mxu1 %v3713_v50 }
  0x98   :  { %575 = vmatpush2.msra.mxu0 %v3785_v31  ;;  %744 = vmatpush1.msra.mxu1 %v3716_v52 }
  0x99   :  { %576 = vmatprep.subr.mxu0 %v3792_v35  ;;  %745 = vmatprep.subr.mxu1 %v3719_v54 }
  0x9a   :  { %577 = vmatpush2.msra.mxu0 %v3795_v37  ;;  %746 = vmatpush1.msra.mxu1 %v3722_v56 }
  0x9b   :  { %578 = vmatprep.subr.mxu0 %v3799_v39  ;;  %747 = vmatprep.subr.mxu1 %v3725_v58 }
  0x9c   :  { %579 = vmatpush2.msra.mxu0 %v3803_v41  ;;  %748 = vmatpush1.msra.mxu1 %v3728_v60 }
  0x9d   :  { %580 = vmatprep.subr.mxu0 %v3810_v45  ;;  %749 = vmatprep.subr.mxu1 %v3731_v62 }
  0x9e   :  { %581 = vmatpush2.msra.mxu0 %v3813_v47  ;;  %750 = vmatpush1.msra.mxu1 %v3734_v1 }
  0x9f   :  { %582 = vmatprep.subr.mxu0 %v3817_v49  ;;  %751 = vmatprep.subr.mxu1 %v3740_v5 }
  0xa0   :  { %583 = vmatpush2.msra.mxu0 %v3821_v51  ;;  %752 = vmatpush2.msra.mxu1 %v3743_v7 }
  0xa1   :  { %584 = vmatprep.subr.mxu0 %v3828_v55  ;;  %753 = vmatprep.subr.mxu1 %v3746_v9 }
  0xa2   :  { %585 = vmatpush2.msra.mxu0 %v3831_v57  ;;  %754 = vmatpush2.msra.mxu1 %v3749_v11 }
  0xa3   :  { %586 = vmatprep.subr.mxu0 %v3835_v59  ;;  %755 = vmatprep.subr.mxu1 %v3756_v15 }
  0xa4   :  { %587 = vmatpush2.msra.mxu0 %v5650_v2  ;;  %756 = vmatpush2.msra.mxu1 %v3759_v17 }
  0xa5   :  { %588 = vmatprep.subr.mxu0 %v3846_v3  ;;  %757 = vmatprep.subr.mxu1 %v3763_v19 }
  0xa6   :  { %589 = vmatpush2.msra.mxu0 %v3849_v13  ;;  %758 = vmatpush2.msra.mxu1 %v3767_v21 }
  0xa7   :  { %590 = vmatprep.subr.mxu0 %v3853_v23  ;;  %759 = vmatprep.subr.mxu1 %v3774_v25 }
  0xa8   :  { %591 = vmatpush2.msra.mxu0 %v5651_v4  ;;  %760 = vmatpush2.msra.mxu1 %v3777_v27 }
  0xa9   :  { %592 = vmatprep.subr.mxu0 %v3864_v53  ;;  %761 = vmatprep.subr.mxu1 %v3781_v29 }
  0xaa   :  { %593 = vmatpush2.msra.mxu0 %v3867_v61  ;;  %762 = vmatpush2.msra.mxu1 %v3785_v31 }
  0xab   :  { %594 = vmatprep.subr.mxu0 %v3871_v63  ;;  %763 = vmatprep.subr.mxu1 %v3792_v35 }
  0xac   :  { %595 = vmatpush2.msra.mxu0 %v3875_v0  ;;  %764 = vmatpush2.msra.mxu1 %v3795_v37 }
  0xad   :  { %765 = vmatprep.subr.mxu1 %v3799_v39 }
  0xae   :  { %766 = vmatpush2.msra.mxu1 %v3803_v41 }
  0xaf   :  { %767 = vmatprep.subr.mxu1 %v3810_v45 }
  0xb0   :  { %768 = vmatpush2.msra.mxu1 %v3813_v47 }
  0xb1   :  { %769 = vmatprep.subr.mxu1 %v3817_v49 }
  0xb2   :  { %770 = vmatpush2.msra.mxu1 %v3821_v51 }
  0xb3   :  { %771 = vmatprep.subr.mxu1 %v3828_v55 }
  0xb4   :  { %772 = vmatpush2.msra.mxu1 %v3831_v57 }
  0xb5   :  { %773 = vmatprep.subr.mxu1 %v3835_v59 }
  0xb6   :  { %774 = vmatpush2.msra.mxu1 %v5650_v2 }
  0xb7   :  { %775 = vmatprep.subr.mxu1 %v3846_v3 }
  0xb8   :  { %776 = vmatpush2.msra.mxu1 %v3849_v13 }
  0xb9   :  { %777 = vmatprep.subr.mxu1 %v3853_v23 }
  0xba   :  { %778 = vmatpush2.msra.mxu1 %v5651_v4 }
  0xbb   :  { %779 = vmatprep.subr.mxu1 %v3864_v53 }
  0xbc   :  { %780 = vmatpush2.msra.mxu1 %v3867_v61 }
  0xbd   :  { %781 = vmatprep.subr.mxu1 %v3871_v63 }
  0xbe   :  { %782 = vmatpush2.msra.mxu1 %v3875_v0 }
 0x11e   :  { %v218_v18 = vpop.f32.mrf.mxu0 }
 0x11f   :  { %v219_v19 = vadd.f32 %v218_v18, %v145_v22 }
 0x120   :  { %v220_v20 = vpop.f32.mrf.mxu0 }
 0x121   :  { %v4006_v0 = vadd.f32 %v220_v20, %v149_v16 }
 0x122   :  { %v224_v24 = vpop.f32.mrf.mxu0 }
 0x123   :  { %5653 = vst [vmem:[#allocation16_spill] sm:$0xff] %v4006_v0  ;;  %v4008_v26 = vadd.f32 %v224_v24, %v145_v22  ;;  %v4264_v0 = vld [vmem:[#allocation6 + $0x168] sm:$0xff] }
 0x124   :  { %v226_v28 = vpop.f32.mrf.mxu0  ;;  %5669 = vst [vmem:[#allocation32_spill] sm:$0xff] %v4264_v0 }
 0x125   :  { %v4010_v30 = vadd.f32 %v226_v28, %v149_v16 }
 0x126   :  { %v230_v32 = vpop.f32.mrf.mxu0 }
 0x127   :  { %5654 = vst [vmem:[#allocation17_spill] sm:$0xff] %v4010_v30  ;;  %v4012_v34 = vadd.f32 %v230_v32, %v145_v22  ;;  %v4272_v30 = vld [vmem:[#allocation6 + $0x158] sm:$0xff] }
 0x128   :  { %v232_v36 = vpop.f32.mrf.mxu0  ;;  %5671 = vst [vmem:[#allocation34_spill] sm:$0xff] %v4272_v30 }
 0x129   :  { %v4014_v38 = vadd.f32 %v232_v36, %v149_v16 }
 0x12a   :  { %v236_v40 = vpop.f32.mrf.mxu0 }
 0x12b   :  { %5655 = vst [vmem:[#allocation18_spill] sm:$0xff] %v4014_v38  ;;  %v4016_v42 = vadd.f32 %v236_v40, %v145_v22  ;;  %v4280_v38 = vld [vmem:[#allocation6 + $0x148] sm:$0xff] }
 0x12c   :  { %v238_v44 = vpop.f32.mrf.mxu0  ;;  %5673 = vst [vmem:[#allocation36_spill] sm:$0xff] %v4280_v38 }
 0x12d   :  { %5656 = vst [vmem:[#allocation19_spill] sm:$0xff] %v4016_v42  ;;  %v4018_v46 = vadd.f32 %v238_v44, %v149_v16  ;;  %v4298_v42 = vld [vmem:[#allocation6 + $0x120] sm:$0xff] }
 0x12e   :  { %v242_v48 = vpop.f32.mrf.mxu0  ;;  %5678 = vst [vmem:[#allocation41_spill] sm:$0xff] %v4298_v42 }
 0x12f   :  { %5657 = vst [vmem:[#allocation20_spill] sm:$0xff] %v4018_v46  ;;  %v4020_v50 = vadd.f32 %v242_v48, %v145_v22  ;;  %v4288_v46 = vld [vmem:[#allocation6 + $0x138] sm:$0xff] }
 0x130   :  { %v244_v52 = vpop.f32.mrf.mxu0  ;;  %5675 = vst [vmem:[#allocation38_spill] sm:$0xff] %v4288_v46 }
 0x131   :  { %5658 = vst [vmem:[#allocation21_spill] sm:$0xff] %v4020_v50  ;;  %v4022_v54 = vadd.f32 %v244_v52, %v149_v16  ;;  %v4293_v50 = vld [vmem:[#allocation6 + $0x130] sm:$0xff] }
 0x132   :  { %v248_v56 = vpop.f32.mrf.mxu0  ;;  %5676 = vst [vmem:[#allocation39_spill] sm:$0xff] %v4293_v50 }
 0x133   :  { %5659 = vst [vmem:[#allocation22_spill] sm:$0xff] %v4022_v54  ;;  %v4024_v58 = vadd.f32 %v248_v56, %v145_v22  ;;  %v4296_v54 = vld [vmem:[#allocation6 + $0x128] sm:$0xff] }
 0x134   :  { %v250_v60 = vpop.f32.mrf.mxu0  ;;  %5677 = vst [vmem:[#allocation40_spill] sm:$0xff] %v4296_v54 }
 0x135   :  { %5660 = vst [vmem:[#allocation23_spill] sm:$0xff] %v4024_v58  ;;  %v4026_v62 = vadd.f32 %v250_v60, %v149_v16  ;;  %v4284_v58 = vld [vmem:[#allocation6 + $0x140] sm:$0xff] }
 0x136   :  { %v254_v1 = vpop.f32.mrf.mxu0  ;;  %5674 = vst [vmem:[#allocation37_spill] sm:$0xff] %v4284_v58 }
 0x137   :  { %v4028_v5 = vadd.f32 %v254_v1, %v145_v22 }
 0x138   :  { %v256_v7 = vpop.f32.mrf.mxu0 }
 0x139   :  { %5661 = vst [vmem:[#allocation24_spill] sm:$0xff] %v4028_v5  ;;  %v257_v9 = vadd.f32 %v256_v7, %v149_v16  ;;  %v4277_v5 = vld [vmem:[#allocation6 + $0x150] sm:$0xff] }
 0x13a   :  { %v260_v11 = vpop.f32.mrf.mxu0  ;;  %5672 = vst [vmem:[#allocation35_spill] sm:$0xff] %v4277_v5 }
 0x13b   :  { %v4030_v15 = vadd.f32 %v260_v11, %v145_v22 }
 0x13c   :  { %v262_v17 = vpop.f32.mrf.mxu0 }
 0x13d   :  { %5662 = vst [vmem:[#allocation25_spill] sm:$0xff] %v4030_v15  ;;  %v263_v25 = vadd.f32 %v262_v17, %v149_v16  ;;  %v4269_v15 = vld [vmem:[#allocation6 + $0x160] sm:$0xff] }
 0x13e   :  { %v411_v21 = vpop.f32.mrf.mxu1  ;;  %5670 = vst [vmem:[#allocation33_spill] sm:$0xff] %v4269_v15 }
 0x13f   :  { %v420_v27 = vadd.f32 %v411_v21, %v219_v19 }
 0x140   :  { %v413_v29 = vpop.f32.mrf.mxu1 }
 0x141   :  { %v3042_v31 = vmul.f32 -1.442695, %v420_v27  ;;  %v425_v35 = vadd.f32 %v413_v29, %v263_v25 }
 0x143   :  { %3123 = vpow2.f32 %v3042_v31  ;;  %v3043_v37 = vmul.f32 -1.442695, %v425_v35 }
 0x145   :  { %3125 = vpow2.f32 %v3043_v37 }
 0x150   :  { %v3124_v39 = vpop.eup %3123 }
 0x151   :  { %v429_v41 = vadd.f32 1.0, %v3124_v39 }
 0x152   :  { %v3126_v45 = vpop.eup %3125 }
 0x153   :  { %3127 = vrcp.f32 %v429_v41  ;;  %v447_v47 = vadd.f32 1.0, %v3126_v45 }
 0x155   :  { %3129 = vrcp.f32 %v447_v47 }
 0x156   :  { %3131 = vtanh.f32 %v420_v27 }
 0x157   :  { %3133 = vtanh.f32 %v425_v35 }
 0x160   :  { %v3128_v49 = vpop.eup %3127 }
 0x161   :  { %433 = vrot.lane.b32.xlu1 %v3128_v49, %s3561_s3 }
 0x162   :  { %v3130_v51 = vpop.eup %3129 }
 0x163   :  { %451 = vrot.lane.b32.xlu0 %v3130_v51, %s3561_s3  ;;  %v3132_v55 = vpop.eup %3131 }
 0x164   :  { %v3134_v57 = vpop.eup %3133 }
 0x165   :  { %435 = vrot.lane.b32.xlu1 %v3132_v55, %s3562_s27  ;;  %v4063_v55 = vld [vmem:[#allocation6 + $0xf8] sm:$0xff] }
 0x166   :  { %906 = vmatprep.subr.mxu0 %v4063_v55  ;;  %1093 = vmatprep.subr.mxu1 %v4063_v55 }
 0x167   :  { %453 = vrot.lane.b32.xlu0 %v3134_v57, %s3562_s27  ;;  %v4065_v57 = vld [vmem:[#allocation6 + $0xf0] sm:$0xff] }
 0x169   :  { %437 = vrot.lane.b32.xlu1 %v3128_v49, %s3563_s28 }
 0x16b   :  { %455 = vrot.lane.b32.xlu0 %v3130_v51, %s3563_s28 }
 0x1d3   :  { %v434_v59 = vpop.permute.xlu1 %433 }
 0x1d4   :  { %v439_v13 = vmul.f32 0.0, %v434_v59  ;;  %v4067_v59 = vld [vmem:[#allocation6 + $0xe8] sm:$0xff] }
 0x1d5   :  { %v452_v61 = vpop.permute.xlu0 %451 }
 0x1d6   :  { %v457_v53 = vmul.f32 0.0, %v452_v61  ;;  %v4070_v61 = vld [vmem:[#allocation6 + $0xe0] sm:$0xff] }
 0x1d7   :  { %v436_v3 = vpop.permute.xlu1 %435 }
 0x1d8   :  { %v440_v23 = vmul.f32 %v3128_v49, %v436_v3  ;;  %v4074_v3 = vld [vmem:[#allocation6 + $0xd8] sm:$0xff] }
 0x1d9   :  { %v454_v43 = vpop.permute.xlu0 %453 }
 0x1da   :  { %v441_v63 = vadd.f32 %v440_v23, %v439_v13  ;;  %v458_v2 = vmul.f32 %v3130_v51, %v454_v43  ;;  %v4078_v13 = vld [vmem:[#allocation6 + $0xd0] sm:$0xff]  ;;  %v4082_v23 = vld [vmem:[#allocation6 + $0xc8] sm:$0xff]  ;;  %v4086_v43 = vld [vmem:[#allocation6 + $0xc0] sm:$0xff] }
 0x1db   :  { %v438_v18 = vpop.permute.xlu1 %437 }
 0x1dc   :  { %v459_v4 = vadd.f32 %v458_v2, %v457_v53  ;;  %3135 = vtanh.f32 %v441_v63  ;;  %v4090_v53 = vld [vmem:[#allocation6 + $0xb8] sm:$0xff]  ;;  %v4098_v2 = vld [vmem:[#allocation6 + $0xa8] sm:$0xff] }
 0x1dd   :  { %v456_v16 = vpop.permute.xlu0 %455 }
 0x1de   :  { %3137 = vtanh.f32 %v459_v4 }
 0x1e9   :  { %v3136_v6 = vpop.eup %3135 }
 0x1ea   :  { %v4040_v22 = vmul.f32 %v3136_v6, %v438_v18  ;;  %v4106_v6 = vld [vmem:[#allocation6 + $0x98] sm:$0xff]  ;;  %v4118_v18 = vld [vmem:[#allocation6 + $0x80] sm:$0xff] }
 0x1eb   :  { %v3138_v12 = vpop.eup %3137 }
 0x1ec   :  { %v4038_v20 = vmul.f32 %v3138_v12, %v456_v16  ;;  %5664 = vst [vmem:[#allocation27_spill] sm:$0xff] %v4040_v22  ;;  %v4110_v12 = vld [vmem:[#allocation6 + $0x90] sm:$0xff]  ;;  %v4114_v16 = vld [vmem:[#allocation6 + $0x88] sm:$0xff] }
 0x1ee   :  { %5663 = vst [vmem:[#allocation26_spill] sm:$0xff] %v4038_v20  ;;  %596 = vmatprep.mubr.f32.mxu0 %v4038_v20  ;;  %v4252_v20 = vld [vmem:[#allocation6 + $0x180] sm:$0xff] }
 0x1ef   :  { %597 = vmatmul.mubr.f32.vlgmr.msra.gmra.mxu0 %v4040_v22 }
 0x1f0   :  { %907 = vmatpush1.msra.mxu0 %v4065_v57 }
 0x1f1   :  { %908 = vmatprep.subr.mxu0 %v4067_v59 }
 0x1f2   :  { %909 = vmatpush1.msra.mxu0 %v4070_v61 }
 0x1f3   :  { %910 = vmatprep.subr.mxu0 %v4074_v3 }
 0x1f4   :  { %911 = vmatpush1.msra.mxu0 %v4078_v13 }
 0x1f5   :  { %912 = vmatprep.subr.mxu0 %v4082_v23 }
 0x1f6   :  { %913 = vmatpush1.msra.mxu0 %v4086_v43 }
 0x1f7   :  { %914 = vmatprep.subr.mxu0 %v4090_v53 }
 0x2af   :  { %v598_v24 = vpop.f32.mrf.mxu0 }
 0x2b0   :  { %v607_v28 = vadd.f32 %v598_v24, %v4008_v26  ;;  %v4122_v24 = vld [vmem:[#allocation6 + $0x78] sm:$0xff] }
 0x2b1   :  { %v600_v32 = vpop.f32.mrf.mxu0 }
 0x2b2   :  { %v3044_v36 = vmul.f32 -1.442695, %v607_v28  ;;  %v612_v40 = vadd.f32 %v600_v32, %v257_v9  ;;  %v4130_v32 = vld [vmem:[#allocation6 + $0x68] sm:$0xff] }
 0x2b4   :  { %3139 = vpow2.f32 %v3044_v36  ;;  %v3045_v44 = vmul.f32 -1.442695, %v612_v40  ;;  %v4134_v36 = vld [vmem:[#allocation6 + $0x60] sm:$0xff] }
 0x2b5   :  { %3141 = vtanh.f32 %v612_v40  ;;  %v4138_v40 = vld [vmem:[#allocation6 + $0x58] sm:$0xff] }
 0x2b6   :  { %3143 = vpow2.f32 %v3045_v44  ;;  %v4142_v44 = vld [vmem:[#allocation6 + $0x50] sm:$0xff] }
 0x2b7   :  { %3145 = vtanh.f32 %v607_v28  ;;  %v4126_v28 = vld [vmem:[#allocation6 + $0x70] sm:$0xff] }
 0x2c1   :  { %v3140_v48 = vpop.eup %3139 }
 0x2c2   :  { %v3142_v52 = vpop.eup %3141  ;;  %v616_v56 = vadd.f32 1.0, %v3140_v48 }
 0x2c3   :  { %v3144_v60 = vpop.eup %3143  ;;  %640 = vrot.lane.b32.xlu1 %v3142_v52, %s3562_s27 }
 0x2c4   :  { %3147 = vrcp.f32 %v616_v56  ;;  %v634_v1 = vadd.f32 1.0, %v3144_v60  ;;  %v3146_v7 = vpop.eup %3145 }
 0x2c6   :  { %3149 = vrcp.f32 %v634_v1 }
 0x2c7   :  { %622 = vrot.lane.b32.xlu1 %v3146_v7, %s3562_s27 }
 0x2d1   :  { %v3148_v26 = vpop.eup %3147 }
 0x2d2   :  { %624 = vrot.lane.b32.xlu1 %v3148_v26, %s3563_s28 }
 0x2d3   :  { %v3150_v9 = vpop.eup %3149 }
 0x2d4   :  { %638 = vrot.lane.b32.xlu0 %v3150_v9, %s3561_s3 }
 0x2d8   :  { %620 = vrot.lane.b32.xlu0 %v3148_v26, %s3561_s3 }
 0x2dc   :  { %642 = vrot.lane.b32.xlu0 %v3150_v9, %s3563_s28 }
 0x335   :  { %v641_v11 = vpop.permute.xlu1 %640 }
 0x336   :  { %v645_v19 = vmul.f32 %v3150_v9, %v641_v11  ;;  %v4156_v9 = vld [vmem:[#allocation6 + $0x40] sm:$0xff]  ;;  %v4158_v11 = vld [vmem:[#allocation6 + $0x38] sm:$0xff] }
 0x339   :  { %v623_v25 = vpop.permute.xlu1 %622 }
 0x33a   :  { %v627_v31 = vmul.f32 %v3148_v26, %v623_v25  ;;  %v4153_v26 = vld [vmem:[#allocation6 + $0x48] sm:$0xff] }
 0x33b   :  { %v4180_v25 = vld [vmem:[#allocation6 + $0x8] sm:$0xff] }
 0x344   :  { %v625_v49 = vpop.permute.xlu1 %624 }
 0x346   :  { %v639_v17 = vpop.permute.xlu0 %638 }
 0x347   :  { %v644_v21 = vmul.f32 %v639_v17, %v459_v4  ;;  %v4102_v4 = vld [vmem:[#allocation6 + $0xa0] sm:$0xff]  ;;  %v4160_v17 = vld [vmem:[#allocation6 + $0x30] sm:$0xff] }
 0x349   :  { %v4051_v27 = vadd.f32 %v645_v19, %v644_v21  ;;  %v4174_v19 = vld [vmem:[#allocation6 + $0x18] sm:$0xff]  ;;  %v4176_v21 = vld [vmem:[#allocation6 + $0x10] sm:$0xff] }
 0x34a   :  { %v621_v29 = vpop.permute.xlu0 %620 }
 0x34b   :  { %3151 = vtanh.f32 %v4051_v27  ;;  %v626_v35 = vmul.f32 %v621_v29, %v441_v63  ;;  %v4094_v63 = vld [vmem:[#allocation6 + $0xb0] sm:$0xff]  ;;  %v4184_v29 = vld [vmem:[#allocation6] sm:$0xff] }
 0x34c   :  { %915 = vmatpush1.msra.mxu0 %v4094_v63 }
 0x34d   :  { %v4054_v37 = vadd.f32 %v627_v31, %v626_v35  ;;  %916 = vmatprep.subr.mxu0 %v4098_v2  ;;  %v4188_v31 = vld [vmem:[#allocation6 + $0x1f8] sm:$0xff]  ;;  %v4192_v35 = vld [vmem:[#allocation6 + $0x1f0] sm:$0xff] }
 0x34e   :  { %v643_v41 = vpop.permute.xlu0 %642  ;;  %917 = vmatpush1.msra.mxu0 %v4102_v4 }
 0x34f   :  { %3153 = vtanh.f32 %v4054_v37  ;;  %918 = vmatprep.subr.mxu0 %v4106_v6 }
 0x350   :  { %919 = vmatpush1.msra.mxu0 %v4110_v12 }
 0x351   :  { %920 = vmatprep.subr.mxu0 %v4114_v16 }
 0x352   :  { %921 = vmatpush1.msra.mxu0 %v4118_v18 }
 0x353   :  { %922 = vmatprep.subr.mxu0 %v4122_v24 }
 0x354   :  { %923 = vmatpush1.msra.mxu0 %v4126_v28 }
 0x355   :  { %924 = vmatprep.subr.mxu0 %v4130_v32 }
 0x356   :  { %925 = vmatpush1.msra.mxu0 %v4134_v36 }
 0x357   :  { %926 = vmatprep.subr.mxu0 %v4138_v40 }
 0x358   :  { %v3152_v39 = vpop.eup %3151  ;;  %927 = vmatpush1.msra.mxu0 %v4142_v44 }
 0x359   :  { %v4057_v45 = vmul.f32 %v3152_v39, %v643_v41  ;;  %928 = vmatprep.subr.mxu0 %v4153_v26  ;;  %v4196_v39 = vld [vmem:[#allocation6 + $0x1e8] sm:$0xff]  ;;  %v4200_v41 = vld [vmem:[#allocation6 + $0x1e0] sm:$0xff] }
 0x35a   :  { %929 = vmatpush1.msra.mxu0 %v4156_v9 }
 0x35b   :  { %5665 = vst [vmem:[#allocation28_spill] sm:$0xff] %v4057_v45  ;;  %783 = vmatprep.mubr.f32.mxu1 %v4057_v45  ;;  %930 = vmatprep.subr.mxu0 %v4158_v11  ;;  %v4256_v45 = vld [vmem:[#allocation6 + $0x178] sm:$0xff] }
 0x35c   :  { %v3154_v47 = vpop.eup %3153  ;;  %931 = vmatpush1.msra.mxu0 %v4160_v17  ;;  %5667 = vst [vmem:[#allocation30_spill] sm:$0xff] %v4256_v45 }
 0x35d   :  { %v4060_v51 = vmul.f32 %v3154_v47, %v625_v49  ;;  %v4204_v49 = vld [vmem:[#allocation6 + $0x1d8] sm:$0xff] }
 0x35f   :  { %5666 = vst [vmem:[#allocation29_spill] sm:$0xff] %v4060_v51  ;;  %784 = vmatmul.mubr.f32.vlgmr.msra.gmra.mxu1 %v4060_v51  ;;  %v4260_v51 = vld [vmem:[#allocation6 + $0x170] sm:$0xff] }
 0x360   :  { %1094 = vmatpush1.msra.mxu1 %v4065_v57  ;;  %5668 = vst [vmem:[#allocation31_spill] sm:$0xff] %v4260_v51 }
 0x361   :  { %1095 = vmatprep.subr.mxu1 %v4067_v59 }
 0x362   :  { %1096 = vmatpush1.msra.mxu1 %v4070_v61 }
 0x363   :  { %1097 = vmatprep.subr.mxu1 %v4074_v3 }
 0x364   :  { %1098 = vmatpush1.msra.mxu1 %v4078_v13 }
 0x365   :  { %1099 = vmatprep.subr.mxu1 %v4082_v23 }
 0x366   :  { %1100 = vmatpush1.msra.mxu1 %v4086_v43 }
 0x367   :  { %1101 = vmatprep.subr.mxu1 %v4090_v53 }
 0x368   :  { %1102 = vmatpush1.msra.mxu1 %v4094_v63 }
 0x369   :  { %1103 = vmatprep.subr.mxu1 %v4098_v2 }
 0x36a   :  { %1104 = vmatpush1.msra.mxu1 %v4102_v4 }
 0x36b   :  { %1105 = vmatprep.subr.mxu1 %v4106_v6 }
 0x36c   :  { %1106 = vmatpush1.msra.mxu1 %v4110_v12 }
 0x36d   :  { %1107 = vmatprep.subr.mxu1 %v4114_v16 }
 0x36e   :  { %1108 = vmatpush1.msra.mxu1 %v4118_v18 }
 0x36f   :  { %1109 = vmatprep.subr.mxu1 %v4122_v24 }
 0x370   :  { %1110 = vmatpush1.msra.mxu1 %v4126_v28 }
 0x371   :  { %1111 = vmatprep.subr.mxu1 %v4130_v32 }
 0x372   :  { %1112 = vmatpush1.msra.mxu1 %v4134_v36 }
 0x373   :  { %1113 = vmatprep.subr.mxu1 %v4138_v40 }
 0x374   :  { %1114 = vmatpush1.msra.mxu1 %v4142_v44 }
 0x375   :  { %1115 = vmatprep.subr.mxu1 %v4153_v26 }
 0x376   :  { %1116 = vmatpush1.msra.mxu1 %v4156_v9 }
 0x377   :  { %1117 = vmatprep.subr.mxu1 %v4158_v11 }
 0x378   :  { %1118 = vmatpush1.msra.mxu1 %v4160_v17 }
 0x41f   :  { %v785_v48 = vpop.f32.mrf.mxu1 }
 0x420   :  { %v794_v52 = vadd.f32 %v785_v48, %v4012_v34  ;;  %v4168_v34 = vld [vmem:[#allocation6 + $0x28] sm:$0xff] }
 0x421   :  { %v787_v56 = vpop.f32.mrf.mxu1  ;;  %932 = vmatprep.subr.mxu0 %v4168_v34  ;;  %1119 = vmatprep.subr.mxu1 %v4168_v34 }
 0x422   :  { %v3046_v60 = vmul.f32 -1.442695, %v794_v52  ;;  %v799_v1 = vadd.f32 %v787_v56, %v4026_v62  ;;  %v4172_v62 = vld [vmem:[#allocation6 + $0x20] sm:$0xff]  ;;  %v4208_v56 = vld [vmem:[#allocation6 + $0x1d0] sm:$0xff] }
 0x423   :  { %933 = vmatpush1.msra.mxu0 %v4172_v62  ;;  %1120 = vmatpush1.msra.mxu1 %v4172_v62 }
 0x424   :  { %3155 = vpow2.f32 %v3046_v60  ;;  %v3047_v7 = vmul.f32 -1.442695, %v799_v1  ;;  %934 = vmatprep.subr.mxu0 %v4174_v19  ;;  %1121 = vmatprep.subr.mxu1 %v4174_v19 }
 0x425   :  { %3157 = vtanh.f32 %v799_v1  ;;  %935 = vmatpush1.msra.mxu0 %v4176_v21  ;;  %1122 = vmatpush1.msra.mxu1 %v4176_v21 }
 0x426   :  { %3159 = vpow2.f32 %v3047_v7  ;;  %936 = vmatprep.subr.mxu0 %v4180_v25  ;;  %1123 = vmatprep.subr.mxu1 %v4180_v25  ;;  %v4214_v7 = vld [vmem:[#allocation6 + $0x1c8] sm:$0xff] }
 0x427   :  { %3161 = vtanh.f32 %v794_v52  ;;  %937 = vmatpush1.msra.mxu0 %v4184_v29  ;;  %1124 = vmatpush1.msra.mxu1 %v4184_v29 }
 0x428   :  { %938 = vmatprep.subr.mxu0 %v4188_v31  ;;  %1125 = vmatprep.subr.mxu1 %v4188_v31 }
 0x429   :  { %939 = vmatpush2.msra.mxu0 %v4192_v35  ;;  %1126 = vmatpush2.msra.mxu1 %v4192_v35 }
 0x42a   :  { %940 = vmatprep.subr.mxu0 %v4196_v39  ;;  %1127 = vmatprep.subr.mxu1 %v4196_v39 }
 0x42b   :  { %941 = vmatpush2.msra.mxu0 %v4200_v41  ;;  %1128 = vmatpush2.msra.mxu1 %v4200_v41 }
 0x42c   :  { %942 = vmatprep.subr.mxu0 %v4204_v49  ;;  %1129 = vmatprep.subr.mxu1 %v4204_v49 }
 0x42d   :  { %943 = vmatpush2.msra.mxu0 %v4208_v56  ;;  %1130 = vmatpush2.msra.mxu1 %v4208_v56 }
 0x42e   :  { %944 = vmatprep.subr.mxu0 %v4214_v7  ;;  %1131 = vmatprep.subr.mxu1 %v4214_v7 }
 0x42f   :  { %945 = vmatpush2.msra.mxu0 %v4216_v14  ;;  %1132 = vmatpush2.msra.mxu1 %v4216_v14 }
 0x431   :  { %v3156_v47 = vpop.eup %3155 }
 0x432   :  { %v3158_v48 = vpop.eup %3157  ;;  %v803_v52 = vadd.f32 1.0, %v3156_v47 }
 0x433   :  { %v3160_v60 = vpop.eup %3159  ;;  %827 = vrot.lane.b32.xlu1 %v3158_v48, %s3562_s27  ;;  %v4225_v48 = vld [vmem:[#allocation6 + $0x1b8] sm:$0xff] }
 0x434   :  { %3163 = vrcp.f32 %v803_v52  ;;  %v821_v1 = vadd.f32 1.0, %v3160_v60  ;;  %v3162_v47 = vpop.eup %3161  ;;  %946 = vmatprep.subr.mxu0 %v4225_v48  ;;  %v4228_v52 = vld [vmem:[#allocation6 + $0x1b0] sm:$0xff]  ;;  %v4232_v60 = vld [vmem:[#allocation6 + $0x1a8] sm:$0xff]  ;;  %1133 = vmatprep.subr.mxu1 %v4225_v48 }
 0x435   :  { %947 = vmatpush2.msra.mxu0 %v4228_v52  ;;  %1134 = vmatpush2.msra.mxu1 %v4228_v52 }
 0x436   :  { %3165 = vrcp.f32 %v821_v1  ;;  %948 = vmatprep.subr.mxu0 %v4232_v60  ;;  %v4236_v1 = vld [vmem:[#allocation6 + $0x1a0] sm:$0xff]  ;;  %1135 = vmatprep.subr.mxu1 %v4232_v60 }
 0x437   :  { %809 = vrot.lane.b32.xlu1 %v3162_v47, %s3562_s27  ;;  %949 = vmatpush2.msra.mxu0 %v4236_v1  ;;  %v4240_v47 = vld [vmem:[#allocation6 + $0x198] sm:$0xff] }
 0x438   :  { %950 = vmatprep.subr.mxu0 %v4240_v47  ;;  %1136 = vmatpush2.msra.mxu1 %v4236_v1 }
 0x439   :  { %951 = vmatpush2.msra.mxu0 %v4244_v10  ;;  %1137 = vmatprep.subr.mxu1 %v4240_v47 }
 0x43a   :  { %952 = vmatprep.subr.mxu0 %v4248_v8  ;;  %1138 = vmatpush2.msra.mxu1 %v4244_v10 }
 0x43b   :  { %953 = vmatpush2.msra.mxu0 %v4252_v20  ;;  %1139 = vmatprep.subr.mxu1 %v4248_v8 }
 0x43c   :  { %954 = vmatprep.subr.mxu0 %v4256_v45  ;;  %1140 = vmatpush2.msra.mxu1 %v4252_v20 }
 0x43d   :  { %955 = vmatpush2.msra.mxu0 %v4260_v51  ;;  %1141 = vmatprep.subr.mxu1 %v4256_v45  ;;  %v4313_v45 = vld [vmem:[#allocation6 + $0x100] sm:$0xff] }
 0x43e   :  { %956 = vmatprep.subr.mxu0 %v4264_v0  ;;  %1142 = vmatpush2.msra.mxu1 %v4260_v51  ;;  %v4300_v51 = vld [vmem:[#allocation6 + $0x118] sm:$0xff]  ;;  %5682 = vst [vmem:[#allocation45_spill] sm:$0xff] %v4313_v45 }
 0x43f   :  { %957 = vmatpush2.msra.mxu0 %v4269_v15  ;;  %1143 = vmatprep.subr.mxu1 %v4264_v0  ;;  %5679 = vst [vmem:[#allocation42_spill] sm:$0xff] %v4300_v51  ;;  %v4308_v0 = vld [vmem:[#allocation6 + $0x108] sm:$0xff] }
 0x440   :  { %958 = vmatprep.subr.mxu0 %v4272_v30  ;;  %1144 = vmatpush2.msra.mxu1 %v4269_v15  ;;  %v4306_v15 = vld [vmem:[#allocation6 + $0x110] sm:$0xff]  ;;  %5681 = vst [vmem:[#allocation44_spill] sm:$0xff] %v4308_v0 }
 0x441   :  { %v3164_v22 = vpop.eup %3163  ;;  %959 = vmatpush2.msra.mxu0 %v4277_v5  ;;  %1145 = vmatprep.subr.mxu1 %v4272_v30  ;;  %5680 = vst [vmem:[#allocation43_spill] sm:$0xff] %v4306_v15 }
 0x442   :  { %811 = vrot.lane.b32.xlu1 %v3164_v22, %s3563_s28  ;;  %960 = vmatprep.subr.mxu0 %v4280_v38 }
 0x443   :  { %v3166_v33 = vpop.eup %3165  ;;  %961 = vmatpush2.msra.mxu0 %v4284_v58  ;;  %1146 = vmatpush2.msra.mxu1 %v4277_v5 }
 0x444   :  { %825 = vrot.lane.b32.xlu0 %v3166_v33, %s3561_s3  ;;  %962 = vmatprep.subr.mxu0 %v4288_v46 }
 0x445   :  { %963 = vmatpush2.msra.mxu0 %v4293_v50  ;;  %1147 = vmatprep.subr.mxu1 %v4280_v38 }
 0x446   :  { %964 = vmatprep.subr.mxu0 %v4296_v54  ;;  %1148 = vmatpush2.msra.mxu1 %v4284_v58 }
 0x447   :  { %965 = vmatpush2.msra.mxu0 %v4298_v42  ;;  %1149 = vmatprep.subr.mxu1 %v4288_v46 }
 0x448   :  { %807 = vrot.lane.b32.xlu0 %v3164_v22, %s3561_s3  ;;  %966 = vmatprep.subr.mxu0 %v4300_v51 }
 0x449   :  { %967 = vmatpush2.msra.mxu0 %v4306_v15  ;;  %1150 = vmatpush2.msra.mxu1 %v4293_v50 }
 0x44a   :  { %968 = vmatprep.subr.mxu0 %v4308_v0  ;;  %1151 = vmatprep.subr.mxu1 %v4296_v54 }
 0x44b   :  { %969 = vmatpush2.msra.mxu0 %v4313_v45  ;;  %1152 = vmatpush2.msra.mxu1 %v4298_v42 }
 0x44c   :  { %829 = vrot.lane.b32.xlu0 %v3166_v33, %s3563_s28  ;;  %1270 = vmatprep.subr.mxu0 %v4063_v55 }
 0x44d   :  { %1153 = vmatprep.subr.mxu1 %v4300_v51 }
 0x44e   :  { %1154 = vmatpush2.msra.mxu1 %v4306_v15 }
 0x44f   :  { %1155 = vmatprep.subr.mxu1 %v4308_v0 }
 0x450   :  { %1156 = vmatpush2.msra.mxu1 %v4313_v45 }
 0x451   :  { %1447 = vmatprep.subr.mxu1 %v4063_v55 }
 0x4a5   :  { %v828_v46 = vpop.permute.xlu1 %827 }
 0x4a6   :  { %v832_v38 = vmul.f32 %v3166_v33, %v828_v46 }
 0x4a9   :  { %v810_v54 = vpop.permute.xlu1 %809 }
 0x4aa   :  { %v814_v42 = vmul.f32 %v3164_v22, %v810_v54  ;;  %v5688_v54 = vld [vmem:[#allocation33_spill] sm:$0xff]  ;;  %v5691_v22 = vld [vmem:[#allocation36_spill] sm:$0xff] }
 0x4b4   :  { %v812_v46 = vpop.permute.xlu1 %811 }
 0x4b6   :  { %v826_v58 = vpop.permute.xlu0 %825 }
 0x4b7   :  { %v831_v50 = vmul.f32 %v826_v58, %v4051_v27  ;;  %v5689_v58 = vld [vmem:[#allocation34_spill] sm:$0xff]  ;;  %v5692_v27 = vld [vmem:[#allocation37_spill] sm:$0xff] }
 0x4b9   :  { %v4330_v5 = vadd.f32 %v832_v38, %v831_v50  ;;  %v5687_v50 = vld [vmem:[#allocation32_spill] sm:$0xff] }
 0x4ba   :  { %v808_v30 = vpop.permute.xlu0 %807 }
 0x4bb   :  { %3167 = vtanh.f32 %v4330_v5  ;;  %v813_v15 = vmul.f32 %v808_v30, %v4054_v37  ;;  %v5685_v30 = vld [vmem:[#allocation30_spill] sm:$0xff] }
 0x4bc   :  { %v5693_v37 = vld [vmem:[#allocation38_spill] sm:$0xff] }
 0x4bd   :  { %v4334_v51 = vadd.f32 %v814_v42, %v813_v15  ;;  %v5686_v42 = vld [vmem:[#allocation31_spill] sm:$0xff] }
 0x4be   :  { %v830_v55 = vpop.permute.xlu0 %829  ;;  %v5690_v15 = vld [vmem:[#allocation35_spill] sm:$0xff] }
 0x4bf   :  { %3169 = vtanh.f32 %v4334_v51 }
 0x4c8   :  { %v3168_v45 = vpop.eup %3167 }
 0x4c9   :  { %v4337_v0 = vmul.f32 %v3168_v45, %v830_v55  ;;  %v5694_v45 = vld [vmem:[#allocation39_spill] sm:$0xff]  ;;  %v5695_v55 = vld [vmem:[#allocation40_spill] sm:$0xff] }
 0x4cb   :  { %5683 = vst [vmem:[#allocation46_spill] sm:$0xff] %v4337_v0  ;;  %970 = vmatprep.mubr.f32.mxu0 %v4337_v0  ;;  %v5698_v0 = vld [vmem:[#allocation43_spill] sm:$0xff] }
 0x4cc   :  { %v3170_v33 = vpop.eup %3169 }
 0x4cd   :  { %v4340_v38 = vmul.f32 %v3170_v33, %v812_v46  ;;  %v5696_v33 = vld [vmem:[#allocation41_spill] sm:$0xff]  ;;  %v5697_v46 = vld [vmem:[#allocation42_spill] sm:$0xff] }
 0x4cf   :  { %5684 = vst [vmem:[#allocation47_spill] sm:$0xff] %v4340_v38  ;;  %971 = vmatmul.mubr.f32.vlgmr.msra.gmra.mxu0 %v4340_v38  ;;  %v5699_v38 = vld [vmem:[#allocation44_spill] sm:$0xff] }
 0x4d0   :  { %1271 = vmatpush1.msra.mxu0 %v4065_v57 }
 0x4d1   :  { %1272 = vmatprep.subr.mxu0 %v4067_v59 }
 0x4d2   :  { %1273 = vmatpush1.msra.mxu0 %v4070_v61 }
 0x4d3   :  { %1274 = vmatprep.subr.mxu0 %v4074_v3 }
 0x4d4   :  { %1275 = vmatpush1.msra.mxu0 %v4078_v13 }
 0x4d5   :  { %1276 = vmatprep.subr.mxu0 %v4082_v23 }
 0x4d6   :  { %1277 = vmatpush1.msra.mxu0 %v4086_v43 }
 0x4d7   :  { %1278 = vmatprep.subr.mxu0 %v4090_v53 }
 0x4d8   :  { %1279 = vmatpush1.msra.mxu0 %v4094_v63 }
 0x4d9   :  { %1280 = vmatprep.subr.mxu0 %v4098_v2 }
 0x4da   :  { %1281 = vmatpush1.msra.mxu0 %v4102_v4 }
 0x4db   :  { %1282 = vmatprep.subr.mxu0 %v4106_v6 }
 0x4dc   :  { %1283 = vmatpush1.msra.mxu0 %v4110_v12 }
 0x4dd   :  { %1284 = vmatprep.subr.mxu0 %v4114_v16 }
 0x4de   :  { %1285 = vmatpush1.msra.mxu0 %v4118_v18 }
 0x4df   :  { %1286 = vmatprep.subr.mxu0 %v4122_v24 }
 0x4e0   :  { %1287 = vmatpush1.msra.mxu0 %v4126_v28 }
 0x4e1   :  { %1288 = vmatprep.subr.mxu0 %v4130_v32 }
 0x4e2   :  { %1289 = vmatpush1.msra.mxu0 %v4134_v36 }
 0x4e3   :  { %1290 = vmatprep.subr.mxu0 %v4138_v40 }
 0x4e4   :  { %1291 = vmatpush1.msra.mxu0 %v4142_v44 }
 0x4e5   :  { %1292 = vmatprep.subr.mxu0 %v4153_v26 }
 0x4e6   :  { %1293 = vmatpush1.msra.mxu0 %v4156_v9 }
 0x4e7   :  { %1294 = vmatprep.subr.mxu0 %v4158_v11 }
 0x4e8   :  { %1295 = vmatpush1.msra.mxu0 %v4160_v17 }
 0x4e9   :  { %1296 = vmatprep.subr.mxu0 %v4168_v34 }
 0x4ea   :  { %1297 = vmatpush1.msra.mxu0 %v4172_v62 }
 0x4eb   :  { %1298 = vmatprep.subr.mxu0 %v4174_v19 }
 0x4ec   :  { %1299 = vmatpush1.msra.mxu0 %v4176_v21 }
 0x4ed   :  { %1300 = vmatprep.subr.mxu0 %v4180_v25 }
 0x4ee   :  { %1301 = vmatpush1.msra.mxu0 %v4184_v29 }
 0x4ef   :  { %1302 = vmatprep.subr.mxu0 %v4188_v31 }
 0x4f0   :  { %1303 = vmatpush2.msra.mxu0 %v4192_v35 }
 0x4f1   :  { %1304 = vmatprep.subr.mxu0 %v4196_v39 }
 0x4f2   :  { %1305 = vmatpush2.msra.mxu0 %v4200_v41 }
 0x4f3   :  { %1306 = vmatprep.subr.mxu0 %v4204_v49 }
 0x4f4   :  { %1307 = vmatpush2.msra.mxu0 %v4208_v56 }
 0x4f5   :  { %1308 = vmatprep.subr.mxu0 %v4214_v7 }
 0x4f6   :  { %1309 = vmatpush2.msra.mxu0 %v4216_v14 }
 0x4f7   :  { %1310 = vmatprep.subr.mxu0 %v4225_v48 }
 0x4f8   :  { %1311 = vmatpush2.msra.mxu0 %v4228_v52 }
 0x4f9   :  { %1312 = vmatprep.subr.mxu0 %v4232_v60 }
 0x4fa   :  { %1313 = vmatpush2.msra.mxu0 %v4236_v1 }
 0x4fb   :  { %1314 = vmatprep.subr.mxu0 %v4240_v47 }
 0x4fc   :  { %1315 = vmatpush2.msra.mxu0 %v4244_v10 }
 0x4fd   :  { %1316 = vmatprep.subr.mxu0 %v4248_v8 }
 0x4fe   :  { %1317 = vmatpush2.msra.mxu0 %v4252_v20 }
 0x4ff   :  { %1318 = vmatprep.subr.mxu0 %v5685_v30 }
 0x500   :  { %1319 = vmatpush2.msra.mxu0 %v5686_v42 }
 0x501   :  { %1320 = vmatprep.subr.mxu0 %v5687_v50 }
 0x502   :  { %1321 = vmatpush2.msra.mxu0 %v5688_v54 }
 0x503   :  { %1322 = vmatprep.subr.mxu0 %v5689_v58  ;;  %v5700_v58 = vld [vmem:[#allocation45_spill] sm:$0xff] }
 0x504   :  { %1323 = vmatpush2.msra.mxu0 %v5690_v15 }
 0x505   :  { %1324 = vmatprep.subr.mxu0 %v5691_v22  ;;  %v5701_v22 = vld [vmem:[#allocation19_spill] sm:$0xff] }
 0x506   :  { %1325 = vmatpush2.msra.mxu0 %v5692_v27 }
 0x507   :  { %1326 = vmatprep.subr.mxu0 %v5693_v37  ;;  %v5702_v37 = vld [vmem:[#allocation22_spill] sm:$0xff] }
 0x508   :  { %1327 = vmatpush2.msra.mxu0 %v5694_v45 }
 0x509   :  { %1328 = vmatprep.subr.mxu0 %v5695_v55 }
 0x50a   :  { %1329 = vmatpush2.msra.mxu0 %v5696_v33 }
 0x50b   :  { %1330 = vmatprep.subr.mxu0 %v5697_v46 }
 0x50c   :  { %1331 = vmatpush2.msra.mxu0 %v5698_v0 }
 0x50d   :  { %1332 = vmatprep.subr.mxu0 %v5699_v38 }
 0x50e   :  { %1333 = vmatpush2.msra.mxu0 %v5700_v58 }
 0x58f   :  { %v972_v15 = vpop.f32.mrf.mxu0 }
 0x590   :  { %v981_v54 = vadd.f32 %v972_v15, %v5701_v22 }
 0x591   :  { %v974_v27 = vpop.f32.mrf.mxu0 }
 0x592   :  { %v3048_v50 = vmul.f32 -1.442695, %v981_v54  ;;  %v986_v42 = vadd.f32 %v974_v27, %v5702_v37 }
 0x594   :  { %3171 = vpow2.f32 %v3048_v50  ;;  %v3049_v45 = vmul.f32 -1.442695, %v986_v42 }
 0x595   :  { %3173 = vtanh.f32 %v986_v42 }
 0x596   :  { %3175 = vpow2.f32 %v3049_v45 }
 0x597   :  { %3177 = vtanh.f32 %v981_v54 }
 0x5a1   :  { %v3172_v33 = vpop.eup %3171 }
 0x5a2   :  { %v3174_v46 = vpop.eup %3173  ;;  %v990_v55 = vadd.f32 1.0, %v3172_v33 }
 0x5a3   :  { %v3176_v0 = vpop.eup %3175  ;;  %1014 = vrot.lane.b32.xlu1 %v3174_v46, %s3562_s27 }
 0x5a4   :  { %3179 = vrcp.f32 %v990_v55  ;;  %v1008_v58 = vadd.f32 1.0, %v3176_v0  ;;  %v3178_v38 = vpop.eup %3177 }
 0x5a6   :  { %3181 = vrcp.f32 %v1008_v58 }
 0x5a7   :  { %996 = vrot.lane.b32.xlu1 %v3178_v38, %s3562_s27 }
 0x5b1   :  { %v3180_v15 = vpop.eup %3179 }
 0x5b2   :  { %998 = vrot.lane.b32.xlu1 %v3180_v15, %s3563_s28 }
 0x5b3   :  { %v3182_v50 = vpop.eup %3181 }
 0x5b4   :  { %1012 = vrot.lane.b32.xlu0 %v3182_v50, %s3561_s3 }
 0x5b8   :  { %994 = vrot.lane.b32.xlu0 %v3180_v15, %s3561_s3 }
 0x5bc   :  { %1016 = vrot.lane.b32.xlu0 %v3182_v50, %s3563_s28 }
 0x615   :  { %v1015_v42 = vpop.permute.xlu1 %1014 }
 0x616   :  { %v1019_v22 = vmul.f32 %v3182_v50, %v1015_v42 }
 0x619   :  { %v997_v0 = vpop.permute.xlu1 %996 }
 0x61a   :  { %v1001_v38 = vmul.f32 %v3180_v15, %v997_v0 }
 0x624   :  { %v999_v50 = vpop.permute.xlu1 %998 }
 0x626   :  { %v1013_v54 = vpop.permute.xlu0 %1012 }
 0x627   :  { %v1018_v27 = vmul.f32 %v1013_v54, %v4330_v5  ;;  %v5725_v54 = vld [vmem:[#allocation23_spill] sm:$0xff] }
 0x629   :  { %v4415_v37 = vadd.f32 %v1019_v22, %v1018_v27 }
 0x62a   :  { %v995_v58 = vpop.permute.xlu0 %994 }
 0x62b   :  { %3183 = vtanh.f32 %v4415_v37  ;;  %v1000_v45 = vmul.f32 %v995_v58, %v4334_v51  ;;  %v5705_v51 = vld [vmem:[#allocation30_spill] sm:$0xff] }
 0x62d   :  { %v4419_v55 = vadd.f32 %v1001_v38, %v1000_v45 }
 0x62e   :  { %v1017_v46 = vpop.permute.xlu0 %1016 }
 0x62f   :  { %3185 = vtanh.f32 %v4419_v55 }
 0x638   :  { %v3184_v33 = vpop.eup %3183 }
 0x639   :  { %v4422_v30 = vmul.f32 %v3184_v33, %v1017_v46 }
 0x63b   :  { %5703 = vst [vmem:[#allocation19_spill] sm:$0xff] %v4422_v30  ;;  %1157 = vmatprep.mubr.f32.mxu1 %v4422_v30 }
 0x63c   :  { %v3186_v5 = vpop.eup %3185 }
 0x63d   :  { %v4425_v42 = vmul.f32 %v3186_v5, %v999_v50 }
 0x63f   :  { %5704 = vst [vmem:[#allocation22_spill] sm:$0xff] %v4425_v42  ;;  %1158 = vmatmul.mubr.f32.vlgmr.msra.gmra.mxu1 %v4425_v42  ;;  %v4716_v42 = vld [vmem:[#allocation9 + $0x158] sm:$0xff] }
 0x640   :  { %1448 = vmatpush1.msra.mxu1 %v4065_v57  ;;  %v5706_v57 = vld [vmem:[#allocation31_spill] sm:$0xff] }
 0x641   :  { %1449 = vmatprep.subr.mxu1 %v4067_v59  ;;  %v5708_v59 = vld [vmem:[#allocation33_spill] sm:$0xff] }
 0x642   :  { %1450 = vmatpush1.msra.mxu1 %v4070_v61  ;;  %v5709_v61 = vld [vmem:[#allocation34_spill] sm:$0xff] }
 0x643   :  { %1451 = vmatprep.subr.mxu1 %v4074_v3  ;;  %v5710_v3 = vld [vmem:[#allocation35_spill] sm:$0xff] }
 0x644   :  { %1452 = vmatpush1.msra.mxu1 %v4078_v13  ;;  %v5711_v13 = vld [vmem:[#allocation36_spill] sm:$0xff] }
 0x645   :  { %1453 = vmatprep.subr.mxu1 %v4082_v23  ;;  %v5712_v23 = vld [vmem:[#allocation37_spill] sm:$0xff] }
 0x646   :  { %1454 = vmatpush1.msra.mxu1 %v4086_v43  ;;  %v5716_v43 = vld [vmem:[#allocation41_spill] sm:$0xff] }
 0x647   :  { %1455 = vmatprep.subr.mxu1 %v4090_v53  ;;  %v5717_v53 = vld [vmem:[#allocation42_spill] sm:$0xff] }
 0x648   :  { %1456 = vmatpush1.msra.mxu1 %v4094_v63  ;;  %v5718_v63 = vld [vmem:[#allocation43_spill] sm:$0xff] }
 0x649   :  { %1457 = vmatprep.subr.mxu1 %v4098_v2  ;;  %v5719_v2 = vld [vmem:[#allocation44_spill] sm:$0xff]  ;;  %5743 = vst [vmem:[#allocation43_spill] sm:$0xff] %v4716_v42 }
 0x64a   :  { %1458 = vmatpush1.msra.mxu1 %v4102_v4  ;;  %v5720_v4 = vld [vmem:[#allocation45_spill] sm:$0xff] }
 0x64b   :  { %1459 = vmatprep.subr.mxu1 %v4106_v6 }
 0x64c   :  { %1460 = vmatpush1.msra.mxu1 %v4110_v12  ;;  %v5721_v12 = vld [vmem:[#allocation21_spill] sm:$0xff] }
 0x64d   :  { %1461 = vmatprep.subr.mxu1 %v4114_v16 }
 0x64e   :  { %1462 = vmatpush1.msra.mxu1 %v4118_v18 }
 0x64f   :  { %1463 = vmatprep.subr.mxu1 %v4122_v24 }
 0x650   :  { %1464 = vmatpush1.msra.mxu1 %v4126_v28  ;;  %v5722_v28 = vld [vmem:[#allocation20_spill] sm:$0xff] }
 0x651   :  { %1465 = vmatprep.subr.mxu1 %v4130_v32 }
 0x652   :  { %1466 = vmatpush1.msra.mxu1 %v4134_v36 }
 0x653   :  { %1467 = vmatprep.subr.mxu1 %v4138_v40 }
 0x654   :  { %1468 = vmatpush1.msra.mxu1 %v4142_v44 }
 0x655   :  { %1469 = vmatprep.subr.mxu1 %v4153_v26 }
 0x656   :  { %1470 = vmatpush1.msra.mxu1 %v4156_v9 }
 0x657   :  { %1471 = vmatprep.subr.mxu1 %v4158_v11 }
 0x658   :  { %1472 = vmatpush1.msra.mxu1 %v4160_v17 }
 0x659   :  { %1473 = vmatprep.subr.mxu1 %v4168_v34 }
 0x65a   :  { %1474 = vmatpush1.msra.mxu1 %v4172_v62 }
 0x65b   :  { %1475 = vmatprep.subr.mxu1 %v4174_v19 }
 0x65c   :  { %1476 = vmatpush1.msra.mxu1 %v4176_v21 }
 0x65d   :  { %1477 = vmatprep.subr.mxu1 %v4180_v25 }
 0x65e   :  { %1478 = vmatpush1.msra.mxu1 %v4184_v29 }
 0x65f   :  { %1479 = vmatprep.subr.mxu1 %v4188_v31 }
 0x660   :  { %1480 = vmatpush2.msra.mxu1 %v4192_v35 }
 0x661   :  { %1481 = vmatprep.subr.mxu1 %v4196_v39 }
 0x662   :  { %1482 = vmatpush2.msra.mxu1 %v4200_v41 }
 0x663   :  { %1483 = vmatprep.subr.mxu1 %v4204_v49 }
 0x664   :  { %1484 = vmatpush2.msra.mxu1 %v4208_v56 }
 0x665   :  { %1485 = vmatprep.subr.mxu1 %v4214_v7 }
 0x666   :  { %1486 = vmatpush2.msra.mxu1 %v4216_v14  ;;  %v5707_v14 = vld [vmem:[#allocation32_spill] sm:$0xff] }
 0x667   :  { %1487 = vmatprep.subr.mxu1 %v4225_v48 }
 0x668   :  { %1488 = vmatpush2.msra.mxu1 %v4228_v52 }
 0x669   :  { %1489 = vmatprep.subr.mxu1 %v4232_v60 }
 0x66a   :  { %1490 = vmatpush2.msra.mxu1 %v4236_v1 }
 0x66b   :  { %1491 = vmatprep.subr.mxu1 %v4240_v47 }
 0x66c   :  { %1492 = vmatpush2.msra.mxu1 %v4244_v10  ;;  %v5713_v10 = vld [vmem:[#allocation38_spill] sm:$0xff] }
 0x66d   :  { %1493 = vmatprep.subr.mxu1 %v4248_v8  ;;  %v5714_v8 = vld [vmem:[#allocation39_spill] sm:$0xff] }
 0x66e   :  { %1494 = vmatpush2.msra.mxu1 %v4252_v20  ;;  %v5715_v20 = vld [vmem:[#allocation40_spill] sm:$0xff] }
 0x66f   :  { %1495 = vmatprep.subr.mxu1 %v5705_v51 }
 0x670   :  { %1496 = vmatpush2.msra.mxu1 %v5706_v57 }
 0x671   :  { %1497 = vmatprep.subr.mxu1 %v5707_v14 }
 0x672   :  { %1498 = vmatpush2.msra.mxu1 %v5708_v59 }
 0x673   :  { %1499 = vmatprep.subr.mxu1 %v5709_v61 }
 0x674   :  { %1500 = vmatpush2.msra.mxu1 %v5710_v3 }
 0x675   :  { %1501 = vmatprep.subr.mxu1 %v5711_v13 }
 0x676   :  { %1502 = vmatpush2.msra.mxu1 %v5712_v23 }
 0x677   :  { %1503 = vmatprep.subr.mxu1 %v5713_v10 }
 0x678   :  { %1504 = vmatpush2.msra.mxu1 %v5714_v8 }
 0x679   :  { %1505 = vmatprep.subr.mxu1 %v5715_v20 }
 0x67a   :  { %1506 = vmatpush2.msra.mxu1 %v5716_v43 }
 0x67b   :  { %1507 = vmatprep.subr.mxu1 %v5717_v53 }
 0x67c   :  { %1508 = vmatpush2.msra.mxu1 %v5718_v63 }
 0x67d   :  { %1509 = vmatprep.subr.mxu1 %v5719_v2 }
 0x67e   :  { %1510 = vmatpush2.msra.mxu1 %v5720_v4 }
 0x6ff   :  { %v1159_v6 = vpop.f32.mrf.mxu1 }
 0x700   :  { %v1165_v16 = vadd.f32 %v1159_v6, %v5721_v12 }
 0x701   :  { %v1161_v18 = vpop.f32.mrf.mxu1 }
 0x702   :  { %v3050_v24 = vmul.f32 -1.442695, %v1165_v16  ;;  %v1167_v32 = vadd.f32 %v1161_v18, %v5722_v28  ;;  %v1590_v18 = vld [vmem:[#allocation6 + $0xf0] sm:$0xff]  ;;  %v1588_v28 = vld [vmem:[#allocation6 + $0xe0] sm:$0xff] }
 0x704   :  { %3187 = vpow2.f32 %v3050_v24  ;;  %v3051_v36 = vmul.f32 -1.442695, %v1167_v32  ;;  %v1589_v24 = vld [vmem:[#allocation6 + $0xe8] sm:$0xff] }
 0x705   :  { %3189 = vtanh.f32 %v1167_v32  ;;  %v1587_v32 = vld [vmem:[#allocation6 + $0xd8] sm:$0xff] }
 0x706   :  { %3191 = vpow2.f32 %v3051_v36  ;;  %v1586_v36 = vld [vmem:[#allocation6 + $0xd0] sm:$0xff] }
 0x707   :  { %3193 = vtanh.f32 %v1165_v16  ;;  %v1591_v16 = vld [vmem:[#allocation6 + $0xf8] sm:$0xff] }
 0x708   :  { %1624 = vmatprep.subr.mxu0 %v1591_v16  ;;  %v1613_v16 = vld [vmem:[#allocation6 + $0x1a8] sm:$0xff] }
 0x711   :  { %v3188_v40 = vpop.eup %3187 }
 0x712   :  { %v3190_v44 = vpop.eup %3189  ;;  %v1171_v26 = vadd.f32 1.0, %v3188_v40  ;;  %v1585_v40 = vld [vmem:[#allocation6 + $0xc8] sm:$0xff] }
 0x713   :  { %v3192_v9 = vpop.eup %3191  ;;  %1195 = vrot.lane.b32.xlu1 %v3190_v44, %s3562_s27  ;;  %v1584_v44 = vld [vmem:[#allocation6 + $0xc0] sm:$0xff] }
 0x714   :  { %3195 = vrcp.f32 %v1171_v26  ;;  %v1189_v11 = vadd.f32 1.0, %v3192_v9  ;;  %v3194_v17 = vpop.eup %3193  ;;  %v1583_v26 = vld [vmem:[#allocation6 + $0xb8] sm:$0xff]  ;;  %v1582_v9 = vld [vmem:[#allocation6 + $0xb0] sm:$0xff] }
 0x716   :  { %3197 = vrcp.f32 %v1189_v11  ;;  %v1581_v11 = vld [vmem:[#allocation6 + $0xa8] sm:$0xff] }
 0x717   :  { %1177 = vrot.lane.b32.xlu1 %v3194_v17, %s3562_s27  ;;  %v1580_v17 = vld [vmem:[#allocation6 + $0xa0] sm:$0xff] }
 0x721   :  { %v3196_v34 = vpop.eup %3195 }
 0x722   :  { %1179 = vrot.lane.b32.xlu1 %v3196_v34, %s3563_s28 }
 0x723   :  { %v3198_v62 = vpop.eup %3197 }
 0x724   :  { %1193 = vrot.lane.b32.xlu0 %v3198_v62, %s3561_s3 }
 0x728   :  { %1175 = vrot.lane.b32.xlu0 %v3196_v34, %s3561_s3 }
 0x72c   :  { %1197 = vrot.lane.b32.xlu0 %v3198_v62, %s3563_s28 }
 0x785   :  { %v1196_v19 = vpop.permute.xlu1 %1195 }
 0x786   :  { %v1200_v25 = vmul.f32 %v3198_v62, %v1196_v19  ;;  %v1578_v62 = vld [vmem:[#allocation6 + $0x90] sm:$0xff]  ;;  %v1577_v19 = vld [vmem:[#allocation6 + $0x88] sm:$0xff] }
 0x789   :  { %v1178_v31 = vpop.permute.xlu1 %1177 }
 0x78a   :  { %v1182_v41 = vmul.f32 %v3196_v34, %v1178_v31  ;;  %v1579_v34 = vld [vmem:[#allocation6 + $0x98] sm:$0xff]  ;;  %v1573_v31 = vld [vmem:[#allocation6 + $0x68] sm:$0xff] }
 0x794   :  { %v1180_v1 = vpop.permute.xlu1 %1179 }
 0x796   :  { %v1194_v21 = vpop.permute.xlu0 %1193 }
 0x797   :  { %v1199_v29 = vmul.f32 %v1194_v21, %v4415_v37  ;;  %v5726_v37 = vld [vmem:[#allocation18_spill] sm:$0xff]  ;;  %v1576_v21 = vld [vmem:[#allocation6 + $0x80] sm:$0xff] }
 0x799   :  { %v1201_v35 = vadd.f32 %v1200_v25, %v1199_v29  ;;  %v1575_v25 = vld [vmem:[#allocation6 + $0x78] sm:$0xff]  ;;  %v1574_v29 = vld [vmem:[#allocation6 + $0x70] sm:$0xff] }
 0x79a   :  { %v1176_v39 = vpop.permute.xlu0 %1175 }
 0x79b   :  { %3199 = vtanh.f32 %v1201_v35  ;;  %v1181_v49 = vmul.f32 %v1176_v39, %v4419_v55  ;;  %v1571_v39 = vld [vmem:[#allocation6 + $0x58] sm:$0xff] }
 0x79d   :  { %v1183_v56 = vadd.f32 %v1182_v41, %v1181_v49  ;;  %v1570_v41 = vld [vmem:[#allocation6 + $0x50] sm:$0xff] }
 0x79e   :  { %v1198_v48 = vpop.permute.xlu0 %1197 }
 0x79f   :  { %3201 = vtanh.f32 %v1183_v56 }
 0x7a8   :  { %v3200_v7 = vpop.eup %3199 }
 0x7a9   :  { %v4501_v52 = vmul.f32 %v3200_v7, %v1198_v48 }
 0x7ab   :  { %5723 = vst [vmem:[#allocation30_spill] sm:$0xff] %v4501_v52  ;;  %1334 = vmatprep.mubr.f32.mxu0 %v4501_v52  ;;  %v1793_v52 = vld [vmem:[#allocation8 + $0x140] sm:$0xff] }
 0x7ac   :  { %v3202_v60 = vpop.eup %3201 }
 0x7ad   :  { %v4504_v47 = vmul.f32 %v3202_v60, %v1180_v1  ;;  %v5730_v1 = vld [vmem:[#allocation17_spill] sm:$0xff] }
 0x7af   :  { %5724 = vst [vmem:[#allocation31_spill] sm:$0xff] %v4504_v47  ;;  %1335 = vmatmul.mubr.f32.vlgmr.msra.gmra.mxu0 %v4504_v47  ;;  %v4706_v47 = vld [vmem:[#allocation9 + $0x168] sm:$0xff] }
 0x7b0   :  { %1625 = vmatpush1.msra.mxu0 %v1590_v18  ;;  %v1612_v18 = vld [vmem:[#allocation6 + $0x1a0] sm:$0xff]  ;;  %5740 = vst [vmem:[#allocation40_spill] sm:$0xff] %v4706_v47 }
 0x7b1   :  { %1626 = vmatprep.subr.mxu0 %v1589_v24  ;;  %v1611_v24 = vld [vmem:[#allocation6 + $0x198] sm:$0xff] }
 0x7b2   :  { %1627 = vmatpush1.msra.mxu0 %v1588_v28  ;;  %v1610_v28 = vld [vmem:[#allocation6 + $0x190] sm:$0xff] }
 0x7b3   :  { %1628 = vmatprep.subr.mxu0 %v1587_v32  ;;  %v1609_v32 = vld [vmem:[#allocation6 + $0x188] sm:$0xff] }
 0x7b4   :  { %1629 = vmatpush1.msra.mxu0 %v1586_v36  ;;  %v1608_v36 = vld [vmem:[#allocation6 + $0x180] sm:$0xff] }
 0x7b5   :  { %1630 = vmatprep.subr.mxu0 %v1585_v40  ;;  %v1607_v40 = vld [vmem:[#allocation6 + $0x178] sm:$0xff] }
 0x7b6   :  { %1631 = vmatpush1.msra.mxu0 %v1584_v44  ;;  %v1606_v44 = vld [vmem:[#allocation6 + $0x170] sm:$0xff] }
 0x7b7   :  { %1632 = vmatprep.subr.mxu0 %v1583_v26 }
 0x7b8   :  { %1633 = vmatpush1.msra.mxu0 %v1582_v9  ;;  %v1605_v9 = vld [vmem:[#allocation6 + $0x168] sm:$0xff] }
 0x7b9   :  { %1634 = vmatprep.subr.mxu0 %v1581_v11  ;;  %v1604_v11 = vld [vmem:[#allocation6 + $0x160] sm:$0xff] }
 0x7ba   :  { %1635 = vmatpush1.msra.mxu0 %v1580_v17 }
 0x7bb   :  { %1636 = vmatprep.subr.mxu0 %v1579_v34  ;;  %v1603_v34 = vld [vmem:[#allocation6 + $0x158] sm:$0xff] }
 0x7bc   :  { %1637 = vmatpush1.msra.mxu0 %v1578_v62  ;;  %v1602_v62 = vld [vmem:[#allocation6 + $0x150] sm:$0xff] }
 0x7bd   :  { %1638 = vmatprep.subr.mxu0 %v1577_v19  ;;  %v1601_v19 = vld [vmem:[#allocation6 + $0x148] sm:$0xff] }
 0x7be   :  { %1639 = vmatpush1.msra.mxu0 %v1576_v21  ;;  %v1600_v21 = vld [vmem:[#allocation6 + $0x140] sm:$0xff] }
 0x7bf   :  { %1640 = vmatprep.subr.mxu0 %v1575_v25  ;;  %v1599_v25 = vld [vmem:[#allocation6 + $0x138] sm:$0xff] }
 0x7c0   :  { %1641 = vmatpush1.msra.mxu0 %v1574_v29  ;;  %v1598_v29 = vld [vmem:[#allocation6 + $0x130] sm:$0xff] }
 0x7c1   :  { %1642 = vmatprep.subr.mxu0 %v1573_v31  ;;  %v1597_v31 = vld [vmem:[#allocation6 + $0x128] sm:$0xff] }
 0x86f   :  { %v1336_v15 = vpop.f32.mrf.mxu0 }
 0x870   :  { %v1342_v22 = vadd.f32 %v1336_v15, %v5725_v54 }
 0x871   :  { %v1338_v27 = vpop.f32.mrf.mxu0 }
 0x872   :  { %v3052_v0 = vmul.f32 -1.442695, %v1342_v22  ;;  %v1344_v58 = vadd.f32 %v1338_v27, %v5726_v37  ;;  %v1568_v27 = vld [vmem:[#allocation6 + $0x40] sm:$0xff]  ;;  %v1566_v37 = vld [vmem:[#allocation6 + $0x30] sm:$0xff] }
 0x874   :  { %3203 = vpow2.f32 %v3052_v0  ;;  %v3053_v38 = vmul.f32 -1.442695, %v1344_v58  ;;  %v1567_v0 = vld [vmem:[#allocation6 + $0x38] sm:$0xff] }
 0x875   :  { %3205 = vtanh.f32 %v1344_v58  ;;  %v1565_v58 = vld [vmem:[#allocation6 + $0x28] sm:$0xff] }
 0x876   :  { %3207 = vpow2.f32 %v3053_v38  ;;  %v1564_v38 = vld [vmem:[#allocation6 + $0x20] sm:$0xff] }
 0x877   :  { %3209 = vtanh.f32 %v1342_v22  ;;  %v1569_v22 = vld [vmem:[#allocation6 + $0x48] sm:$0xff] }
 0x881   :  { %v3204_v45 = vpop.eup %3203 }
 0x882   :  { %v3206_v55 = vpop.eup %3205  ;;  %v1348_v33 = vadd.f32 1.0, %v3204_v45  ;;  %v1563_v45 = vld [vmem:[#allocation6 + $0x18] sm:$0xff] }
 0x883   :  { %v3208_v46 = vpop.eup %3207  ;;  %1372 = vrot.lane.b32.xlu1 %v3206_v55, %s3562_s27  ;;  %v1562_v55 = vld [vmem:[#allocation6 + $0x10] sm:$0xff] }
 0x884   :  { %3211 = vrcp.f32 %v1348_v33  ;;  %v1366_v5 = vadd.f32 1.0, %v3208_v46  ;;  %v3210_v50 = vpop.eup %3209  ;;  %v1561_v33 = vld [vmem:[#allocation6 + $0x8] sm:$0xff]  ;;  %v1560_v46 = vld [vmem:[#allocation6] sm:$0xff] }
 0x886   :  { %3213 = vrcp.f32 %v1366_v5  ;;  %v1623_v5 = vld [vmem:[#allocation6 + $0x1f8] sm:$0xff] }
 0x887   :  { %1354 = vrot.lane.b32.xlu1 %v3210_v50, %s3562_s27  ;;  %v1622_v50 = vld [vmem:[#allocation6 + $0x1f0] sm:$0xff] }
 0x891   :  { %v3212_v51 = vpop.eup %3211 }
 0x892   :  { %1356 = vrot.lane.b32.xlu1 %v3212_v51, %s3563_s28 }
 0x893   :  { %v3214_v57 = vpop.eup %3213 }
 0x894   :  { %1370 = vrot.lane.b32.xlu0 %v3214_v57, %s3561_s3 }
 0x898   :  { %1352 = vrot.lane.b32.xlu0 %v3212_v51, %s3561_s3 }
 0x89c   :  { %1374 = vrot.lane.b32.xlu0 %v3214_v57, %s3563_s28 }
 0x8f5   :  { %v1373_v14 = vpop.permute.xlu1 %1372 }
 0x8f6   :  { %v1377_v61 = vmul.f32 %v3214_v57, %v1373_v14  ;;  %v1620_v57 = vld [vmem:[#allocation6 + $0x1e0] sm:$0xff] }
 0x8f9   :  { %v1355_v13 = vpop.permute.xlu1 %1354 }
 0x8fa   :  { %v1359_v8 = vmul.f32 %v3212_v51, %v1355_v13  ;;  %v1621_v51 = vld [vmem:[#allocation6 + $0x1e8] sm:$0xff]  ;;  %v1618_v13 = vld [vmem:[#allocation6 + $0x1d0] sm:$0xff] }
 0x904   :  { %v1357_v6 = vpop.permute.xlu1 %1356 }
 0x906   :  { %v1371_v59 = vpop.permute.xlu0 %1370 }
 0x907   :  { %v1376_v3 = vmul.f32 %v1371_v59, %v1201_v35  ;;  %v1572_v35 = vld [vmem:[#allocation6 + $0x60] sm:$0xff]  ;;  %v1619_v59 = vld [vmem:[#allocation6 + $0x1d8] sm:$0xff] }
 0x908   :  { %1643 = vmatpush1.msra.mxu0 %v1572_v35  ;;  %v1596_v35 = vld [vmem:[#allocation6 + $0x120] sm:$0xff] }
 0x909   :  { %v4515_v23 = vadd.f32 %v1377_v61, %v1376_v3  ;;  %1644 = vmatprep.subr.mxu0 %v1571_v39  ;;  %v1595_v39 = vld [vmem:[#allocation6 + $0x118] sm:$0xff] }
 0x90a   :  { %v1353_v10 = vpop.permute.xlu0 %1352  ;;  %1645 = vmatpush1.msra.mxu0 %v1570_v41  ;;  %v1594_v41 = vld [vmem:[#allocation6 + $0x110] sm:$0xff] }
 0x90b   :  { %3215 = vtanh.f32 %v4515_v23  ;;  %v1358_v20 = vmul.f32 %v1353_v10, %v1183_v56  ;;  %v5729_v56 = vld [vmem:[#allocation24_spill] sm:$0xff]  ;;  %1646 = vmatprep.subr.mxu0 %v1569_v22 }
 0x90c   :  { %1647 = vmatpush1.msra.mxu0 %v1568_v27 }
 0x90d   :  { %v4518_v43 = vadd.f32 %v1359_v8, %v1358_v20  ;;  %1648 = vmatprep.subr.mxu0 %v1567_v0  ;;  %v1617_v20 = vld [vmem:[#allocation6 + $0x1c8] sm:$0xff] }
 0x90e   :  { %v1375_v63 = vpop.permute.xlu0 %1374  ;;  %1649 = vmatpush1.msra.mxu0 %v1566_v37 }
 0x90f   :  { %3217 = vtanh.f32 %v4518_v43  ;;  %1650 = vmatprep.subr.mxu0 %v1565_v58 }
 0x910   :  { %1651 = vmatpush1.msra.mxu0 %v1564_v38 }
 0x911   :  { %1652 = vmatprep.subr.mxu0 %v1563_v45 }
 0x912   :  { %1653 = vmatpush1.msra.mxu0 %v1562_v55 }
 0x913   :  { %1654 = vmatprep.subr.mxu0 %v1561_v33 }
 0x914   :  { %1655 = vmatpush1.msra.mxu0 %v1560_v46  ;;  %v5735_v46 = vmov 0.0  }
 0x915   :  { %1656 = vmatprep.subr.mxu0 %v1623_v5  ;;  %v1784_v5 = vld [vmem:[#allocation8 + $0xf8] sm:$0xff] }
 0x916   :  { %1657 = vmatpush2.msra.mxu0 %v1622_v50  ;;  %v1782_v50 = vld [vmem:[#allocation8 + $0xe8] sm:$0xff]  ;;  %1829 = vmatprep.subr.mxu1 %v1784_v5 }
 0x917   :  { %1658 = vmatprep.subr.mxu0 %v1621_v51  ;;  %v4550_v51 = vld [vmem:[#allocation9 + $0xf8] sm:$0xff]  ;;  %v5738_v5 = vld [vmem:[#allocation16_spill] sm:$0xff] }
 0x918   :  { %v3216_v53 = vpop.eup %3215  ;;  %1659 = vmatpush2.msra.mxu0 %v1620_v57  ;;  %5736 = vst [vmem:[#allocation38_spill] sm:$0xff] %v4550_v51  ;;  %v1781_v57 = vld [vmem:[#allocation8 + $0xe0] sm:$0xff] }
 0x919   :  { %v4521_v2 = vmul.f32 %v3216_v53, %v1375_v63  ;;  %1660 = vmatprep.subr.mxu0 %v1619_v59  ;;  %v1616_v53 = vld [vmem:[#allocation6 + $0x1c0] sm:$0xff]  ;;  %v1780_v59 = vld [vmem:[#allocation8 + $0xd8] sm:$0xff] }
 0x91a   :  { %1661 = vmatpush2.msra.mxu0 %v1618_v13  ;;  %v4558_v13 = vld [vmem:[#allocation9 + $0xe0] sm:$0xff] }
 0x91b   :  { %5727 = vst [vmem:[#allocation32_spill] sm:$0xff] %v4521_v2  ;;  %1511 = vmatprep.mubr.f32.mxu1 %v4521_v2  ;;  %1662 = vmatprep.subr.mxu0 %v1617_v20  ;;  %v4563_v20 = vld [vmem:[#allocation9 + $0xd0] sm:$0xff] }
 0x91c   :  { %v3218_v4 = vpop.eup %3217  ;;  %1663 = vmatpush2.msra.mxu0 %v1616_v53  ;;  %v1777_v53 = vld [vmem:[#allocation8 + $0xc0] sm:$0xff]  ;;  %v4721_v2 = vld [vmem:[#allocation9 + $0x150] sm:$0xff] }
 0x91d   :  { %v4524_v12 = vmul.f32 %v3218_v4, %v1357_v6  ;;  %v1615_v4 = vld [vmem:[#allocation6 + $0x1b8] sm:$0xff]  ;;  %v1614_v6 = vld [vmem:[#allocation6 + $0x1b0] sm:$0xff]  ;;  %5745 = vst [vmem:[#allocation45_spill] sm:$0xff] %v4721_v2 }
 0x91e   :  { %1664 = vmatprep.subr.mxu0 %v1615_v4  ;;  %v1776_v4 = vld [vmem:[#allocation8 + $0xb8] sm:$0xff] }
 0x91f   :  { %5728 = vst [vmem:[#allocation33_spill] sm:$0xff] %v4524_v12  ;;  %1512 = vmatmul.mubr.f32.vlgmr.msra.gmra.mxu1 %v4524_v12  ;;  %1665 = vmatpush2.msra.mxu0 %v1614_v6  ;;  %v4569_v6 = vld [vmem:[#allocation9 + $0xc0] sm:$0xff]  ;;  %v4703_v12 = vld [vmem:[#allocation9 + $0x170] sm:$0xff] }
 0x920   :  { %1666 = vmatprep.subr.mxu0 %v1613_v16  ;;  %v1775_v16 = vld [vmem:[#allocation8 + $0xb0] sm:$0xff]  ;;  %5739 = vst [vmem:[#allocation39_spill] sm:$0xff] %v4703_v12 }
 0x921   :  { %1667 = vmatpush2.msra.mxu0 %v1612_v18  ;;  %v4572_v18 = vld [vmem:[#allocation9 + $0xb8] sm:$0xff] }
 0x922   :  { %1668 = vmatprep.subr.mxu0 %v1611_v24  ;;  %v1774_v24 = vld [vmem:[#allocation8 + $0xa8] sm:$0xff] }
 0x923   :  { %1669 = vmatpush2.msra.mxu0 %v1610_v28  ;;  %v4575_v28 = vld [vmem:[#allocation9 + $0xb0] sm:$0xff] }
 0x924   :  { %1670 = vmatprep.subr.mxu0 %v1609_v32  ;;  %v1773_v32 = vld [vmem:[#allocation8 + $0xa0] sm:$0xff] }
 0x925   :  { %1671 = vmatpush2.msra.mxu0 %v1608_v36  ;;  %v4578_v36 = vld [vmem:[#allocation9 + $0xa8] sm:$0xff] }
 0x926   :  { %1672 = vmatprep.subr.mxu0 %v1607_v40  ;;  %v1772_v40 = vld [vmem:[#allocation8 + $0x98] sm:$0xff] }
 0x927   :  { %1673 = vmatpush2.msra.mxu0 %v1606_v44  ;;  %v4581_v44 = vld [vmem:[#allocation9 + $0xa0] sm:$0xff] }
 0x928   :  { %1674 = vmatprep.subr.mxu0 %v1605_v9  ;;  %v4584_v9 = vld [vmem:[#allocation9 + $0x98] sm:$0xff] }
 0x929   :  { %1675 = vmatpush2.msra.mxu0 %v1604_v11  ;;  %v1770_v11 = vld [vmem:[#allocation8 + $0x88] sm:$0xff] }
 0x92a   :  { %1676 = vmatprep.subr.mxu0 %v1603_v34  ;;  %v1769_v34 = vld [vmem:[#allocation8 + $0x80] sm:$0xff] }
 0x92b   :  { %1677 = vmatpush2.msra.mxu0 %v1602_v62  ;;  %v4590_v62 = vld [vmem:[#allocation9 + $0x88] sm:$0xff] }
 0x92c   :  { %1678 = vmatprep.subr.mxu0 %v1601_v19  ;;  %v1768_v19 = vld [vmem:[#allocation8 + $0x78] sm:$0xff] }
 0x92d   :  { %1679 = vmatpush2.msra.mxu0 %v1600_v21  ;;  %v4593_v21 = vld [vmem:[#allocation9 + $0x80] sm:$0xff] }
 0x92e   :  { %1680 = vmatprep.subr.mxu0 %v1599_v25  ;;  %v1767_v25 = vld [vmem:[#allocation8 + $0x70] sm:$0xff] }
 0x92f   :  { %1681 = vmatpush2.msra.mxu0 %v1598_v29  ;;  %v4596_v29 = vld [vmem:[#allocation9 + $0x78] sm:$0xff] }
 0x930   :  { %1682 = vmatprep.subr.mxu0 %v1597_v31  ;;  %v1766_v31 = vld [vmem:[#allocation8 + $0x68] sm:$0xff] }
 0x931   :  { %1683 = vmatpush2.msra.mxu0 %v1596_v35  ;;  %v4599_v35 = vld [vmem:[#allocation9 + $0x70] sm:$0xff] }
 0x932   :  { %1684 = vmatprep.subr.mxu0 %v1595_v39  ;;  %v1765_v39 = vld [vmem:[#allocation8 + $0x60] sm:$0xff] }
 0x933   :  { %1685 = vmatpush2.msra.mxu0 %v1594_v41  ;;  %v4602_v41 = vld [vmem:[#allocation9 + $0x68] sm:$0xff] }
 0x9df   :  { %v1513_v49 = vpop.f32.mrf.mxu1 }
 0x9e0   :  { %v1519_v7 = vadd.f32 %v1513_v49, %v5729_v56  ;;  %v1593_v49 = vld [vmem:[#allocation6 + $0x108] sm:$0xff]  ;;  %v1592_v56 = vld [vmem:[#allocation6 + $0x100] sm:$0xff] }
 0x9e1   :  { %v1515_v48 = vpop.f32.mrf.mxu1  ;;  %1686 = vmatprep.subr.mxu0 %v1593_v49  ;;  %v1764_v49 = vld [vmem:[#allocation8 + $0x58] sm:$0xff] }
 0x9e2   :  { %v3054_v60 = vmul.f32 -1.442695, %v1519_v7  ;;  %v1521_v15 = vadd.f32 %v1515_v48, %v5730_v1  ;;  %1687 = vmatpush2.msra.mxu0 %v1592_v56  ;;  %v4605_v56 = vld [vmem:[#allocation9 + $0x60] sm:$0xff] }
 0x9e3   :  { %2022 = vmatprep.subr.mxu0 %v4550_v51 }
 0x9e4   :  { %3219 = vpow2.f32 %v3054_v60  ;;  %v3055_v54 = vmul.f32 -1.442695, %v1521_v15 }
 0x9e5   :  { %3221 = vtanh.f32 %v1521_v15 }
 0x9e6   :  { %3223 = vpow2.f32 %v3055_v54 }
 0x9e7   :  { %3225 = vtanh.f32 %v1519_v7 }
 0x9f1   :  { %v3220_v14 = vpop.eup %3219 }
 0x9f2   :  { %v3222_v61 = vpop.eup %3221  ;;  %v1525_v3 = vadd.f32 1.0, %v3220_v14  ;;  %v4552_v14 = vld [vmem:[#allocation9 + $0xf0] sm:$0xff] }
 0x9f3   :  { %v3224_v10 = vpop.eup %3223  ;;  %1549 = vrot.lane.b32.xlu1 %v3222_v61, %s3562_s27  ;;  %v4555_v61 = vld [vmem:[#allocation9 + $0xe8] sm:$0xff] }
 0x9f4   :  { %3227 = vrcp.f32 %v1525_v3  ;;  %v1543_v8 = vadd.f32 1.0, %v3224_v10  ;;  %v3226_v63 = vpop.eup %3225  ;;  %v1779_v3 = vld [vmem:[#allocation8 + $0xd0] sm:$0xff]  ;;  %v4560_v10 = vld [vmem:[#allocation9 + $0xd8] sm:$0xff] }
 0x9f6   :  { %3229 = vrcp.f32 %v1543_v8  ;;  %v1778_v8 = vld [vmem:[#allocation8 + $0xc8] sm:$0xff] }
 0x9f7   :  { %1531 = vrot.lane.b32.xlu1 %v3226_v63, %s3562_s27  ;;  %v4566_v63 = vld [vmem:[#allocation9 + $0xc8] sm:$0xff] }
 0xa01   :  { %v3228_v26 = vpop.eup %3227 }
 0xa02   :  { %1533 = vrot.lane.b32.xlu1 %v3228_v26, %s3563_s28 }
 0xa03   :  { %v3230_v17 = vpop.eup %3229 }
 0xa04   :  { %1547 = vrot.lane.b32.xlu0 %v3230_v17, %s3561_s3 }
 0xa08   :  { %1529 = vrot.lane.b32.xlu0 %v3228_v26, %s3561_s3 }
 0xa0c   :  { %1551 = vrot.lane.b32.xlu0 %v3230_v17, %s3563_s28 }
 0xa65   :  { %v1550_v7 = vpop.permute.xlu1 %1549 }
 0xa66   :  { %v1554_v60 = vmul.f32 %v3230_v17, %v1550_v7  ;;  %v4587_v17 = vld [vmem:[#allocation9 + $0x90] sm:$0xff] }
 0xa67   :  { %v1763_v7 = vld [vmem:[#allocation8 + $0x50] sm:$0xff] }
 0xa69   :  { %v1532_v15 = vpop.permute.xlu1 %1531 }
 0xa6a   :  { %v1536_v27 = vmul.f32 %v3228_v26, %v1532_v15  ;;  %v1771_v26 = vld [vmem:[#allocation8 + $0x90] sm:$0xff]  ;;  %v1761_v15 = vld [vmem:[#allocation8 + $0x40] sm:$0xff] }
 0xa74   :  { %v1534_v55 = vpop.permute.xlu1 %1533 }
 0xa76   :  { %v1548_v48 = vpop.permute.xlu0 %1547 }
 0xa77   :  { %v1553_v1 = vmul.f32 %v1548_v48, %v4515_v23  ;;  %v4608_v48 = vld [vmem:[#allocation9 + $0x58] sm:$0xff] }
 0xa79   :  { %v4536_v54 = vadd.f32 %v1554_v60, %v1553_v1  ;;  %v1762_v60 = vld [vmem:[#allocation8 + $0x48] sm:$0xff]  ;;  %v4611_v1 = vld [vmem:[#allocation9 + $0x50] sm:$0xff] }
 0xa7a   :  { %v1530_v22 = vpop.permute.xlu0 %1529 }
 0xa7b   :  { %5731 = vst [vmem:[#allocation34_spill] sm:$0xff] %v4536_v54  ;;  %3231 = vtanh.f32 %v4536_v54  ;;  %v1535_v0 = vmul.f32 %v1530_v22, %v4518_v43  ;;  %v1783_v43 = vld [vmem:[#allocation8 + $0xf0] sm:$0xff]  ;;  %v4614_v22 = vld [vmem:[#allocation9 + $0x48] sm:$0xff] }
 0xa7c   :  { %1830 = vmatpush1.msra.mxu1 %v1783_v43  ;;  %v1790_v54 = vld [vmem:[#allocation8 + $0x128] sm:$0xff] }
 0xa7d   :  { %v4540_v37 = vadd.f32 %v1536_v27, %v1535_v0  ;;  %1831 = vmatprep.subr.mxu1 %v1782_v50  ;;  %v1760_v27 = vld [vmem:[#allocation8 + $0x38] sm:$0xff] }
 0xa7e   :  { %v1552_v38 = vpop.permute.xlu0 %1551  ;;  %1832 = vmatpush1.msra.mxu1 %v1781_v57  ;;  %v1759_v57 = vld [vmem:[#allocation8 + $0x30] sm:$0xff] }
 0xa7f   :  { %5732 = vst [vmem:[#allocation35_spill] sm:$0xff] %v4540_v37  ;;  %3233 = vtanh.f32 %v4540_v37  ;;  %1833 = vmatprep.subr.mxu1 %v1780_v59  ;;  %v4624_v59 = vld [vmem:[#allocation9 + $0x40] sm:$0xff]  ;;  %v4725_v37 = vld [vmem:[#allocation9 + $0x148] sm:$0xff] }
 0xa80   :  { %1834 = vmatpush1.msra.mxu1 %v1779_v3  ;;  %v1758_v3 = vld [vmem:[#allocation8 + $0x28] sm:$0xff]  ;;  %5746 = vst [vmem:[#allocation21_spill] sm:$0xff] %v4725_v37 }
 0xa81   :  { %1835 = vmatprep.subr.mxu1 %v1778_v8  ;;  %v4627_v8 = vld [vmem:[#allocation9 + $0x38] sm:$0xff] }
 0xa82   :  { %1836 = vmatpush1.msra.mxu1 %v1777_v53  ;;  %v1757_v53 = vld [vmem:[#allocation8 + $0x20] sm:$0xff] }
 0xa83   :  { %1837 = vmatprep.subr.mxu1 %v1776_v4  ;;  %v4630_v4 = vld [vmem:[#allocation9 + $0x30] sm:$0xff] }
 0xa84   :  { %1838 = vmatpush1.msra.mxu1 %v1775_v16  ;;  %v1756_v16 = vld [vmem:[#allocation8 + $0x18] sm:$0xff] }
 0xa85   :  { %1839 = vmatprep.subr.mxu1 %v1774_v24  ;;  %v4632_v24 = vld [vmem:[#allocation9 + $0x28] sm:$0xff] }
 0xa86   :  { %1840 = vmatpush1.msra.mxu1 %v1773_v32  ;;  %v1755_v32 = vld [vmem:[#allocation8 + $0x10] sm:$0xff] }
 0xa87   :  { %1841 = vmatprep.subr.mxu1 %v1772_v40  ;;  %v4635_v40 = vld [vmem:[#allocation9 + $0x20] sm:$0xff] }
 0xa88   :  { %v3232_v58 = vpop.eup %3231  ;;  %1842 = vmatpush1.msra.mxu1 %v1771_v26  ;;  %v1754_v26 = vld [vmem:[#allocation8 + $0x8] sm:$0xff] }
 0xa89   :  { %v4543_v45 = vmul.f32 %v3232_v58, %v1552_v38  ;;  %1843 = vmatprep.subr.mxu1 %v1770_v11  ;;  %v5737_v58 = vld [vmem:[#allocation25_spill] sm:$0xff]  ;;  %v4638_v11 = vld [vmem:[#allocation9 + $0x18] sm:$0xff] }
 0xa8a   :  { %1844 = vmatpush1.msra.mxu1 %v1769_v34  ;;  %v1753_v34 = vld [vmem:[#allocation8] sm:$0xff] }
 0xa8b   :  { %5733 = vst [vmem:[#allocation36_spill] sm:$0xff] %v4543_v45  ;;  %1688 = vmatprep.mubr.f32.mxu0 %v4543_v45  ;;  %1845 = vmatprep.subr.mxu1 %v1768_v19  ;;  %v4640_v19 = vld [vmem:[#allocation9 + $0x10] sm:$0xff] }
 0xa8c   :  { %v3234_v23 = vpop.eup %3233  ;;  %1846 = vmatpush1.msra.mxu1 %v1767_v25  ;;  %v1816_v25 = vld [vmem:[#allocation8 + $0x1f8] sm:$0xff]  ;;  %v1791_v45 = vld [vmem:[#allocation8 + $0x130] sm:$0xff] }
 0xa8d   :  { %v4546_v33 = vmul.f32 %v3234_v23, %v1534_v55  ;;  %1847 = vmatprep.subr.mxu1 %v1766_v31  ;;  %v4643_v31 = vld [vmem:[#allocation9 + $0x8] sm:$0xff] }
 0xa8e   :  { %1848 = vmatpush1.msra.mxu1 %v1765_v39  ;;  %v1815_v39 = vld [vmem:[#allocation8 + $0x1f0] sm:$0xff] }
 0xa8f   :  { %5734 = vst [vmem:[#allocation37_spill] sm:$0xff] %v4546_v33  ;;  %1689 = vmatmul.mubr.f32.vlgmr.msra.gmra.mxu0 %v4546_v33  ;;  %1849 = vmatprep.subr.mxu1 %v1764_v49  ;;  %v4646_v49 = vld [vmem:[#allocation9] sm:$0xff]  ;;  %v4700_v33 = vld [vmem:[#allocation9 + $0x178] sm:$0xff] }
 0xa90   :  { %2086 = vmatprep.mubr.f32.mxu0 %v5735_v46  ;;  %2023 = vmatpush1.msra.mxu0 %v4552_v14 }
 0xa91   :  { %2024 = vmatprep.subr.mxu0 %v4555_v61  ;;  %1850 = vmatpush1.msra.mxu1 %v1763_v7  ;;  %v1814_v7 = vld [vmem:[#allocation8 + $0x1e8] sm:$0xff] }
 0xa92   :  { %2025 = vmatpush1.msra.mxu0 %v4558_v13  ;;  %1851 = vmatprep.subr.mxu1 %v1762_v60  ;;  %v4649_v60 = vld [vmem:[#allocation9 + $0x1f8] sm:$0xff] }
 0xa93   :  { %2026 = vmatprep.subr.mxu0 %v4560_v10  ;;  %1852 = vmatpush1.msra.mxu1 %v1761_v15  ;;  %v1813_v15 = vld [vmem:[#allocation8 + $0x1e0] sm:$0xff] }
 0xa94   :  { %2027 = vmatpush1.msra.mxu0 %v4563_v20  ;;  %1853 = vmatprep.subr.mxu1 %v1760_v27  ;;  %v4652_v27 = vld [vmem:[#allocation9 + $0x1f0] sm:$0xff] }
 0xa95   :  { %2028 = vmatprep.subr.mxu0 %v4566_v63  ;;  %1854 = vmatpush1.msra.mxu1 %v1759_v57  ;;  %v1809_v57 = vld [vmem:[#allocation8 + $0x1c0] sm:$0xff] }
 0xa96   :  { %2029 = vmatpush1.msra.mxu0 %v4569_v6  ;;  %1855 = vmatprep.subr.mxu1 %v1758_v3 }
 0xa97   :  { %2030 = vmatprep.subr.mxu0 %v4572_v18  ;;  %1856 = vmatpush1.msra.mxu1 %v1757_v53 }
 0xa98   :  { %2031 = vmatpush1.msra.mxu0 %v4575_v28  ;;  %1857 = vmatprep.subr.mxu1 %v1756_v16  ;;  %v4665_v16 = vld [vmem:[#allocation9 + $0x1d0] sm:$0xff] }
 0xa99   :  { %2032 = vmatprep.subr.mxu0 %v4578_v36  ;;  %1858 = vmatpush1.msra.mxu1 %v1755_v32  ;;  %v1808_v32 = vld [vmem:[#allocation8 + $0x1b8] sm:$0xff] }
 0xa9a   :  { %2033 = vmatpush1.msra.mxu0 %v4581_v44  ;;  %1859 = vmatprep.subr.mxu1 %v1754_v26 }
 0xa9b   :  { %2034 = vmatprep.subr.mxu0 %v4584_v9  ;;  %1860 = vmatpush1.msra.mxu1 %v1753_v34  ;;  %v4668_v34 = vld [vmem:[#allocation9 + $0x1c8] sm:$0xff] }
 0xa9c   :  { %2035 = vmatpush1.msra.mxu0 %v4587_v17  ;;  %1861 = vmatprep.subr.mxu1 %v1816_v25 }
 0xa9d   :  { %2036 = vmatprep.subr.mxu0 %v4590_v62  ;;  %1862 = vmatpush2.msra.mxu1 %v1815_v39  ;;  %v1807_v39 = vld [vmem:[#allocation8 + $0x1b0] sm:$0xff] }
 0xa9e   :  { %2037 = vmatpush1.msra.mxu0 %v4593_v21  ;;  %1863 = vmatprep.subr.mxu1 %v1814_v7  ;;  %v4672_v7 = vld [vmem:[#allocation9 + $0x1c0] sm:$0xff] }
 0xa9f   :  { %2038 = vmatprep.subr.mxu0 %v4596_v29  ;;  %1864 = vmatpush2.msra.mxu1 %v1813_v15  ;;  %v1806_v15 = vld [vmem:[#allocation8 + $0x1a8] sm:$0xff] }
 0xaa0   :  { %2039 = vmatpush1.msra.mxu0 %v4599_v35 }
 0xaa1   :  { %2040 = vmatprep.subr.mxu0 %v4602_v41 }
 0xaa2   :  { %2041 = vmatpush1.msra.mxu0 %v4605_v56 }
 0xaa3   :  { %2042 = vmatprep.subr.mxu0 %v4608_v48 }
 0xaa4   :  { %2043 = vmatpush1.msra.mxu0 %v4611_v1 }
 0xaa5   :  { %2044 = vmatprep.subr.mxu0 %v4614_v22 }
 0xaa6   :  { %2045 = vmatpush1.msra.mxu0 %v4624_v59 }
 0xaa7   :  { %2046 = vmatprep.subr.mxu0 %v4627_v8 }
 0xaa8   :  { %2047 = vmatpush1.msra.mxu0 %v4630_v4 }
 0xaa9   :  { %2048 = vmatprep.subr.mxu0 %v4632_v24 }
 0xaaa   :  { %2049 = vmatpush1.msra.mxu0 %v4635_v40 }
 0xaab   :  { %2050 = vmatprep.subr.mxu0 %v4638_v11 }
 0xaac   :  { %2051 = vmatpush1.msra.mxu0 %v4640_v19 }
 0xaad   :  { %2052 = vmatprep.subr.mxu0 %v4643_v31 }
 0xaae   :  { %2053 = vmatpush1.msra.mxu0 %v4646_v49 }
 0xaaf   :  { %2054 = vmatprep.subr.mxu0 %v4649_v60 }
 0xab0   :  { %2055 = vmatpush2.msra.mxu0 %v4652_v27 }
 0xb4f   :  { %v1690_v0 = vpop.f32.mrf.mxu0 }
 0xb50   :  { %v4620_v38 = vadd.f32 %v1690_v0, %v5737_v58  ;;  %v1812_v0 = vld [vmem:[#allocation8 + $0x1d8] sm:$0xff]  ;;  %v4655_v58 = vld [vmem:[#allocation9 + $0x1e8] sm:$0xff] }
 0xb51   :  { %v1692_v23 = vpop.f32.mrf.mxu0  ;;  %1865 = vmatprep.subr.mxu1 %v1812_v0  ;;  %2056 = vmatprep.subr.mxu0 %v4655_v58  ;;  %v4675_v0 = vld [vmem:[#allocation9 + $0x1b8] sm:$0xff] }
 0xb52   :  { %v3056_v55 = vmul.f32 -1.442695, %v4620_v38  ;;  %v1698_v43 = vadd.f32 %v1692_v23, %v5738_v5  ;;  %v1811_v23 = vld [vmem:[#allocation8 + $0x1d0] sm:$0xff]  ;;  %v1810_v5 = vld [vmem:[#allocation8 + $0x1c8] sm:$0xff] }
 0xb53   :  { %1866 = vmatpush2.msra.mxu1 %v1811_v23  ;;  %v1805_v23 = vld [vmem:[#allocation8 + $0x1a0] sm:$0xff] }
 0xb54   :  { %3235 = vpow2.f32 %v3056_v55  ;;  %v3057_v50 = vmul.f32 -1.442695, %v1698_v43  ;;  %v4658_v55 = vld [vmem:[#allocation9 + $0x1e0] sm:$0xff]  ;;  %1867 = vmatprep.subr.mxu1 %v1810_v5  ;;  %v4678_v5 = vld [vmem:[#allocation9 + $0x1b0] sm:$0xff] }
 0xb55   :  { %3237 = vtanh.f32 %v1698_v43  ;;  %2057 = vmatpush2.msra.mxu0 %v4658_v55  ;;  %1868 = vmatpush2.msra.mxu1 %v1809_v57  ;;  %v4681_v57 = vld [vmem:[#allocation9 + $0x1a8] sm:$0xff] }
 0xb56   :  { %3239 = vpow2.f32 %v3057_v50  ;;  %v4662_v50 = vld [vmem:[#allocation9 + $0x1d8] sm:$0xff]  ;;  %1869 = vmatprep.subr.mxu1 %v1808_v32  ;;  %v1802_v32 = vld [vmem:[#allocation8 + $0x188] sm:$0xff] }
 0xb57   :  { %2058 = vmatprep.subr.mxu0 %v4662_v50  ;;  %1870 = vmatpush2.msra.mxu1 %v1807_v39  ;;  %v4690_v39 = vld [vmem:[#allocation9 + $0x190] sm:$0xff] }
 0xb58   :  { %2059 = vmatpush2.msra.mxu0 %v4665_v16  ;;  %1871 = vmatprep.subr.mxu1 %v1806_v15  ;;  %v1800_v15 = vld [vmem:[#allocation8 + $0x178] sm:$0xff] }
 0xb59   :  { %2060 = vmatprep.subr.mxu0 %v4668_v34  ;;  %1872 = vmatpush2.msra.mxu1 %v1805_v23  ;;  %v4693_v23 = vld [vmem:[#allocation9 + $0x188] sm:$0xff] }
 0xb5a   :  { %2061 = vmatpush2.msra.mxu0 %v4672_v7 }
 0xb5b   :  { %2062 = vmatprep.subr.mxu0 %v4675_v0 }
 0xb5c   :  { %2063 = vmatpush2.msra.mxu0 %v4678_v5 }
 0xb5d   :  { %2064 = vmatprep.subr.mxu0 %v4681_v57 }
 0xb61   :  { %v3236_v43 = vpop.eup %3235 }
 0xb62   :  { %v3238_v3 = vpop.eup %3237  ;;  %v1702_v53 = vadd.f32 1.0, %v3236_v43  ;;  %v1804_v43 = vld [vmem:[#allocation8 + $0x198] sm:$0xff] }
 0xb63   :  { %v3240_v26 = vpop.eup %3239  ;;  %1726 = vrot.lane.b32.xlu1 %v3238_v3, %s3562_s27  ;;  %1873 = vmatprep.subr.mxu1 %v1804_v43  ;;  %v1803_v3 = vld [vmem:[#allocation8 + $0x190] sm:$0xff] }
 0xb64   :  { %3241 = vrcp.f32 %v1702_v53  ;;  %v1720_v25 = vadd.f32 1.0, %v3240_v26  ;;  %v4684_v53 = vld [vmem:[#allocation9 + $0x1a0] sm:$0xff]  ;;  %1874 = vmatpush2.msra.mxu1 %v1803_v3  ;;  %v4687_v26 = vld [vmem:[#allocation9 + $0x198] sm:$0xff]  ;;  %v1799_v43 = vld [vmem:[#allocation8 + $0x170] sm:$0xff] }
 0xb65   :  { %2065 = vmatpush2.msra.mxu0 %v4684_v53  ;;  %1875 = vmatprep.subr.mxu1 %v1802_v32  ;;  %v4696_v3 = vld [vmem:[#allocation9 + $0x180] sm:$0xff]  ;;  %v1798_v32 = vld [vmem:[#allocation8 + $0x168] sm:$0xff] }
 0xb66   :  { %3243 = vrcp.f32 %v1720_v25  ;;  %v1801_v25 = vld [vmem:[#allocation8 + $0x180] sm:$0xff]  ;;  %2066 = vmatprep.subr.mxu0 %v4687_v26 }
 0xb67   :  { %1876 = vmatpush2.msra.mxu1 %v1801_v25  ;;  %2067 = vmatpush2.msra.mxu0 %v4690_v39  ;;  %3245 = vtanh.f32 %v4620_v38  ;;  %v1797_v25 = vld [vmem:[#allocation8 + $0x160] sm:$0xff]  ;;  %v1795_v38 = vld [vmem:[#allocation8 + $0x150] sm:$0xff] }
 0xb68   :  { %1877 = vmatprep.subr.mxu1 %v1800_v15  ;;  %2068 = vmatprep.subr.mxu0 %v4693_v23  ;;  %v1796_v15 = vld [vmem:[#allocation8 + $0x158] sm:$0xff] }
 0xb69   :  { %1878 = vmatpush2.msra.mxu1 %v1799_v43  ;;  %2069 = vmatpush2.msra.mxu0 %v4696_v3  ;;  %v4711_v43 = vld [vmem:[#allocation9 + $0x160] sm:$0xff] }
 0xb6a   :  { %1879 = vmatprep.subr.mxu1 %v1798_v32  ;;  %2070 = vmatprep.subr.mxu0 %v4700_v33  ;;  %5742 = vst [vmem:[#allocation42_spill] sm:$0xff] %v4711_v43  ;;  %v1794_v32 = vld [vmem:[#allocation8 + $0x148] sm:$0xff] }
 0xb6b   :  { %1880 = vmatpush2.msra.mxu1 %v1797_v25  ;;  %2071 = vmatpush2.msra.mxu0 %v4703_v12 }
 0xb6c   :  { %1881 = vmatprep.subr.mxu1 %v1796_v15  ;;  %2072 = vmatprep.subr.mxu0 %v4706_v47  ;;  %v1792_v15 = vld [vmem:[#allocation8 + $0x138] sm:$0xff] }
 0xb6d   :  { %1882 = vmatpush2.msra.mxu1 %v1795_v38  ;;  %2073 = vmatpush2.msra.mxu0 %v4711_v43  ;;  %v4731_v38 = vld [vmem:[#allocation9 + $0x140] sm:$0xff]  ;;  %v4734_v43 = vld [vmem:[#allocation9 + $0x138] sm:$0xff] }
 0xb6e   :  { %1883 = vmatprep.subr.mxu1 %v1794_v32  ;;  %2074 = vmatprep.subr.mxu0 %v4716_v42  ;;  %5747 = vst [vmem:[#allocation20_spill] sm:$0xff] %v4731_v38  ;;  %5748 = vst [vmem:[#allocation23_spill] sm:$0xff] %v4734_v43  ;;  %v1789_v32 = vld [vmem:[#allocation8 + $0x120] sm:$0xff]  ;;  %v1788_v42 = vld [vmem:[#allocation8 + $0x118] sm:$0xff] }
 0xb6f   :  { %1884 = vmatpush2.msra.mxu1 %v1793_v52  ;;  %2075 = vmatpush2.msra.mxu0 %v4721_v2  ;;  %v4738_v52 = vld [vmem:[#allocation9 + $0x130] sm:$0xff] }
 0xb70   :  { %1885 = vmatprep.subr.mxu1 %v1792_v15  ;;  %2076 = vmatprep.subr.mxu0 %v4725_v37  ;;  %5749 = vst [vmem:[#allocation18_spill] sm:$0xff] %v4738_v52  ;;  %v1787_v15 = vld [vmem:[#allocation8 + $0x110] sm:$0xff]  ;;  %v4744_v37 = vld [vmem:[#allocation9 + $0x120] sm:$0xff] }
 0xb71   :  { %v4708_v30 = vpop.eup %3241  ;;  %1886 = vmatpush2.msra.mxu1 %v1791_v45  ;;  %2077 = vmatpush2.msra.mxu0 %v4731_v38  ;;  %5751 = vst [vmem:[#allocation17_spill] sm:$0xff] %v4744_v37  ;;  %v4747_v45 = vld [vmem:[#allocation9 + $0x118] sm:$0xff]  ;;  %v4751_v38 = vld [vmem:[#allocation9 + $0x110] sm:$0xff] }
 0xb72   :  { %5741 = vst [vmem:[#allocation41_spill] sm:$0xff] %v4708_v30  ;;  %1706 = vrot.lane.b32.xlu1 %v4708_v30, %s3561_s3  ;;  %1887 = vmatprep.subr.mxu1 %v1790_v54  ;;  %5752 = vst [vmem:[#allocation25_spill] sm:$0xff] %v4747_v45  ;;  %v1785_v54 = vld [vmem:[#allocation8 + $0x100] sm:$0xff] }
 0xb73   :  { %v4718_v25 = vpop.eup %3243  ;;  %2078 = vmatprep.subr.mxu0 %v4734_v43  ;;  %1888 = vmatpush2.msra.mxu1 %v1789_v32  ;;  %5753 = vst [vmem:[#allocation16_spill] sm:$0xff] %v4751_v38  ;;  %v4754_v32 = vld [vmem:[#allocation9 + $0x108] sm:$0xff] }
 0xb74   :  { %5744 = vst [vmem:[#allocation44_spill] sm:$0xff] %v4718_v25  ;;  %1724 = vrot.lane.b32.xlu0 %v4718_v25, %s3561_s3  ;;  %v3246_v2 = vpop.eup %3245  ;;  %2079 = vmatpush2.msra.mxu0 %v4738_v52  ;;  %5754 = vst [vmem:[#allocation48_spill] sm:$0xff] %v4754_v32  ;;  %v4757_v52 = vld [vmem:[#allocation9 + $0x100] sm:$0xff] }
 0xb75   :  { %1889 = vmatprep.subr.mxu1 %v1788_v42  ;;  %5755 = vst [vmem:[#allocation49_spill] sm:$0xff] %v4757_v52  ;;  %v5756_v42 = vld [vmem:[#allocation42_spill] sm:$0xff] }
 0xb76   :  { %1710 = vrot.lane.b32.xlu1 %v4708_v30, %s3563_s28  ;;  %v4741_v30 = vld [vmem:[#allocation9 + $0x128] sm:$0xff]  ;;  %1890 = vmatpush2.msra.mxu1 %v1787_v15 }
 0xb77   :  { %5750 = vst [vmem:[#allocation24_spill] sm:$0xff] %v4741_v30  ;;  %2080 = vmatprep.subr.mxu0 %v4741_v30  ;;  %v5760_v15 = vld [vmem:[#allocation20_spill] sm:$0xff] }
 0xb78   :  { %1728 = vrot.lane.b32.xlu0 %v4718_v25, %s3563_s28  ;;  %v1786_v25 = vld [vmem:[#allocation8 + $0x108] sm:$0xff]  ;;  %2081 = vmatpush2.msra.mxu0 %v4744_v37 }
 0xb79   :  { %1891 = vmatprep.subr.mxu1 %v1786_v25  ;;  %2082 = vmatprep.subr.mxu0 %v4747_v45  ;;  %v5759_v25 = vld [vmem:[#allocation21_spill] sm:$0xff] }
 0xb7a   :  { %1892 = vmatpush2.msra.mxu1 %v1785_v54  ;;  %2083 = vmatpush2.msra.mxu0 %v4751_v38  ;;  %v5761_v54 = vld [vmem:[#allocation18_spill] sm:$0xff] }
 0xb7b   :  { %2084 = vmatprep.subr.mxu0 %v4754_v32  ;;  %2133 = vmatprep.subr.mxu1 %v4550_v51 }
 0xb7c   :  { %1708 = vrot.lane.b32.xlu0 %v3246_v2, %s3562_s27  ;;  %2085 = vmatpush2.msra.mxu0 %v4757_v52  ;;  %v5757_v2 = vld [vmem:[#allocation43_spill] sm:$0xff] }
 0xb7d   :  { %2087 = vmatmul.mubr.f32.vlgmr.msra.gmra.mxu0 %v5735_v46  ;;  %2244 = vmatprep.subr.mxu0 %v4550_v51  ;;  %v5758_v46 = vld [vmem:[#allocation45_spill] sm:$0xff] }
 0xb7e   :  { %2245 = vmatpush1.msra.mxu0 %v4552_v14 }
 0xb7f   :  { %2246 = vmatprep.subr.mxu0 %v4555_v61 }
 0xb80   :  { %2247 = vmatpush1.msra.mxu0 %v4558_v13 }
 0xb81   :  { %2248 = vmatprep.subr.mxu0 %v4560_v10 }
 0xb82   :  { %2249 = vmatpush1.msra.mxu0 %v4563_v20 }
 0xb83   :  { %2250 = vmatprep.subr.mxu0 %v4566_v63 }
 0xb84   :  { %2251 = vmatpush1.msra.mxu0 %v4569_v6 }
 0xb85   :  { %2252 = vmatprep.subr.mxu0 %v4572_v18 }
 0xb86   :  { %2253 = vmatpush1.msra.mxu0 %v4575_v28 }
 0xb87   :  { %2254 = vmatprep.subr.mxu0 %v4578_v36 }
 0xb88   :  { %2255 = vmatpush1.msra.mxu0 %v4581_v44 }
 0xb89   :  { %2256 = vmatprep.subr.mxu0 %v4584_v9 }
 0xb8a   :  { %2257 = vmatpush1.msra.mxu0 %v4587_v17 }
 0xb8b   :  { %2258 = vmatprep.subr.mxu0 %v4590_v62 }
 0xb8c   :  { %2259 = vmatpush1.msra.mxu0 %v4593_v21 }
 0xb8d   :  { %2260 = vmatprep.subr.mxu0 %v4596_v29 }
 0xb8e   :  { %2261 = vmatpush1.msra.mxu0 %v4599_v35 }
 0xb8f   :  { %2262 = vmatprep.subr.mxu0 %v4602_v41 }
 0xb90   :  { %2263 = vmatpush1.msra.mxu0 %v4605_v56 }
 0xb91   :  { %2264 = vmatprep.subr.mxu0 %v4608_v48 }
 0xb92   :  { %2265 = vmatpush1.msra.mxu0 %v4611_v1 }
 0xb93   :  { %2266 = vmatprep.subr.mxu0 %v4614_v22 }
 0xb94   :  { %2267 = vmatpush1.msra.mxu0 %v4624_v59 }
 0xb95   :  { %2268 = vmatprep.subr.mxu0 %v4627_v8 }
 0xb96   :  { %2269 = vmatpush1.msra.mxu0 %v4630_v4 }
 0xb97   :  { %2270 = vmatprep.subr.mxu0 %v4632_v24 }
 0xb98   :  { %2271 = vmatpush1.msra.mxu0 %v4635_v40 }
 0xb99   :  { %2272 = vmatprep.subr.mxu0 %v4638_v11 }
 0xb9a   :  { %2273 = vmatpush1.msra.mxu0 %v4640_v19 }
 0xb9b   :  { %2274 = vmatprep.subr.mxu0 %v4643_v31 }
 0xb9c   :  { %2275 = vmatpush1.msra.mxu0 %v4646_v49 }
 0xb9d   :  { %2276 = vmatprep.subr.mxu0 %v4649_v60 }
 0xb9e   :  { %2277 = vmatpush2.msra.mxu0 %v4652_v27 }
 0xb9f   :  { %2278 = vmatprep.subr.mxu0 %v4655_v58 }
 0xba0   :  { %2279 = vmatpush2.msra.mxu0 %v4658_v55 }
 0xba1   :  { %2280 = vmatprep.subr.mxu0 %v4662_v50 }
 0xba2   :  { %2281 = vmatpush2.msra.mxu0 %v4665_v16 }
 0xba3   :  { %2282 = vmatprep.subr.mxu0 %v4668_v34 }
 0xba4   :  { %2283 = vmatpush2.msra.mxu0 %v4672_v7 }
 0xba5   :  { %2284 = vmatprep.subr.mxu0 %v4675_v0 }
 0xba6   :  { %2285 = vmatpush2.msra.mxu0 %v4678_v5 }
 0xba7   :  { %2286 = vmatprep.subr.mxu0 %v4681_v57 }
 0xba8   :  { %2287 = vmatpush2.msra.mxu0 %v4684_v53 }
 0xba9   :  { %2288 = vmatprep.subr.mxu0 %v4687_v26 }
 0xbaa   :  { %2289 = vmatpush2.msra.mxu0 %v4690_v39 }
 0xbab   :  { %2290 = vmatprep.subr.mxu0 %v4693_v23 }
 0xbac   :  { %2291 = vmatpush2.msra.mxu0 %v4696_v3 }
 0xbad   :  { %2292 = vmatprep.subr.mxu0 %v4700_v33 }
 0xbae   :  { %2293 = vmatpush2.msra.mxu0 %v4703_v12  ;;  %v5765_v12 = vld [vmem:[#allocation36_spill] sm:$0xff] }
 0xbaf   :  { %2294 = vmatprep.subr.mxu0 %v4706_v47 }
 0xbb0   :  { %2295 = vmatpush2.msra.mxu0 %v5756_v42 }
 0xbb1   :  { %2296 = vmatprep.subr.mxu0 %v5757_v2  ;;  %v5763_v2 = vld [vmem:[#allocation34_spill] sm:$0xff] }
 0xbb2   :  { %2297 = vmatpush2.msra.mxu0 %v5758_v46  ;;  %v5762_v46 = vld [vmem:[#allocation44_spill] sm:$0xff] }
 0xbb3   :  { %2298 = vmatprep.subr.mxu0 %v5759_v25 }
 0xbb4   :  { %2299 = vmatpush2.msra.mxu0 %v5760_v15 }
 0xbb5   :  { %2300 = vmatprep.subr.mxu0 %v4734_v43 }
 0xbb6   :  { %2301 = vmatpush2.msra.mxu0 %v5761_v54 }
 0xbb7   :  { %2302 = vmatprep.subr.mxu0 %v4741_v30 }
 0xbb8   :  { %2303 = vmatpush2.msra.mxu0 %v4744_v37 }
 0xbb9   :  { %2304 = vmatprep.subr.mxu0 %v4747_v45 }
 0xbba   :  { %2305 = vmatpush2.msra.mxu0 %v4751_v38  ;;  %v5764_v38 = vld [vmem:[#allocation27_spill] sm:$0xff] }
 0xbbb   :  { %2306 = vmatprep.subr.mxu0 %v4754_v32 }
 0xbbc   :  { %2307 = vmatpush2.msra.mxu0 %v4757_v52 }
 0xbbd   :  { %2466 = vmatprep.subr.mxu0 %v4550_v51  ;;  %v5766_v51 = vld [vmem:[#allocation41_spill] sm:$0xff] }
 0xbd5   :  { %v1727_v25 = vpop.permute.xlu1 %1726 }
 0xbd6   :  { %v1731_v43 = vmul.f32 %v5762_v46, %v1727_v25  ;;  %v5780_v25 = vld [vmem:[#allocation39_spill] sm:$0xff] }
 0xbe4   :  { %v1707_v32 = vpop.permute.xlu1 %1706 }
 0xbe6   :  { %v1725_v15 = vpop.permute.xlu0 %1724 }
 0xbe7   :  { %v1730_v54 = vmul.f32 %v1725_v15, %v5763_v2  ;;  %v5768_v2 = vld [vmem:[#allocation29_spill] sm:$0xff]  ;;  %v5781_v15 = vld [vmem:[#allocation40_spill] sm:$0xff] }
 0xbe9   :  { %v1732_v42 = vadd.f32 %v1731_v43, %v1730_v54  ;;  %v5767_v43 = vld [vmem:[#allocation35_spill] sm:$0xff]  ;;  %v5782_v54 = vld [vmem:[#allocation42_spill] sm:$0xff] }
 0xbea   :  { %v1729_v30 = vpop.permute.xlu0 %1728 }
 0xbeb   :  { %3247 = vtanh.f32 %v1732_v42  ;;  %v1712_v42 = vmul.f32 %v1707_v32, %v5767_v43  ;;  %v5779_v32 = vld [vmem:[#allocation26_spill] sm:$0xff]  ;;  %v5783_v43 = vld [vmem:[#allocation43_spill] sm:$0xff] }
 0xbee   :  { %v1709_v45 = vpop.permute.xlu0 %1708 }
 0xbef   :  { %v1713_v52 = vmul.f32 %v5766_v51, %v1709_v45  ;;  %v5772_v51 = vld [vmem:[#allocation22_spill] sm:$0xff]  ;;  %v1711_v45 = vpop.permute.xlu1 %1710 }
 0xbf8   :  { %v3248_v37 = vpop.eup %3247 }
 0xbf9   :  { %v1734_v47 = vmul.f32 %v3248_v37, %v1729_v30  ;;  %v5769_v30 = vld [vmem:[#allocation32_spill] sm:$0xff]  ;;  %v5771_v37 = vld [vmem:[#allocation30_spill] sm:$0xff] }
 0xbfb   :  { %1893 = vmatprep.mubr.f32.mxu1 %v1734_v47  ;;  %v1714_v47 = vadd.f32 %v1713_v52, %v1712_v42  ;;  %v5778_v52 = vld [vmem:[#allocation37_spill] sm:$0xff] }
 0xbfc   :  { %1894 = vmatmul.mubr.f32.vlgmr.msra.gmra.mxu1 %v5764_v38  ;;  %v5784_v42 = vld [vmem:[#allocation45_spill] sm:$0xff] }
 0xbfd   :  { %1899 = vmatprep.mubr.f32.mxu1 %v5765_v12  ;;  %2134 = vmatpush1.msra.mxu1 %v4552_v14  ;;  %v5770_v12 = vld [vmem:[#allocation47_spill] sm:$0xff]  ;;  %3249 = vtanh.f32 %v1714_v47 }
 0xbfe   :  { %2135 = vmatprep.subr.mxu1 %v4555_v61  ;;  %v5773_v14 = vld [vmem:[#allocation19_spill] sm:$0xff] }
 0xbff   :  { %2136 = vmatpush1.msra.mxu1 %v4558_v13  ;;  %v5774_v61 = vld [vmem:[#allocation31_spill] sm:$0xff]  ;;  %v5775_v13 = vld [vmem:[#allocation46_spill] sm:$0xff] }
 0xc00   :  { %1900 = vmatmul.mubr.f32.gmra.mxu1 %v5768_v2  ;;  %2137 = vmatprep.subr.mxu1 %v4560_v10  ;;  %v5776_v10 = vld [vmem:[#allocation33_spill] sm:$0xff]  ;;  %v5787_v47 = vld [vmem:[#allocation23_spill] sm:$0xff] }
 0xc01   :  { %1905 = vmatprep.mubr.f32.mxu1 %v5769_v30  ;;  %2138 = vmatpush1.msra.mxu1 %v4563_v20  ;;  %v5777_v20 = vld [vmem:[#allocation28_spill] sm:$0xff]  ;;  %v5785_v2 = vld [vmem:[#allocation21_spill] sm:$0xff] }
 0xc02   :  { %2139 = vmatprep.subr.mxu1 %v4566_v63  ;;  %v5786_v30 = vld [vmem:[#allocation20_spill] sm:$0xff] }
 0xc03   :  { %2140 = vmatpush1.msra.mxu1 %v4569_v6 }
 0xc04   :  { %1906 = vmatmul.mubr.f32.gmra.mxu1 %v5770_v12  ;;  %2141 = vmatprep.subr.mxu1 %v4572_v18  ;;  %v5788_v12 = vld [vmem:[#allocation18_spill] sm:$0xff] }
 0xc05   :  { %1911 = vmatprep.mubr.f32.mxu1 %v5771_v37  ;;  %2142 = vmatpush1.msra.mxu1 %v4575_v28  ;;  %v5789_v37 = vld [vmem:[#allocation24_spill] sm:$0xff] }
 0xc06   :  { %2143 = vmatprep.subr.mxu1 %v4578_v36 }
 0xc07   :  { %2144 = vmatpush1.msra.mxu1 %v4581_v44 }
 0xc08   :  { %1912 = vmatmul.mubr.f32.gmra.mxu1 %v5772_v51  ;;  %2145 = vmatprep.subr.mxu1 %v4584_v9  ;;  %v5790_v51 = vld [vmem:[#allocation17_spill] sm:$0xff] }
 0xc09   :  { %1917 = vmatprep.mubr.f32.mxu1 %v5773_v14  ;;  %2146 = vmatpush1.msra.mxu1 %v4587_v17  ;;  %v5791_v14 = vld [vmem:[#allocation25_spill] sm:$0xff] }
 0xc0a   :  { %2147 = vmatprep.subr.mxu1 %v4590_v62  ;;  %v3250_v38 = vpop.eup %3249 }
 0xc0b   :  { %2148 = vmatpush1.msra.mxu1 %v4593_v21  ;;  %v1716_v46 = vmul.f32 %v3250_v38, %v1711_v45  ;;  %v1817_v38 = vld [vmem:[%s5514_s6] sm:$0x3] }
 0xc0c   :  { %1918 = vmatmul.mubr.f32.gmra.mxu1 %v5774_v61  ;;  %2149 = vmatprep.subr.mxu1 %v4596_v29  ;;  %v5792_v61 = vld [vmem:[#allocation16_spill] sm:$0xff] }
 0xc0d   :  { %1923 = vmatprep.mubr.f32.mxu1 %v5775_v13  ;;  %2150 = vmatpush1.msra.mxu1 %v4599_v35  ;;  %v5793_v13 = vld [vmem:[#allocation48_spill] sm:$0xff] }
 0xc0e   :  { %2151 = vmatprep.subr.mxu1 %v4602_v41 }
 0xc0f   :  { %2152 = vmatpush1.msra.mxu1 %v4605_v56 }
 0xc10   :  { %1924 = vmatmul.mubr.f32.gmra.mxu1 %v5776_v10  ;;  %2153 = vmatprep.subr.mxu1 %v4608_v48  ;;  %v5794_v10 = vld [vmem:[#allocation49_spill] sm:$0xff] }
 0xc11   :  { %1929 = vmatprep.mubr.f32.mxu1 %v5777_v20  ;;  %2154 = vmatpush1.msra.mxu1 %v4611_v1  ;;  %v5795_v20 = vld [vmem:[#allocation38_spill] sm:$0xff] }
 0xc12   :  { %2155 = vmatprep.subr.mxu1 %v4614_v22 }
 0xc13   :  { %2156 = vmatpush1.msra.mxu1 %v4624_v59 }
 0xc14   :  { %1930 = vmatmul.mubr.f32.gmra.mxu1 %v5778_v52  ;;  %2157 = vmatprep.subr.mxu1 %v4627_v8  ;;  %v5796_v52 = vld [vmem:[#allocation15_spill] sm:$0xff] }
 0xc15   :  { %1935 = vmatprep.mubr.f32.mxu1 %v5779_v32  ;;  %2158 = vmatpush1.msra.mxu1 %v4630_v4  ;;  %v5797_v45 = vsub.s32 1, %v5796_v52 }
 0xc16   :  { %2159 = vmatprep.subr.mxu1 %v4632_v24 }
 0xc17   :  { %2160 = vmatpush1.msra.mxu1 %v4635_v40  ;;  %v1826_v32 = vrot.slane %v1817_v38, %v5797_v45 }
 0xc18   :  { %1936 = vmatmul.mubr.f32.gmra.mxu1 %v1716_v46  ;;  %2161 = vmatprep.subr.mxu1 %v4638_v11 }
 0xc19   :  { %2162 = vmatpush1.msra.mxu1 %v4640_v19 }
 0xc1a   :  { %2163 = vmatprep.subr.mxu1 %v4643_v31 }
 0xc1b   :  { %2164 = vmatpush1.msra.mxu1 %v4646_v49 }
 0xc1c   :  { %2165 = vmatprep.subr.mxu1 %v4649_v60 }
 0xc1d   :  { %2166 = vmatpush2.msra.mxu1 %v4652_v27 }
 0xc1e   :  { %2167 = vmatprep.subr.mxu1 %v4655_v58 }
 0xc1f   :  { %2168 = vmatpush2.msra.mxu1 %v4658_v55 }
 0xc20   :  { %2169 = vmatprep.subr.mxu1 %v4662_v50 }
 0xc21   :  { %2170 = vmatpush2.msra.mxu1 %v4665_v16 }
 0xc22   :  { %2171 = vmatprep.subr.mxu1 %v4668_v34 }
 0xc23   :  { %2172 = vmatpush2.msra.mxu1 %v4672_v7 }
 0xc24   :  { %2173 = vmatprep.subr.mxu1 %v4675_v0 }
 0xc25   :  { %2174 = vmatpush2.msra.mxu1 %v4678_v5 }
 0xc26   :  { %2175 = vmatprep.subr.mxu1 %v4681_v57 }
 0xc27   :  { %2176 = vmatpush2.msra.mxu1 %v4684_v53 }
 0xc28   :  { %2177 = vmatprep.subr.mxu1 %v4687_v26 }
 0xc29   :  { %2178 = vmatpush2.msra.mxu1 %v4690_v39 }
 0xc2a   :  { %2179 = vmatprep.subr.mxu1 %v4693_v23 }
 0xc2b   :  { %2180 = vmatpush2.msra.mxu1 %v4696_v3 }
 0xc2c   :  { %2181 = vmatprep.subr.mxu1 %v4700_v33 }
 0xc2d   :  { %2182 = vmatpush2.msra.mxu1 %v5780_v25 }
 0xc2e   :  { %2183 = vmatprep.subr.mxu1 %v5781_v15 }
 0xc2f   :  { %2184 = vmatpush2.msra.mxu1 %v5782_v54 }
 0xc30   :  { %2185 = vmatprep.subr.mxu1 %v5783_v43 }
 0xc31   :  { %2186 = vmatpush2.msra.mxu1 %v5784_v42 }
 0xc32   :  { %2187 = vmatprep.subr.mxu1 %v5785_v2 }
 0xc33   :  { %2188 = vmatpush2.msra.mxu1 %v5786_v30 }
 0xc34   :  { %2189 = vmatprep.subr.mxu1 %v5787_v47 }
 0xc35   :  { %2190 = vmatpush2.msra.mxu1 %v5788_v12 }
 0xc36   :  { %2191 = vmatprep.subr.mxu1 %v5789_v37 }
 0xc37   :  { %2192 = vmatpush2.msra.mxu1 %v5790_v51  ;;  %v5798_v51 = vsub.s32 0, %v5796_v52 }
 0xc38   :  { %2193 = vmatprep.subr.mxu1 %v5791_v14 }
 0xc39   :  { %2194 = vmatpush2.msra.mxu1 %v5792_v61  ;;  %v1822_v14 = vrot.slane %v1817_v38, %v5798_v51 }
 0xc3a   :  { %2195 = vmatprep.subr.mxu1 %v5793_v13 }
 0xc3b   :  { %2196 = vmatpush2.msra.mxu1 %v5794_v10 }
 0xc3c   :  { %2355 = vmatprep.subr.mxu1 %v5795_v20 }
 0xc3d   :  { %v2088_v45 = vpop.f32.mrf.mxu0 }
 0xcbc   :  { %v1895_v46 = vpop.f32.mrf.mxu1 }
 0xcbd   :  { %v1896_v42 = vadd.f32 %v1895_v46, %v1822_v14 }
 0xcbe   :  { %v1897_v37 = vpop.f32.mrf.mxu1 }
 0xcbf   :  { %v4918_v12 = vadd.f32 %v1897_v37, %v1826_v32  ;;  %v2094_v37 = vadd.f32 %v2088_v45, %v1896_v42 }
 0xcc0   :  { %v1901_v61 = vpop.f32.mrf.mxu1 }
 0xcc1   :  { %5799 = vst [vmem:[#allocation44_spill] sm:$0xff] %v4918_v12  ;;  %v4920_v13 = vadd.f32 %v1901_v61, %v1822_v14  ;;  %v3058_v12 = vmul.f32 -1.442695, %v2094_v37 }
 0xcc2   :  { %v1903_v10 = vpop.f32.mrf.mxu1 }
 0xcc3   :  { %v4922_v47 = vadd.f32 %v1903_v10, %v1826_v32  ;;  %3251 = vpow2.f32 %v3058_v12 }
 0xcc4   :  { %v1907_v20 = vpop.f32.mrf.mxu1 }
 0xcc5   :  { %5800 = vst [vmem:[#allocation34_spill] sm:$0xff] %v4922_v47  ;;  %v4924_v30 = vadd.f32 %v1907_v20, %v1822_v14 }
 0xcc6   :  { %v1909_v2 = vpop.f32.mrf.mxu1 }
 0xcc7   :  { %5801 = vst [vmem:[#allocation27_spill] sm:$0xff] %v4924_v30  ;;  %v4926_v43 = vadd.f32 %v1909_v2, %v1826_v32 }
 0xcc8   :  { %v1913_v54 = vpop.f32.mrf.mxu1 }
 0xcc9   :  { %5802 = vst [vmem:[#allocation36_spill] sm:$0xff] %v4926_v43  ;;  %v4928_v15 = vadd.f32 %v1913_v54, %v1822_v14 }
 0xcca   :  { %v1915_v51 = vpop.f32.mrf.mxu1 }
 0xccb   :  { %5803 = vst [vmem:[#allocation41_spill] sm:$0xff] %v4928_v15  ;;  %v4930_v38 = vadd.f32 %v1915_v51, %v1826_v32 }
 0xccc   :  { %v1919_v61 = vpop.f32.mrf.mxu1 }
 0xccd   :  { %5804 = vst [vmem:[#allocation35_spill] sm:$0xff] %v4930_v38  ;;  %v4932_v52 = vadd.f32 %v1919_v61, %v1822_v14 }
 0xcce   :  { %v1921_v10 = vpop.f32.mrf.mxu1 }
 0xccf   :  { %5805 = vst [vmem:[#allocation29_spill] sm:$0xff] %v4932_v52  ;;  %v4934_v47 = vadd.f32 %v1921_v10, %v1826_v32  ;;  %v2090_v10 = vpop.f32.mrf.mxu0 }
 0xcd0   :  { %v1925_v20 = vpop.f32.mrf.mxu1 }
 0xcd1   :  { %5806 = vst [vmem:[#allocation32_spill] sm:$0xff] %v4934_v47  ;;  %v4936_v30 = vadd.f32 %v1925_v20, %v1822_v14  ;;  %v3252_v20 = vpop.eup %3251 }
 0xcd2   :  { %v1927_v2 = vpop.f32.mrf.mxu1  ;;  %v2100_v12 = vadd.f32 1.0, %v3252_v20 }
 0xcd3   :  { %5807 = vst [vmem:[#allocation47_spill] sm:$0xff] %v4936_v30  ;;  %v4938_v46 = vadd.f32 %v1927_v2, %v1826_v32 }
 0xcd4   :  { %v1931_v54 = vpop.f32.mrf.mxu1 }
 0xcd5   :  { %v4940_v43 = vadd.f32 %v1931_v54, %v1822_v14 }
 0xcd6   :  { %v1933_v42 = vpop.f32.mrf.mxu1 }
 0xcd7   :  { %5808 = vst [vmem:[#allocation30_spill] sm:$0xff] %v4940_v43  ;;  %v4942_v45 = vadd.f32 %v1933_v42, %v1826_v32 }
 0xcd8   :  { %v1937_v51 = vpop.f32.mrf.mxu1 }
 0xcd9   :  { %v4944_v61 = vadd.f32 %v1937_v51, %v1822_v14 }
 0xcda   :  { %v1939_v38 = vpop.f32.mrf.mxu1 }
 0xcdb   :  { %5809 = vst [vmem:[#allocation22_spill] sm:$0xff] %v4944_v61  ;;  %v1940_v52 = vadd.f32 %v1939_v38, %v1826_v32 }
 0xcdd   :  { %v2096_v47 = vadd.f32 %v2090_v10, %v1940_v52 }
 0xcdf   :  { %v3059_v15 = vmul.f32 -1.442695, %v2096_v47  ;;  %3253 = vtanh.f32 %v2096_v47 }
 0xce1   :  { %3255 = vpow2.f32 %v3059_v15 }
 0xce2   :  { %3257 = vtanh.f32 %v2094_v37 }
 0xce3   :  { %3259 = vrcp.f32 %v2100_v12 }
 0xcec   :  { %v3254_v2 = vpop.eup %3253 }
 0xced   :  { %2124 = vrot.lane.b32.xlu1 %v3254_v2, %s3562_s27 }
 0xcee   :  { %v3256_v54 = vpop.eup %3255 }
 0xcef   :  { %v2118_v42 = vadd.f32 1.0, %v3256_v54  ;;  %v3258_v43 = vpop.eup %3257 }
 0xcf0   :  { %v3260_v14 = vpop.eup %3259 }
 0xcf1   :  { %3261 = vrcp.f32 %v2118_v42  ;;  %2106 = vrot.lane.b32.xlu1 %v3258_v43, %s3562_s27 }
 0xcf5   :  { %2108 = vrot.lane.b32.xlu1 %v3260_v14, %s3563_s28 }
 0xcfe   :  { %v3262_v32 = vpop.eup %3261 }
 0xcff   :  { %2122 = vrot.lane.b32.xlu0 %v3262_v32, %s3561_s3 }
 0xd03   :  { %2104 = vrot.lane.b32.xlu0 %v3260_v14, %s3561_s3 }
 0xd07   :  { %2126 = vrot.lane.b32.xlu0 %v3262_v32, %s3563_s28 }
 0xd5f   :  { %v2125_v15 = vpop.permute.xlu1 %2124 }
 0xd60   :  { %v2129_v37 = vmul.f32 %v3262_v32, %v2125_v15  ;;  %v4958_v15 = vld [vmem:[#allocation9 + $0xf0] sm:$0xff] }
 0xd63   :  { %v2107_v52 = vpop.permute.xlu1 %2106 }
 0xd64   :  { %v2111_v20 = vmul.f32 %v3260_v14, %v2107_v52  ;;  %v4961_v14 = vld [vmem:[#allocation9 + $0xe8] sm:$0xff] }
 0xd67   :  { %v2109_v30 = vpop.permute.xlu1 %2108 }
 0xd71   :  { %v2123_v47 = vpop.permute.xlu0 %2122 }
 0xd72   :  { %v2128_v38 = vmul.f32 0.0, %v2123_v47  ;;  %v4964_v47 = vld [vmem:[#allocation9 + $0xe0] sm:$0xff] }
 0xd74   :  { %v4952_v51 = vadd.f32 %v2129_v37, %v2128_v38  ;;  %v4967_v37 = vld [vmem:[#allocation9 + $0xd8] sm:$0xff]  ;;  %v4970_v38 = vld [vmem:[#allocation9 + $0xd0] sm:$0xff] }
 0xd75   :  { %v2105_v10 = vpop.permute.xlu0 %2104 }
 0xd76   :  { %3263 = vtanh.f32 %v4952_v51  ;;  %v2110_v43 = vmul.f32 0.0, %v2105_v10 }
 0xd78   :  { %v4955_v12 = vadd.f32 %v2111_v20, %v2110_v43 }
 0xd79   :  { %v2127_v54 = vpop.permute.xlu0 %2126 }
 0xd7a   :  { %3265 = vtanh.f32 %v4955_v12 }
 0xd83   :  { %v3264_v2 = vpop.eup %3263 }
 0xd84   :  { %v2132_v42 = vmul.f32 %v3264_v2, %v2127_v54 }
 0xd86   :  { %2197 = vmatprep.mubr.f32.mxu1 %v2132_v42 }
 0xd87   :  { %v3266_v61 = vpop.eup %3265 }
 0xd88   :  { %v2114_v32 = vmul.f32 %v3266_v61, %v2109_v30 }
 0xd8a   :  { %2198 = vmatmul.mubr.f32.vlgmr.msra.gmra.mxu1 %v2114_v32 }
 0xd8b   :  { %2356 = vmatpush1.msra.mxu1 %v4958_v15 }
 0xd8c   :  { %2357 = vmatprep.subr.mxu1 %v4961_v14 }
 0xd8d   :  { %2358 = vmatpush1.msra.mxu1 %v4964_v47 }
 0xd8e   :  { %2359 = vmatprep.subr.mxu1 %v4967_v37 }
 0xd8f   :  { %2360 = vmatpush1.msra.mxu1 %v4970_v38 }
 0xd90   :  { %2361 = vmatprep.subr.mxu1 %v4566_v63  ;;  %v5810_v63 = vld [vmem:[#allocation40_spill] sm:$0xff] }
 0xd91   :  { %2362 = vmatpush1.msra.mxu1 %v4569_v6  ;;  %v5811_v6 = vld [vmem:[#allocation42_spill] sm:$0xff] }
 0xd92   :  { %2363 = vmatprep.subr.mxu1 %v4572_v18  ;;  %v5812_v18 = vld [vmem:[#allocation43_spill] sm:$0xff] }
 0xd93   :  { %2364 = vmatpush1.msra.mxu1 %v4575_v28  ;;  %v5813_v28 = vld [vmem:[#allocation45_spill] sm:$0xff] }
 0xd94   :  { %2365 = vmatprep.subr.mxu1 %v4578_v36  ;;  %v5814_v36 = vld [vmem:[#allocation21_spill] sm:$0xff] }
 0xd95   :  { %2366 = vmatpush1.msra.mxu1 %v4581_v44  ;;  %v5815_v44 = vld [vmem:[#allocation20_spill] sm:$0xff] }
 0xd96   :  { %2367 = vmatprep.subr.mxu1 %v4584_v9  ;;  %v5816_v9 = vld [vmem:[#allocation23_spill] sm:$0xff] }
 0xd97   :  { %2368 = vmatpush1.msra.mxu1 %v4587_v17  ;;  %v5817_v17 = vld [vmem:[#allocation18_spill] sm:$0xff] }
 0xd98   :  { %2369 = vmatprep.subr.mxu1 %v4590_v62  ;;  %v5818_v62 = vld [vmem:[#allocation24_spill] sm:$0xff] }
 0xd99   :  { %2370 = vmatpush1.msra.mxu1 %v4593_v21  ;;  %v5819_v21 = vld [vmem:[#allocation17_spill] sm:$0xff] }
 0xd9a   :  { %2371 = vmatprep.subr.mxu1 %v4596_v29  ;;  %v5820_v29 = vld [vmem:[#allocation25_spill] sm:$0xff] }
 0xd9b   :  { %2372 = vmatpush1.msra.mxu1 %v4599_v35  ;;  %v5821_v35 = vld [vmem:[#allocation16_spill] sm:$0xff] }
 0xd9c   :  { %2373 = vmatprep.subr.mxu1 %v4602_v41  ;;  %v5822_v41 = vld [vmem:[#allocation48_spill] sm:$0xff] }
 0xd9d   :  { %2374 = vmatpush1.msra.mxu1 %v4605_v56  ;;  %v5823_v56 = vld [vmem:[#allocation49_spill] sm:$0xff] }
 0xd9e   :  { %2375 = vmatprep.subr.mxu1 %v4608_v48  ;;  %v5031_v48 = vld [vmem:[#allocation9 + $0xf8] sm:$0xff] }
 0xd9f   :  { %2376 = vmatpush1.msra.mxu1 %v4611_v1 }
 0xda0   :  { %2377 = vmatprep.subr.mxu1 %v4614_v22 }
 0xda1   :  { %2378 = vmatpush1.msra.mxu1 %v4624_v59 }
 0xda2   :  { %2379 = vmatprep.subr.mxu1 %v4627_v8 }
 0xda3   :  { %2380 = vmatpush1.msra.mxu1 %v4630_v4 }
 0xda4   :  { %2381 = vmatprep.subr.mxu1 %v4632_v24 }
 0xda5   :  { %2382 = vmatpush1.msra.mxu1 %v4635_v40 }
 0xda6   :  { %2383 = vmatprep.subr.mxu1 %v4638_v11 }
 0xda7   :  { %2384 = vmatpush1.msra.mxu1 %v4640_v19 }
 0xda8   :  { %2385 = vmatprep.subr.mxu1 %v4643_v31 }
 0xda9   :  { %2386 = vmatpush1.msra.mxu1 %v4646_v49 }
 0xdaa   :  { %2387 = vmatprep.subr.mxu1 %v4649_v60 }
 0xdab   :  { %2388 = vmatpush2.msra.mxu1 %v4652_v27 }
 0xdac   :  { %2389 = vmatprep.subr.mxu1 %v4655_v58 }
 0xdad   :  { %2390 = vmatpush2.msra.mxu1 %v4658_v55 }
 0xdae   :  { %2391 = vmatprep.subr.mxu1 %v4662_v50 }
 0xdaf   :  { %2392 = vmatpush2.msra.mxu1 %v4665_v16 }
 0xdb0   :  { %2393 = vmatprep.subr.mxu1 %v4668_v34 }
 0xdb1   :  { %2394 = vmatpush2.msra.mxu1 %v4672_v7 }
 0xdb2   :  { %2395 = vmatprep.subr.mxu1 %v4675_v0 }
 0xdb3   :  { %2396 = vmatpush2.msra.mxu1 %v4678_v5 }
 0xdb4   :  { %2397 = vmatprep.subr.mxu1 %v4681_v57 }
 0xdb5   :  { %2398 = vmatpush2.msra.mxu1 %v4684_v53 }
 0xdb6   :  { %2399 = vmatprep.subr.mxu1 %v4687_v26 }
 0xdb7   :  { %2400 = vmatpush2.msra.mxu1 %v4690_v39 }
 0xdb8   :  { %2401 = vmatprep.subr.mxu1 %v4693_v23 }
 0xdb9   :  { %2402 = vmatpush2.msra.mxu1 %v4696_v3 }
 0xdba   :  { %2403 = vmatprep.subr.mxu1 %v4700_v33 }
 0xdbb   :  { %2404 = vmatpush2.msra.mxu1 %v5780_v25 }
 0xdbc   :  { %2405 = vmatprep.subr.mxu1 %v5810_v63 }
 0xdbd   :  { %2406 = vmatpush2.msra.mxu1 %v5811_v6 }
 0xdbe   :  { %2407 = vmatprep.subr.mxu1 %v5812_v18 }
 0xdbf   :  { %2408 = vmatpush2.msra.mxu1 %v5813_v28 }
 0xdc0   :  { %2409 = vmatprep.subr.mxu1 %v5814_v36 }
 0xdc1   :  { %2410 = vmatpush2.msra.mxu1 %v5815_v44 }
 0xdc2   :  { %2411 = vmatprep.subr.mxu1 %v5816_v9 }
 0xdc3   :  { %2412 = vmatpush2.msra.mxu1 %v5817_v17 }
 0xdc4   :  { %2413 = vmatprep.subr.mxu1 %v5818_v62 }
 0xdc5   :  { %2414 = vmatpush2.msra.mxu1 %v5819_v21 }
 0xdc6   :  { %2415 = vmatprep.subr.mxu1 %v5820_v29 }
 0xdc7   :  { %2416 = vmatpush2.msra.mxu1 %v5821_v35 }
 0xdc8   :  { %2417 = vmatprep.subr.mxu1 %v5822_v41 }
 0xdc9   :  { %2418 = vmatpush2.msra.mxu1 %v5823_v56 }
 0xdca   :  { %2577 = vmatprep.subr.mxu1 %v5031_v48 }
 0xe4a   :  { %v2199_v1 = vpop.f32.mrf.mxu1 }
 0xe4b   :  { %v2205_v22 = vadd.f32 %v2199_v1, %v4920_v13 }
 0xe4c   :  { %v2201_v59 = vpop.f32.mrf.mxu1 }
 0xe4d   :  { %v3060_v8 = vmul.f32 -1.442695, %v2205_v22  ;;  %v2207_v4 = vadd.f32 %v2201_v59, %v4942_v45  ;;  %v5061_v59 = vld [vmem:[#allocation9 + $0xb8] sm:$0xff] }
 0xe4f   :  { %3267 = vpow2.f32 %v3060_v8  ;;  %v3061_v24 = vmul.f32 -1.442695, %v2207_v4  ;;  %v5064_v8 = vld [vmem:[#allocation9 + $0xb0] sm:$0xff] }
 0xe50   :  { %3269 = vtanh.f32 %v2207_v4  ;;  %v5067_v4 = vld [vmem:[#allocation9 + $0xa8] sm:$0xff] }
 0xe51   :  { %3271 = vpow2.f32 %v3061_v24  ;;  %v5070_v24 = vld [vmem:[#allocation9 + $0xa0] sm:$0xff] }
 0xe52   :  { %3273 = vtanh.f32 %v2205_v22  ;;  %v5058_v22 = vld [vmem:[#allocation9 + $0xc0] sm:$0xff] }
 0xe5c   :  { %v3268_v40 = vpop.eup %3267 }
 0xe5d   :  { %v3270_v11 = vpop.eup %3269  ;;  %v2211_v19 = vadd.f32 1.0, %v3268_v40  ;;  %v5073_v40 = vld [vmem:[#allocation9 + $0x98] sm:$0xff] }
 0xe5e   :  { %v3272_v31 = vpop.eup %3271  ;;  %2235 = vrot.lane.b32.xlu1 %v3270_v11, %s3562_s27  ;;  %v5076_v11 = vld [vmem:[#allocation9 + $0x90] sm:$0xff] }
 0xe5f   :  { %3275 = vrcp.f32 %v2211_v19  ;;  %v2229_v49 = vadd.f32 1.0, %v3272_v31  ;;  %v3274_v60 = vpop.eup %3273  ;;  %v5079_v19 = vld [vmem:[#allocation9 + $0x88] sm:$0xff]  ;;  %v5082_v31 = vld [vmem:[#allocation9 + $0x80] sm:$0xff] }
 0xe61   :  { %3277 = vrcp.f32 %v2229_v49  ;;  %v5085_v49 = vld [vmem:[#allocation9 + $0x78] sm:$0xff] }
 0xe62   :  { %2217 = vrot.lane.b32.xlu1 %v3274_v60, %s3562_s27  ;;  %v5088_v60 = vld [vmem:[#allocation9 + $0x70] sm:$0xff] }
 0xe6c   :  { %v3276_v27 = vpop.eup %3275 }
 0xe6d   :  { %2219 = vrot.lane.b32.xlu1 %v3276_v27, %s3563_s28 }
 0xe6e   :  { %v3278_v58 = vpop.eup %3277 }
 0xe6f   :  { %2233 = vrot.lane.b32.xlu0 %v3278_v58, %s3561_s3 }
 0xe73   :  { %2215 = vrot.lane.b32.xlu0 %v3276_v27, %s3561_s3 }
 0xe77   :  { %2237 = vrot.lane.b32.xlu0 %v3278_v58, %s3563_s28 }
 0xed0   :  { %v2236_v55 = vpop.permute.xlu1 %2235 }
 0xed1   :  { %v2240_v30 = vmul.f32 %v3278_v58, %v2236_v55  ;;  %v5094_v58 = vld [vmem:[#allocation9 + $0x60] sm:$0xff]  ;;  %v5097_v55 = vld [vmem:[#allocation9 + $0x58] sm:$0xff] }
 0xed4   :  { %v2218_v45 = vpop.permute.xlu1 %2217 }
 0xed5   :  { %v2222_v10 = vmul.f32 %v3276_v27, %v2218_v45  ;;  %v5091_v27 = vld [vmem:[#allocation9 + $0x68] sm:$0xff]  ;;  %v5109_v45 = vld [vmem:[#allocation9 + $0x38] sm:$0xff] }
 0xedf   :  { %v2220_v1 = vpop.permute.xlu1 %2219 }
 0xee1   :  { %v2234_v50 = vpop.permute.xlu0 %2233 }
 0xee2   :  { %v2239_v13 = vmul.f32 %v2234_v50, %v4952_v51  ;;  %v5100_v50 = vld [vmem:[#allocation9 + $0x50] sm:$0xff] }
 0xee4   :  { %v5043_v61 = vadd.f32 %v2240_v30, %v2239_v13  ;;  %v5103_v30 = vld [vmem:[#allocation9 + $0x48] sm:$0xff]  ;;  %v5106_v13 = vld [vmem:[#allocation9 + $0x40] sm:$0xff] }
 0xee5   :  { %v2216_v52 = vpop.permute.xlu0 %2215 }
 0xee6   :  { %3279 = vtanh.f32 %v5043_v61  ;;  %v2221_v20 = vmul.f32 %v2216_v52, %v4955_v12  ;;  %v5055_v12 = vld [vmem:[#allocation9 + $0xc8] sm:$0xff]  ;;  %v5112_v52 = vld [vmem:[#allocation9 + $0x30] sm:$0xff] }
 0xee8   :  { %v5047_v43 = vadd.f32 %v2222_v10, %v2221_v20  ;;  %v5115_v10 = vld [vmem:[#allocation9 + $0x28] sm:$0xff]  ;;  %v5118_v20 = vld [vmem:[#allocation9 + $0x20] sm:$0xff] }
 0xee9   :  { %v2238_v54 = vpop.permute.xlu0 %2237 }
 0xeea   :  { %3281 = vtanh.f32 %v5047_v43 }
 0xef3   :  { %v3280_v2 = vpop.eup %3279 }
 0xef4   :  { %v2243_v42 = vmul.f32 %v3280_v2, %v2238_v54  ;;  %v5121_v2 = vld [vmem:[#allocation9 + $0x18] sm:$0xff]  ;;  %v5124_v54 = vld [vmem:[#allocation9 + $0x10] sm:$0xff] }
 0xef5   :  { %5824 = vst [vmem:[#allocation19_spill] sm:$0xff] %v5121_v2  ;;  %5825 = vst [vmem:[#allocation31_spill] sm:$0xff] %v5124_v54 }
 0xef6   :  { %2308 = vmatprep.mubr.f32.mxu0 %v2243_v42  ;;  %v5127_v42 = vld [vmem:[#allocation9 + $0x8] sm:$0xff] }
 0xef7   :  { %v3282_v32 = vpop.eup %3281  ;;  %5826 = vst [vmem:[#allocation46_spill] sm:$0xff] %v5127_v42 }
 0xef8   :  { %v2225_v51 = vmul.f32 %v3282_v32, %v2220_v1  ;;  %v5130_v32 = vld [vmem:[#allocation9] sm:$0xff]  ;;  %v5133_v1 = vld [vmem:[#allocation9 + $0x1f8] sm:$0xff] }
 0xefa   :  { %2309 = vmatmul.mubr.f32.vlgmr.msra.gmra.mxu0 %v2225_v51  ;;  %v5136_v51 = vld [vmem:[#allocation9 + $0x1f0] sm:$0xff] }
 0xefb   :  { %2467 = vmatpush1.msra.mxu0 %v4958_v15 }
 0xefc   :  { %2468 = vmatprep.subr.mxu0 %v4961_v14 }
 0xefd   :  { %2469 = vmatpush1.msra.mxu0 %v4964_v47 }
 0xefe   :  { %2470 = vmatprep.subr.mxu0 %v4967_v37 }
 0xeff   :  { %2471 = vmatpush1.msra.mxu0 %v4970_v38 }
 0xf00   :  { %2472 = vmatprep.subr.mxu0 %v5055_v12 }
 0xf01   :  { %2473 = vmatpush1.msra.mxu0 %v5058_v22 }
 0xf02   :  { %2474 = vmatprep.subr.mxu0 %v5061_v59 }
 0xf03   :  { %2475 = vmatpush1.msra.mxu0 %v5064_v8 }
 0xf04   :  { %2476 = vmatprep.subr.mxu0 %v5067_v4 }
 0xf05   :  { %2477 = vmatpush1.msra.mxu0 %v5070_v24 }
 0xf06   :  { %2478 = vmatprep.subr.mxu0 %v5073_v40 }
 0xf07   :  { %2479 = vmatpush1.msra.mxu0 %v5076_v11 }
 0xf08   :  { %2480 = vmatprep.subr.mxu0 %v5079_v19 }
 0xf09   :  { %2481 = vmatpush1.msra.mxu0 %v5082_v31 }
 0xf0a   :  { %2482 = vmatprep.subr.mxu0 %v5085_v49 }
 0xf0b   :  { %2483 = vmatpush1.msra.mxu0 %v5088_v60 }
 0xf0c   :  { %2484 = vmatprep.subr.mxu0 %v5091_v27 }
 0xf0d   :  { %2485 = vmatpush1.msra.mxu0 %v5094_v58 }
 0xf0e   :  { %2486 = vmatprep.subr.mxu0 %v5097_v55 }
 0xf0f   :  { %2487 = vmatpush1.msra.mxu0 %v5100_v50 }
 0xf10   :  { %2488 = vmatprep.subr.mxu0 %v5103_v30 }
 0xf11   :  { %2489 = vmatpush1.msra.mxu0 %v5106_v13 }
 0xf12   :  { %2490 = vmatprep.subr.mxu0 %v5109_v45 }
 0xf13   :  { %2491 = vmatpush1.msra.mxu0 %v5112_v52 }
 0xf14   :  { %2492 = vmatprep.subr.mxu0 %v5115_v10 }
 0xf15   :  { %2493 = vmatpush1.msra.mxu0 %v5118_v20 }
 0xf16   :  { %2494 = vmatprep.subr.mxu0 %v5121_v2  ;;  %v5139_v2 = vld [vmem:[#allocation9 + $0x1e8] sm:$0xff] }
 0xf17   :  { %2495 = vmatpush1.msra.mxu0 %v5124_v54  ;;  %v5142_v54 = vld [vmem:[#allocation9 + $0x1e0] sm:$0xff] }
 0xf18   :  { %2496 = vmatprep.subr.mxu0 %v5127_v42  ;;  %v5145_v42 = vld [vmem:[#allocation9 + $0x1d8] sm:$0xff] }
 0xf19   :  { %2497 = vmatpush1.msra.mxu0 %v5130_v32 }
 0xf1a   :  { %2498 = vmatprep.subr.mxu0 %v5133_v1 }
 0xf1b   :  { %2499 = vmatpush2.msra.mxu0 %v5136_v51 }
 0xf1c   :  { %2500 = vmatprep.subr.mxu0 %v5139_v2 }
 0xf1d   :  { %2501 = vmatpush2.msra.mxu0 %v5142_v54 }
 0xf1e   :  { %2502 = vmatprep.subr.mxu0 %v5145_v42 }
 0xf1f   :  { %2503 = vmatpush2.msra.mxu0 %v4665_v16  ;;  %v5827_v16 = vld [vmem:[#allocation27_spill] sm:$0xff] }
 0xf20   :  { %2504 = vmatprep.subr.mxu0 %v4668_v34 }
 0xf21   :  { %2505 = vmatpush2.msra.mxu0 %v4672_v7 }
 0xf22   :  { %2506 = vmatprep.subr.mxu0 %v4675_v0 }
 0xf23   :  { %2507 = vmatpush2.msra.mxu0 %v4678_v5 }
 0xf24   :  { %2508 = vmatprep.subr.mxu0 %v4681_v57 }
 0xf25   :  { %2509 = vmatpush2.msra.mxu0 %v4684_v53 }
 0xf26   :  { %2510 = vmatprep.subr.mxu0 %v4687_v26 }
 0xf27   :  { %2511 = vmatpush2.msra.mxu0 %v4690_v39 }
 0xf28   :  { %2512 = vmatprep.subr.mxu0 %v4693_v23 }
 0xf29   :  { %2513 = vmatpush2.msra.mxu0 %v4696_v3 }
 0xf2a   :  { %2514 = vmatprep.subr.mxu0 %v4700_v33 }
 0xf2b   :  { %2515 = vmatpush2.msra.mxu0 %v5780_v25 }
 0xf2c   :  { %2516 = vmatprep.subr.mxu0 %v5810_v63 }
 0xf2d   :  { %2517 = vmatpush2.msra.mxu0 %v5811_v6 }
 0xf2e   :  { %2518 = vmatprep.subr.mxu0 %v5812_v18 }
 0xf2f   :  { %2519 = vmatpush2.msra.mxu0 %v5813_v28 }
 0xf30   :  { %2520 = vmatprep.subr.mxu0 %v5814_v36 }
 0xf31   :  { %2521 = vmatpush2.msra.mxu0 %v5815_v44 }
 0xf32   :  { %2522 = vmatprep.subr.mxu0 %v5816_v9 }
 0xf33   :  { %2523 = vmatpush2.msra.mxu0 %v5817_v17 }
 0xf34   :  { %2524 = vmatprep.subr.mxu0 %v5818_v62 }
 0xf35   :  { %2525 = vmatpush2.msra.mxu0 %v5819_v21 }
 0xf36   :  { %2526 = vmatprep.subr.mxu0 %v5820_v29 }
 0xf37   :  { %2527 = vmatpush2.msra.mxu0 %v5821_v35 }
 0xf38   :  { %2528 = vmatprep.subr.mxu0 %v5822_v41 }
 0xf39   :  { %2529 = vmatpush2.msra.mxu0 %v5823_v56 }
 0xf3a   :  { %2688 = vmatprep.subr.mxu0 %v5031_v48 }
 0xfba   :  { %v2310_v33 = vpop.f32.mrf.mxu0 }
 0xfbb   :  { %v2316_v34 = vadd.f32 %v2310_v33, %v5827_v16 }
 0xfbc   :  { %v2312_v7 = vpop.f32.mrf.mxu0 }
 0xfbd   :  { %v3062_v0 = vmul.f32 -1.442695, %v2316_v34  ;;  %v2318_v5 = vadd.f32 %v2312_v7, %v4938_v46  ;;  %v5830_v7 = vld [vmem:[#allocation46_spill] sm:$0xff] }
 0xfbf   :  { %3283 = vpow2.f32 %v3062_v0  ;;  %v3063_v57 = vmul.f32 -1.442695, %v2318_v5  ;;  %v5228_v0 = vld [vmem:[#allocation9 + $0x1d0] sm:$0xff] }
 0xfc0   :  { %3285 = vtanh.f32 %v2318_v5  ;;  %v5231_v5 = vld [vmem:[#allocation9 + $0x1c8] sm:$0xff] }
 0xfc1   :  { %3287 = vpow2.f32 %v3063_v57  ;;  %v5234_v57 = vld [vmem:[#allocation9 + $0x1c0] sm:$0xff] }
 0xfc2   :  { %3289 = vtanh.f32 %v2316_v34  ;;  %v5829_v34 = vld [vmem:[#allocation31_spill] sm:$0xff] }
 0xfcc   :  { %v3284_v53 = vpop.eup %3283 }
 0xfcd   :  { %v3286_v26 = vpop.eup %3285  ;;  %v2322_v39 = vadd.f32 1.0, %v3284_v53  ;;  %v5237_v53 = vld [vmem:[#allocation9 + $0x1b8] sm:$0xff] }
 0xfce   :  { %v3288_v23 = vpop.eup %3287  ;;  %2346 = vrot.lane.b32.xlu1 %v3286_v26, %s3562_s27  ;;  %v5240_v26 = vld [vmem:[#allocation9 + $0x1b0] sm:$0xff] }
 0xfcf   :  { %3291 = vrcp.f32 %v2322_v39  ;;  %v2340_v3 = vadd.f32 1.0, %v3288_v23  ;;  %v3290_v25 = vpop.eup %3289  ;;  %v5243_v39 = vld [vmem:[#allocation9 + $0x1a8] sm:$0xff]  ;;  %v5246_v23 = vld [vmem:[#allocation9 + $0x1a0] sm:$0xff] }
 0xfd1   :  { %3293 = vrcp.f32 %v2340_v3  ;;  %v5249_v3 = vld [vmem:[#allocation9 + $0x198] sm:$0xff] }
 0xfd2   :  { %2328 = vrot.lane.b32.xlu1 %v3290_v25, %s3562_s27  ;;  %v5252_v25 = vld [vmem:[#allocation9 + $0x190] sm:$0xff] }
 0xfdc   :  { %v3292_v63 = vpop.eup %3291 }
 0xfdd   :  { %2330 = vrot.lane.b32.xlu1 %v3292_v63, %s3563_s28 }
 0xfde   :  { %v3294_v46 = vpop.eup %3293 }
 0xfdf   :  { %2344 = vrot.lane.b32.xlu0 %v3294_v46, %s3561_s3 }
 0xfe3   :  { %2326 = vrot.lane.b32.xlu0 %v3292_v63, %s3561_s3 }
 0xfe7   :  { %2348 = vrot.lane.b32.xlu0 %v3294_v46, %s3563_s28 }
0x1040   :  { %v2347_v6 = vpop.permute.xlu1 %2346 }
0x1041   :  { %v2351_v28 = vmul.f32 %v3294_v46, %v2347_v6  ;;  %v5258_v46 = vld [vmem:[#allocation9 + $0x180] sm:$0xff]  ;;  %v5261_v6 = vld [vmem:[#allocation9 + $0x178] sm:$0xff] }
0x1042   :  { %5831 = vst [vmem:[#allocation33_spill] sm:$0xff] %v5261_v6 }
0x1044   :  { %v2329_v44 = vpop.permute.xlu1 %2328 }
0x1045   :  { %v2333_v62 = vmul.f32 %v3292_v63, %v2329_v44  ;;  %v5255_v63 = vld [vmem:[#allocation9 + $0x188] sm:$0xff]  ;;  %v5273_v44 = vld [vmem:[#allocation9 + $0x158] sm:$0xff] }
0x1046   :  { %5835 = vst [vmem:[#allocation39_spill] sm:$0xff] %v5273_v44 }
0x104f   :  { %v2331_v16 = vpop.permute.xlu1 %2330 }
0x1051   :  { %v2345_v18 = vpop.permute.xlu0 %2344 }
0x1052   :  { %v2350_v36 = vmul.f32 %v2345_v18, %v5043_v61  ;;  %v5264_v18 = vld [vmem:[#allocation9 + $0x170] sm:$0xff] }
0x1053   :  { %5832 = vst [vmem:[#allocation28_spill] sm:$0xff] %v5264_v18 }
0x1054   :  { %v5185_v9 = vadd.f32 %v2351_v28, %v2350_v36  ;;  %v5267_v28 = vld [vmem:[#allocation9 + $0x168] sm:$0xff]  ;;  %v5270_v36 = vld [vmem:[#allocation9 + $0x160] sm:$0xff] }
0x1055   :  { %v2327_v17 = vpop.permute.xlu0 %2326  ;;  %5833 = vst [vmem:[#allocation37_spill] sm:$0xff] %v5267_v28  ;;  %5834 = vst [vmem:[#allocation26_spill] sm:$0xff] %v5270_v36 }
0x1056   :  { %3295 = vtanh.f32 %v5185_v9  ;;  %v2332_v21 = vmul.f32 %v2327_v17, %v5047_v43  ;;  %v5828_v43 = vld [vmem:[#allocation19_spill] sm:$0xff]  ;;  %v5276_v17 = vld [vmem:[#allocation9 + $0x150] sm:$0xff] }
0x1057   :  { %5836 = vst [vmem:[#allocation38_spill] sm:$0xff] %v5276_v17 }
0x1058   :  { %v5189_v29 = vadd.f32 %v2333_v62, %v2332_v21  ;;  %v5279_v62 = vld [vmem:[#allocation9 + $0x148] sm:$0xff]  ;;  %v5282_v21 = vld [vmem:[#allocation9 + $0x140] sm:$0xff] }
0x1059   :  { %v2349_v41 = vpop.permute.xlu0 %2348  ;;  %5837 = vst [vmem:[#allocation15_spill] sm:$0xff] %v5279_v62  ;;  %5838 = vst [vmem:[#allocation40_spill] sm:$0xff] %v5282_v21 }
0x105a   :  { %3297 = vtanh.f32 %v5189_v29 }
0x1063   :  { %v3296_v35 = vpop.eup %3295 }
0x1064   :  { %v2354_v56 = vmul.f32 %v3296_v35, %v2349_v41  ;;  %v5285_v35 = vld [vmem:[#allocation9 + $0x138] sm:$0xff]  ;;  %v5288_v41 = vld [vmem:[#allocation9 + $0x130] sm:$0xff] }
0x1065   :  { %5839 = vst [vmem:[#allocation42_spill] sm:$0xff] %v5285_v35  ;;  %5840 = vst [vmem:[#allocation43_spill] sm:$0xff] %v5288_v41 }
0x1066   :  { %2419 = vmatprep.mubr.f32.mxu1 %v2354_v56  ;;  %v5291_v56 = vld [vmem:[#allocation9 + $0x128] sm:$0xff] }
0x1067   :  { %v3298_v33 = vpop.eup %3297  ;;  %5841 = vst [vmem:[#allocation45_spill] sm:$0xff] %v5291_v56 }
0x1068   :  { %v2336_v61 = vmul.f32 %v3298_v33, %v2331_v16  ;;  %v5294_v33 = vld [vmem:[#allocation9 + $0x120] sm:$0xff]  ;;  %v5297_v16 = vld [vmem:[#allocation9 + $0x118] sm:$0xff] }
0x1069   :  { %5842 = vst [vmem:[#allocation21_spill] sm:$0xff] %v5294_v33  ;;  %5843 = vst [vmem:[#allocation20_spill] sm:$0xff] %v5297_v16 }
0x106a   :  { %2420 = vmatmul.mubr.f32.vlgmr.msra.gmra.mxu1 %v2336_v61  ;;  %v5300_v61 = vld [vmem:[#allocation9 + $0x110] sm:$0xff] }
0x106b   :  { %2578 = vmatpush1.msra.mxu1 %v4958_v15  ;;  %5844 = vst [vmem:[#allocation23_spill] sm:$0xff] %v5300_v61 }
0x106c   :  { %2579 = vmatprep.subr.mxu1 %v4961_v14 }
0x106d   :  { %2580 = vmatpush1.msra.mxu1 %v4964_v47 }
0x106e   :  { %2581 = vmatprep.subr.mxu1 %v4967_v37 }
0x106f   :  { %2582 = vmatpush1.msra.mxu1 %v4970_v38 }
0x1070   :  { %2583 = vmatprep.subr.mxu1 %v5055_v12 }
0x1071   :  { %2584 = vmatpush1.msra.mxu1 %v5058_v22 }
0x1072   :  { %2585 = vmatprep.subr.mxu1 %v5061_v59 }
0x1073   :  { %2586 = vmatpush1.msra.mxu1 %v5064_v8 }
0x1074   :  { %2587 = vmatprep.subr.mxu1 %v5067_v4 }
0x1075   :  { %2588 = vmatpush1.msra.mxu1 %v5070_v24 }
0x1076   :  { %2589 = vmatprep.subr.mxu1 %v5073_v40 }
0x1077   :  { %2590 = vmatpush1.msra.mxu1 %v5076_v11 }
0x1078   :  { %2591 = vmatprep.subr.mxu1 %v5079_v19 }
0x1079   :  { %2592 = vmatpush1.msra.mxu1 %v5082_v31 }
0x107a   :  { %2593 = vmatprep.subr.mxu1 %v5085_v49 }
0x107b   :  { %2594 = vmatpush1.msra.mxu1 %v5088_v60 }
0x107c   :  { %2595 = vmatprep.subr.mxu1 %v5091_v27 }
0x107d   :  { %2596 = vmatpush1.msra.mxu1 %v5094_v58 }
0x107e   :  { %2597 = vmatprep.subr.mxu1 %v5097_v55 }
0x107f   :  { %2598 = vmatpush1.msra.mxu1 %v5100_v50 }
0x1080   :  { %2599 = vmatprep.subr.mxu1 %v5103_v30 }
0x1081   :  { %2600 = vmatpush1.msra.mxu1 %v5106_v13 }
0x1082   :  { %2601 = vmatprep.subr.mxu1 %v5109_v45 }
0x1083   :  { %2602 = vmatpush1.msra.mxu1 %v5112_v52 }
0x1084   :  { %2603 = vmatprep.subr.mxu1 %v5115_v10 }
0x1085   :  { %2604 = vmatpush1.msra.mxu1 %v5118_v20 }
0x1086   :  { %2605 = vmatprep.subr.mxu1 %v5828_v43 }
0x1087   :  { %2606 = vmatpush1.msra.mxu1 %v5829_v34 }
0x1088   :  { %2607 = vmatprep.subr.mxu1 %v5830_v7 }
0x1089   :  { %2608 = vmatpush1.msra.mxu1 %v5130_v32 }
0x108a   :  { %2609 = vmatprep.subr.mxu1 %v5133_v1 }
0x108b   :  { %2610 = vmatpush2.msra.mxu1 %v5136_v51 }
0x108c   :  { %2611 = vmatprep.subr.mxu1 %v5139_v2 }
0x108d   :  { %2612 = vmatpush2.msra.mxu1 %v5142_v54 }
0x108e   :  { %2613 = vmatprep.subr.mxu1 %v5145_v42 }
0x108f   :  { %2614 = vmatpush2.msra.mxu1 %v5228_v0 }
0x1090   :  { %2615 = vmatprep.subr.mxu1 %v5231_v5 }
0x1091   :  { %2616 = vmatpush2.msra.mxu1 %v5234_v57 }
0x1092   :  { %2617 = vmatprep.subr.mxu1 %v5237_v53 }
0x1093   :  { %2618 = vmatpush2.msra.mxu1 %v5240_v26 }
0x1094   :  { %2619 = vmatprep.subr.mxu1 %v5243_v39 }
0x1095   :  { %2620 = vmatpush2.msra.mxu1 %v5246_v23 }
0x1096   :  { %2621 = vmatprep.subr.mxu1 %v5249_v3 }
0x1097   :  { %2622 = vmatpush2.msra.mxu1 %v5252_v25 }
0x1098   :  { %2623 = vmatprep.subr.mxu1 %v5255_v63 }
0x1099   :  { %2624 = vmatpush2.msra.mxu1 %v5258_v46 }
0x109a   :  { %2625 = vmatprep.subr.mxu1 %v5261_v6 }
0x109b   :  { %2626 = vmatpush2.msra.mxu1 %v5264_v18 }
0x109c   :  { %2627 = vmatprep.subr.mxu1 %v5267_v28 }
0x109d   :  { %2628 = vmatpush2.msra.mxu1 %v5270_v36 }
0x109e   :  { %2629 = vmatprep.subr.mxu1 %v5273_v44 }
0x109f   :  { %2630 = vmatpush2.msra.mxu1 %v5276_v17 }
0x10a0   :  { %2631 = vmatprep.subr.mxu1 %v5279_v62 }
0x10a1   :  { %2632 = vmatpush2.msra.mxu1 %v5282_v21 }
0x10a2   :  { %2633 = vmatprep.subr.mxu1 %v5285_v35  ;;  %v5303_v35 = vld [vmem:[#allocation9 + $0x108] sm:$0xff] }
0x10a3   :  { %2634 = vmatpush2.msra.mxu1 %v5288_v41  ;;  %5845 = vst [vmem:[#allocation18_spill] sm:$0xff] %v5303_v35  ;;  %v5306_v41 = vld [vmem:[#allocation9 + $0x100] sm:$0xff] }
0x10a4   :  { %2635 = vmatprep.subr.mxu1 %v5291_v56  ;;  %5846 = vst [vmem:[#allocation24_spill] sm:$0xff] %v5306_v41 }
0x10a5   :  { %2636 = vmatpush2.msra.mxu1 %v5294_v33  ;;  %v5847_v33 = vld [vmem:[#allocation41_spill] sm:$0xff] }
0x10a6   :  { %2637 = vmatprep.subr.mxu1 %v5297_v16  ;;  %v5848_v16 = vld [vmem:[#allocation32_spill] sm:$0xff] }
0x10a7   :  { %2638 = vmatpush2.msra.mxu1 %v5300_v61 }
0x10a8   :  { %2639 = vmatprep.subr.mxu1 %v5303_v35 }
0x10a9   :  { %2640 = vmatpush2.msra.mxu1 %v5306_v41 }
0x10aa   :  { %2799 = vmatprep.subr.mxu1 %v5031_v48 }
0x112a   :  { %v2421_v56 = vpop.f32.mrf.mxu1 }
0x112b   :  { %v2427_v21 = vadd.f32 %v2421_v56, %v5847_v33 }
0x112c   :  { %v2423_v62 = vpop.f32.mrf.mxu1 }
0x112d   :  { %v3064_v17 = vmul.f32 -1.442695, %v2427_v21  ;;  %v2429_v44 = vadd.f32 %v2423_v62, %v5848_v16 }
0x112f   :  { %3299 = vpow2.f32 %v3064_v17  ;;  %v3065_v36 = vmul.f32 -1.442695, %v2429_v44 }
0x1130   :  { %3301 = vtanh.f32 %v2429_v44 }
0x1131   :  { %3303 = vpow2.f32 %v3065_v36 }
0x1132   :  { %3305 = vtanh.f32 %v2427_v21 }
0x113c   :  { %v3300_v61 = vpop.eup %3299 }
0x113d   :  { %v3302_v35 = vpop.eup %3301  ;;  %v2433_v28 = vadd.f32 1.0, %v3300_v61 }
0x113e   :  { %v3304_v18 = vpop.eup %3303  ;;  %2457 = vrot.lane.b32.xlu1 %v3302_v35, %s3562_s27 }
0x113f   :  { %3307 = vrcp.f32 %v2433_v28  ;;  %v2451_v48 = vadd.f32 1.0, %v3304_v18  ;;  %v3306_v41 = vpop.eup %3305 }
0x1141   :  { %3309 = vrcp.f32 %v2451_v48 }
0x1142   :  { %2439 = vrot.lane.b32.xlu1 %v3306_v41, %s3562_s27 }
0x114c   :  { %v3308_v56 = vpop.eup %3307 }
0x114d   :  { %2441 = vrot.lane.b32.xlu1 %v3308_v56, %s3563_s28 }
0x114e   :  { %v3310_v17 = vpop.eup %3309 }
0x114f   :  { %2455 = vrot.lane.b32.xlu0 %v3310_v17, %s3561_s3 }
0x1153   :  { %2437 = vrot.lane.b32.xlu0 %v3308_v56, %s3561_s3 }
0x1157   :  { %2459 = vrot.lane.b32.xlu0 %v3310_v17, %s3563_s28 }
0x11b0   :  { %v2458_v36 = vpop.permute.xlu1 %2457 }
0x11b1   :  { %v2462_v62 = vmul.f32 %v3310_v17, %v2458_v36 }
0x11b4   :  { %v2440_v18 = vpop.permute.xlu1 %2439 }
0x11b5   :  { %v2444_v41 = vmul.f32 %v3308_v56, %v2440_v18  ;;  %v5851_v56 = vld [vmem:[#allocation37_spill] sm:$0xff]  ;;  %v5855_v18 = vld [vmem:[#allocation15_spill] sm:$0xff] }
0x11bf   :  { %v2442_v36 = vpop.permute.xlu1 %2441 }
0x11c1   :  { %v2456_v44 = vpop.permute.xlu0 %2455 }
0x11c2   :  { %v2461_v28 = vmul.f32 %v2456_v44, %v5185_v9  ;;  %v5852_v44 = vld [vmem:[#allocation26_spill] sm:$0xff] }
0x11c4   :  { %v5319_v21 = vadd.f32 %v2462_v62, %v2461_v28  ;;  %v5853_v62 = vld [vmem:[#allocation39_spill] sm:$0xff]  ;;  %v5854_v28 = vld [vmem:[#allocation38_spill] sm:$0xff] }
0x11c5   :  { %v2438_v35 = vpop.permute.xlu0 %2437 }
0x11c6   :  { %3311 = vtanh.f32 %v5319_v21  ;;  %v2443_v33 = vmul.f32 %v2438_v35, %v5189_v29  ;;  %v5849_v29 = vld [vmem:[#allocation33_spill] sm:$0xff]  ;;  %v5856_v35 = vld [vmem:[#allocation40_spill] sm:$0xff] }
0x11c8   :  { %v5323_v16 = vadd.f32 %v2444_v41, %v2443_v33  ;;  %v5857_v41 = vld [vmem:[#allocation42_spill] sm:$0xff]  ;;  %v5858_v33 = vld [vmem:[#allocation43_spill] sm:$0xff] }
0x11c9   :  { %v2460_v48 = vpop.permute.xlu0 %2459 }
0x11ca   :  { %3313 = vtanh.f32 %v5323_v16 }
0x11d3   :  { %v3312_v61 = vpop.eup %3311 }
0x11d4   :  { %v2465_v6 = vmul.f32 %v3312_v61, %v2460_v48  ;;  %v5859_v61 = vld [vmem:[#allocation45_spill] sm:$0xff] }
0x11d5   :  { %v5860_v48 = vld [vmem:[#allocation21_spill] sm:$0xff] }
0x11d6   :  { %2530 = vmatprep.mubr.f32.mxu0 %v2465_v6  ;;  %v5850_v6 = vld [vmem:[#allocation28_spill] sm:$0xff] }
0x11d7   :  { %v3314_v17 = vpop.eup %3313 }
0x11d8   :  { %v2447_v9 = vmul.f32 %v3314_v17, %v2442_v36  ;;  %v5861_v17 = vld [vmem:[#allocation20_spill] sm:$0xff]  ;;  %v5862_v36 = vld [vmem:[#allocation23_spill] sm:$0xff] }
0x11da   :  { %2531 = vmatmul.mubr.f32.vlgmr.msra.gmra.mxu0 %v2447_v9  ;;  %v5863_v9 = vld [vmem:[#allocation18_spill] sm:$0xff] }
0x11db   :  { %2689 = vmatpush1.msra.mxu0 %v4958_v15 }
0x11dc   :  { %2690 = vmatprep.subr.mxu0 %v4961_v14 }
0x11dd   :  { %2691 = vmatpush1.msra.mxu0 %v4964_v47 }
0x11de   :  { %2692 = vmatprep.subr.mxu0 %v4967_v37 }
0x11df   :  { %2693 = vmatpush1.msra.mxu0 %v4970_v38 }
0x11e0   :  { %2694 = vmatprep.subr.mxu0 %v5055_v12 }
0x11e1   :  { %2695 = vmatpush1.msra.mxu0 %v5058_v22 }
0x11e2   :  { %2696 = vmatprep.subr.mxu0 %v5061_v59 }
0x11e3   :  { %2697 = vmatpush1.msra.mxu0 %v5064_v8 }
0x11e4   :  { %2698 = vmatprep.subr.mxu0 %v5067_v4 }
0x11e5   :  { %2699 = vmatpush1.msra.mxu0 %v5070_v24 }
0x11e6   :  { %2700 = vmatprep.subr.mxu0 %v5073_v40 }
0x11e7   :  { %2701 = vmatpush1.msra.mxu0 %v5076_v11 }
0x11e8   :  { %2702 = vmatprep.subr.mxu0 %v5079_v19 }
0x11e9   :  { %2703 = vmatpush1.msra.mxu0 %v5082_v31 }
0x11ea   :  { %2704 = vmatprep.subr.mxu0 %v5085_v49 }
0x11eb   :  { %2705 = vmatpush1.msra.mxu0 %v5088_v60 }
0x11ec   :  { %2706 = vmatprep.subr.mxu0 %v5091_v27 }
0x11ed   :  { %2707 = vmatpush1.msra.mxu0 %v5094_v58 }
0x11ee   :  { %2708 = vmatprep.subr.mxu0 %v5097_v55 }
0x11ef   :  { %2709 = vmatpush1.msra.mxu0 %v5100_v50 }
0x11f0   :  { %2710 = vmatprep.subr.mxu0 %v5103_v30 }
0x11f1   :  { %2711 = vmatpush1.msra.mxu0 %v5106_v13 }
0x11f2   :  { %2712 = vmatprep.subr.mxu0 %v5109_v45 }
0x11f3   :  { %2713 = vmatpush1.msra.mxu0 %v5112_v52 }
0x11f4   :  { %2714 = vmatprep.subr.mxu0 %v5115_v10 }
0x11f5   :  { %2715 = vmatpush1.msra.mxu0 %v5118_v20 }
0x11f6   :  { %2716 = vmatprep.subr.mxu0 %v5828_v43 }
0x11f7   :  { %2717 = vmatpush1.msra.mxu0 %v5829_v34 }
0x11f8   :  { %2718 = vmatprep.subr.mxu0 %v5830_v7 }
0x11f9   :  { %2719 = vmatpush1.msra.mxu0 %v5130_v32 }
0x11fa   :  { %2720 = vmatprep.subr.mxu0 %v5133_v1 }
0x11fb   :  { %2721 = vmatpush2.msra.mxu0 %v5136_v51 }
0x11fc   :  { %2722 = vmatprep.subr.mxu0 %v5139_v2 }
0x11fd   :  { %2723 = vmatpush2.msra.mxu0 %v5142_v54 }
0x11fe   :  { %2724 = vmatprep.subr.mxu0 %v5145_v42 }
0x11ff   :  { %2725 = vmatpush2.msra.mxu0 %v5228_v0 }
0x1200   :  { %2726 = vmatprep.subr.mxu0 %v5231_v5 }
0x1201   :  { %2727 = vmatpush2.msra.mxu0 %v5234_v57 }
0x1202   :  { %2728 = vmatprep.subr.mxu0 %v5237_v53 }
0x1203   :  { %2729 = vmatpush2.msra.mxu0 %v5240_v26 }
0x1204   :  { %2730 = vmatprep.subr.mxu0 %v5243_v39 }
0x1205   :  { %2731 = vmatpush2.msra.mxu0 %v5246_v23 }
0x1206   :  { %2732 = vmatprep.subr.mxu0 %v5249_v3 }
0x1207   :  { %2733 = vmatpush2.msra.mxu0 %v5252_v25 }
0x1208   :  { %2734 = vmatprep.subr.mxu0 %v5255_v63 }
0x1209   :  { %2735 = vmatpush2.msra.mxu0 %v5258_v46 }
0x120a   :  { %2736 = vmatprep.subr.mxu0 %v5849_v29 }
0x120b   :  { %2737 = vmatpush2.msra.mxu0 %v5850_v6 }
0x120c   :  { %2738 = vmatprep.subr.mxu0 %v5851_v56 }
0x120d   :  { %2739 = vmatpush2.msra.mxu0 %v5852_v44 }
0x120e   :  { %2740 = vmatprep.subr.mxu0 %v5853_v62  ;;  %v5864_v62 = vld [vmem:[#allocation24_spill] sm:$0xff] }
0x120f   :  { %2741 = vmatpush2.msra.mxu0 %v5854_v28 }
0x1210   :  { %2742 = vmatprep.subr.mxu0 %v5855_v18  ;;  %v5865_v18 = vld [vmem:[#allocation29_spill] sm:$0xff] }
0x1211   :  { %2743 = vmatpush2.msra.mxu0 %v5856_v35 }
0x1212   :  { %2744 = vmatprep.subr.mxu0 %v5857_v41  ;;  %v5866_v41 = vld [vmem:[#allocation35_spill] sm:$0xff] }
0x1213   :  { %2745 = vmatpush2.msra.mxu0 %v5858_v33 }
0x1214   :  { %2746 = vmatprep.subr.mxu0 %v5859_v61 }
0x1215   :  { %2747 = vmatpush2.msra.mxu0 %v5860_v48 }
0x1216   :  { %2748 = vmatprep.subr.mxu0 %v5861_v17 }
0x1217   :  { %2749 = vmatpush2.msra.mxu0 %v5862_v36 }
0x1218   :  { %2750 = vmatprep.subr.mxu0 %v5863_v9 }
0x1219   :  { %2751 = vmatpush2.msra.mxu0 %v5864_v62 }
0x129a   :  { %v2532_v28 = vpop.f32.mrf.mxu0 }
0x129b   :  { %v2538_v44 = vadd.f32 %v2532_v28, %v5865_v18 }
0x129c   :  { %v2534_v35 = vpop.f32.mrf.mxu0 }
0x129d   :  { %v3066_v56 = vmul.f32 -1.442695, %v2538_v44  ;;  %v2540_v6 = vadd.f32 %v2534_v35, %v5866_v41 }
0x129f   :  { %3315 = vpow2.f32 %v3066_v56  ;;  %v3067_v33 = vmul.f32 -1.442695, %v2540_v6 }
0x12a0   :  { %3317 = vtanh.f32 %v2540_v6 }
0x12a1   :  { %3319 = vpow2.f32 %v3067_v33 }
0x12a2   :  { %3321 = vtanh.f32 %v2538_v44 }
0x12ac   :  { %v3316_v48 = vpop.eup %3315 }
0x12ad   :  { %v3318_v17 = vpop.eup %3317  ;;  %v2544_v61 = vadd.f32 1.0, %v3316_v48 }
0x12ae   :  { %v3320_v36 = vpop.eup %3319  ;;  %2568 = vrot.lane.b32.xlu1 %v3318_v17, %s3562_s27 }
0x12af   :  { %3323 = vrcp.f32 %v2544_v61  ;;  %v2562_v62 = vadd.f32 1.0, %v3320_v36  ;;  %v3322_v9 = vpop.eup %3321 }
0x12b1   :  { %3325 = vrcp.f32 %v2562_v62 }
0x12b2   :  { %2550 = vrot.lane.b32.xlu1 %v3322_v9, %s3562_s27 }
0x12bc   :  { %v3324_v28 = vpop.eup %3323 }
0x12bd   :  { %2552 = vrot.lane.b32.xlu1 %v3324_v28, %s3563_s28 }
0x12be   :  { %v3326_v56 = vpop.eup %3325 }
0x12bf   :  { %2566 = vrot.lane.b32.xlu0 %v3326_v56, %s3561_s3 }
0x12c3   :  { %2548 = vrot.lane.b32.xlu0 %v3324_v28, %s3561_s3 }
0x12c7   :  { %2570 = vrot.lane.b32.xlu0 %v3326_v56, %s3563_s28 }
0x1320   :  { %v2569_v6 = vpop.permute.xlu1 %2568 }
0x1321   :  { %v2573_v18 = vmul.f32 %v3326_v56, %v2569_v6 }
0x1324   :  { %v2551_v41 = vpop.permute.xlu1 %2550 }
0x1325   :  { %v2555_v61 = vmul.f32 %v3324_v28, %v2551_v41  ;;  %v5885_v28 = vld [vmem:[#allocation30_spill] sm:$0xff] }
0x1326   :  { %v5886_v41 = vld [vmem:[#allocation34_spill] sm:$0xff] }
0x132f   :  { %v2553_v6 = vpop.permute.xlu1 %2552 }
0x1331   :  { %v2567_v44 = vpop.permute.xlu0 %2566 }
0x1332   :  { %v2572_v35 = vmul.f32 %v2567_v44, %v5319_v21 }
0x1334   :  { %v5398_v33 = vadd.f32 %v2573_v18, %v2572_v35 }
0x1335   :  { %v2549_v62 = vpop.permute.xlu0 %2548 }
0x1336   :  { %3327 = vtanh.f32 %v5398_v33  ;;  %v2554_v48 = vmul.f32 %v2549_v62, %v5323_v16 }
0x1338   :  { %v5402_v17 = vadd.f32 %v2555_v61, %v2554_v48 }
0x1339   :  { %v2571_v9 = vpop.permute.xlu0 %2570 }
0x133a   :  { %3329 = vtanh.f32 %v5402_v17 }
0x1343   :  { %v3328_v36 = vpop.eup %3327 }
0x1344   :  { %v2576_v29 = vmul.f32 %v3328_v36, %v2571_v9 }
0x1346   :  { %2641 = vmatprep.mubr.f32.mxu1 %v2576_v29 }
0x1347   :  { %v3330_v56 = vpop.eup %3329 }
0x1348   :  { %v2558_v21 = vmul.f32 %v3330_v56, %v2553_v6 }
0x134a   :  { %2642 = vmatmul.mubr.f32.vlgmr.msra.gmra.mxu1 %v2558_v21 }
0x134b   :  { %2800 = vmatpush1.msra.mxu1 %v4958_v15  ;;  %v5867_v15 = vld [vmem:[#allocation33_spill] sm:$0xff] }
0x134c   :  { %2801 = vmatprep.subr.mxu1 %v4961_v14  ;;  %v5868_v14 = vld [vmem:[#allocation28_spill] sm:$0xff] }
0x134d   :  { %2802 = vmatpush1.msra.mxu1 %v4964_v47  ;;  %v5869_v47 = vld [vmem:[#allocation37_spill] sm:$0xff] }
0x134e   :  { %2803 = vmatprep.subr.mxu1 %v4967_v37  ;;  %v5870_v37 = vld [vmem:[#allocation26_spill] sm:$0xff] }
0x134f   :  { %2804 = vmatpush1.msra.mxu1 %v4970_v38  ;;  %v5871_v38 = vld [vmem:[#allocation39_spill] sm:$0xff] }
0x1350   :  { %2805 = vmatprep.subr.mxu1 %v5055_v12  ;;  %v5872_v12 = vld [vmem:[#allocation38_spill] sm:$0xff] }
0x1351   :  { %2806 = vmatpush1.msra.mxu1 %v5058_v22  ;;  %v5873_v22 = vld [vmem:[#allocation15_spill] sm:$0xff] }
0x1352   :  { %2807 = vmatprep.subr.mxu1 %v5061_v59  ;;  %v5874_v59 = vld [vmem:[#allocation40_spill] sm:$0xff] }
0x1353   :  { %2808 = vmatpush1.msra.mxu1 %v5064_v8  ;;  %v5875_v8 = vld [vmem:[#allocation42_spill] sm:$0xff] }
0x1354   :  { %2809 = vmatprep.subr.mxu1 %v5067_v4  ;;  %v5876_v4 = vld [vmem:[#allocation43_spill] sm:$0xff] }
0x1355   :  { %2810 = vmatpush1.msra.mxu1 %v5070_v24  ;;  %v5877_v24 = vld [vmem:[#allocation45_spill] sm:$0xff] }
0x1356   :  { %2811 = vmatprep.subr.mxu1 %v5073_v40  ;;  %v5878_v40 = vld [vmem:[#allocation21_spill] sm:$0xff] }
0x1357   :  { %2812 = vmatpush1.msra.mxu1 %v5076_v11  ;;  %v5879_v11 = vld [vmem:[#allocation20_spill] sm:$0xff] }
0x1358   :  { %2813 = vmatprep.subr.mxu1 %v5079_v19  ;;  %v5880_v19 = vld [vmem:[#allocation23_spill] sm:$0xff] }
0x1359   :  { %2814 = vmatpush1.msra.mxu1 %v5082_v31  ;;  %v5881_v31 = vld [vmem:[#allocation18_spill] sm:$0xff] }
0x135a   :  { %2815 = vmatprep.subr.mxu1 %v5085_v49  ;;  %v5882_v49 = vld [vmem:[#allocation24_spill] sm:$0xff] }
0x135b   :  { %2816 = vmatpush1.msra.mxu1 %v5088_v60 }
0x135c   :  { %2817 = vmatprep.subr.mxu1 %v5091_v27  ;;  %v5883_v27 = vld [vmem:[#allocation47_spill] sm:$0xff] }
0x135d   :  { %2818 = vmatpush1.msra.mxu1 %v5094_v58 }
0x135e   :  { %2819 = vmatprep.subr.mxu1 %v5097_v55 }
0x135f   :  { %2820 = vmatpush1.msra.mxu1 %v5100_v50 }
0x1360   :  { %2821 = vmatprep.subr.mxu1 %v5103_v30  ;;  %v5884_v30 = vld [vmem:[#allocation36_spill] sm:$0xff] }
0x1361   :  { %2822 = vmatpush1.msra.mxu1 %v5106_v13 }
0x1362   :  { %2823 = vmatprep.subr.mxu1 %v5109_v45 }
0x1363   :  { %2824 = vmatpush1.msra.mxu1 %v5112_v52 }
0x1364   :  { %2825 = vmatprep.subr.mxu1 %v5115_v10 }
0x1365   :  { %2826 = vmatpush1.msra.mxu1 %v5118_v20 }
0x1366   :  { %2827 = vmatprep.subr.mxu1 %v5828_v43 }
0x1367   :  { %2828 = vmatpush1.msra.mxu1 %v5829_v34 }
0x1368   :  { %2829 = vmatprep.subr.mxu1 %v5830_v7 }
0x1369   :  { %2830 = vmatpush1.msra.mxu1 %v5130_v32 }
0x136a   :  { %2831 = vmatprep.subr.mxu1 %v5133_v1 }
0x136b   :  { %2832 = vmatpush2.msra.mxu1 %v5136_v51 }
0x136c   :  { %2833 = vmatprep.subr.mxu1 %v5139_v2 }
0x136d   :  { %2834 = vmatpush2.msra.mxu1 %v5142_v54 }
0x136e   :  { %2835 = vmatprep.subr.mxu1 %v5145_v42 }
0x136f   :  { %2836 = vmatpush2.msra.mxu1 %v5228_v0 }
0x1370   :  { %2837 = vmatprep.subr.mxu1 %v5231_v5 }
0x1371   :  { %2838 = vmatpush2.msra.mxu1 %v5234_v57 }
0x1372   :  { %2839 = vmatprep.subr.mxu1 %v5237_v53 }
0x1373   :  { %2840 = vmatpush2.msra.mxu1 %v5240_v26 }
0x1374   :  { %2841 = vmatprep.subr.mxu1 %v5243_v39 }
0x1375   :  { %2842 = vmatpush2.msra.mxu1 %v5246_v23 }
0x1376   :  { %2843 = vmatprep.subr.mxu1 %v5249_v3 }
0x1377   :  { %2844 = vmatpush2.msra.mxu1 %v5252_v25 }
0x1378   :  { %2845 = vmatprep.subr.mxu1 %v5255_v63 }
0x1379   :  { %2846 = vmatpush2.msra.mxu1 %v5258_v46 }
0x137a   :  { %2847 = vmatprep.subr.mxu1 %v5867_v15 }
0x137b   :  { %2848 = vmatpush2.msra.mxu1 %v5868_v14 }
0x137c   :  { %2849 = vmatprep.subr.mxu1 %v5869_v47 }
0x137d   :  { %2850 = vmatpush2.msra.mxu1 %v5870_v37 }
0x137e   :  { %2851 = vmatprep.subr.mxu1 %v5871_v38 }
0x137f   :  { %2852 = vmatpush2.msra.mxu1 %v5872_v12 }
0x1380   :  { %2853 = vmatprep.subr.mxu1 %v5873_v22 }
0x1381   :  { %2854 = vmatpush2.msra.mxu1 %v5874_v59 }
0x1382   :  { %2855 = vmatprep.subr.mxu1 %v5875_v8 }
0x1383   :  { %2856 = vmatpush2.msra.mxu1 %v5876_v4 }
0x1384   :  { %2857 = vmatprep.subr.mxu1 %v5877_v24 }
0x1385   :  { %2858 = vmatpush2.msra.mxu1 %v5878_v40 }
0x1386   :  { %2859 = vmatprep.subr.mxu1 %v5879_v11 }
0x1387   :  { %2860 = vmatpush2.msra.mxu1 %v5880_v19 }
0x1388   :  { %2861 = vmatprep.subr.mxu1 %v5881_v31 }
0x1389   :  { %2862 = vmatpush2.msra.mxu1 %v5882_v49 }
0x140a   :  { %v2643_v60 = vpop.f32.mrf.mxu1 }
0x140b   :  { %v2649_v58 = vadd.f32 %v2643_v60, %v5883_v27  ;;  %v5887_v27 = vld [vmem:[#allocation22_spill] sm:$0xff] }
0x140c   :  { %v2645_v55 = vpop.f32.mrf.mxu1 }
0x140d   :  { %v3068_v50 = vmul.f32 -1.442695, %v2649_v58  ;;  %v2651_v13 = vadd.f32 %v2645_v55, %v5884_v30  ;;  %v5888_v30 = vld [vmem:[#allocation44_spill] sm:$0xff] }
0x140f   :  { %3331 = vpow2.f32 %v3068_v50  ;;  %v3069_v45 = vmul.f32 -1.442695, %v2651_v13 }
0x1410   :  { %3333 = vtanh.f32 %v2651_v13 }
0x1411   :  { %3335 = vpow2.f32 %v3069_v45 }
0x1412   :  { %3337 = vtanh.f32 %v2649_v58 }
0x141c   :  { %v3332_v52 = vpop.eup %3331 }
0x141d   :  { %v3334_v10 = vpop.eup %3333  ;;  %v2655_v20 = vadd.f32 1.0, %v3332_v52  ;;  %v2941_v52 = vld [vmem:[#allocation11 + $0xf8] sm:$0xff] }
0x141e   :  { %v3336_v2 = vpop.eup %3335  ;;  %2679 = vrot.lane.b32.xlu1 %v3334_v10, %s3562_s27  ;;  %v2925_v10 = vld [vmem:[#allocation11 + $0x78] sm:$0xff]  ;;  %3075 = vmatprep.subr.mxu0 %v2941_v52 }
0x141f   :  { %3339 = vrcp.f32 %v2655_v20  ;;  %v2673_v54 = vadd.f32 1.0, %v3336_v2  ;;  %v3338_v42 = vpop.eup %3337  ;;  %v2940_v20 = vld [vmem:[#allocation11 + $0xf0] sm:$0xff] }
0x1420   :  { %v2924_v2 = vld [vmem:[#allocation11 + $0x70] sm:$0xff] }
0x1421   :  { %3341 = vrcp.f32 %v2673_v54  ;;  %v2939_v54 = vld [vmem:[#allocation11 + $0xe8] sm:$0xff] }
0x1422   :  { %2661 = vrot.lane.b32.xlu1 %v3338_v42, %s3562_s27  ;;  %v2923_v42 = vld [vmem:[#allocation11 + $0x68] sm:$0xff] }
0x142c   :  { %v3340_v32 = vpop.eup %3339 }
0x142d   :  { %2663 = vrot.lane.b32.xlu1 %v3340_v32, %s3563_s28 }
0x142e   :  { %v3342_v1 = vpop.eup %3341 }
0x142f   :  { %2677 = vrot.lane.b32.xlu0 %v3342_v1, %s3561_s3 }
0x1433   :  { %2659 = vrot.lane.b32.xlu0 %v3340_v32, %s3561_s3 }
0x1437   :  { %2681 = vrot.lane.b32.xlu0 %v3342_v1, %s3563_s28 }
0x1490   :  { %v2680_v51 = vpop.permute.xlu1 %2679 }
0x1491   :  { %v2684_v34 = vmul.f32 %v3342_v1, %v2680_v51 }
0x1494   :  { %v2662_v0 = vpop.permute.xlu1 %2661 }
0x1495   :  { %v2666_v53 = vmul.f32 %v3340_v32, %v2662_v0  ;;  %v2922_v0 = vld [vmem:[#allocation11 + $0x60] sm:$0xff] }
0x149f   :  { %v2664_v46 = vpop.permute.xlu1 %2663 }
0x14a1   :  { %v2678_v43 = vpop.permute.xlu0 %2677 }
0x14a2   :  { %v2683_v7 = vmul.f32 %v2678_v43, %v5398_v33 }
0x14a4   :  { %v2685_v5 = vadd.f32 %v2684_v34, %v2683_v7  ;;  %v2938_v7 = vld [vmem:[#allocation11 + $0xe0] sm:$0xff] }
0x14a5   :  { %v2660_v57 = vpop.permute.xlu0 %2659 }
0x14a6   :  { %3343 = vtanh.f32 %v2685_v5  ;;  %v2665_v26 = vmul.f32 %v2660_v57, %v5402_v17  ;;  %v2937_v57 = vld [vmem:[#allocation11 + $0xd8] sm:$0xff] }
0x14a8   :  { %v2667_v39 = vadd.f32 %v2666_v53, %v2665_v26  ;;  %v2921_v53 = vld [vmem:[#allocation11 + $0x58] sm:$0xff]  ;;  %v2936_v26 = vld [vmem:[#allocation11 + $0xd0] sm:$0xff] }
0x14a9   :  { %v2682_v3 = vpop.permute.xlu0 %2681 }
0x14aa   :  { %3345 = vtanh.f32 %v2667_v39 }
0x14b3   :  { %v3344_v23 = vpop.eup %3343 }
0x14b4   :  { %v2687_v25 = vmul.f32 %v3344_v23, %v2682_v3  ;;  %v2935_v23 = vld [vmem:[#allocation11 + $0xc8] sm:$0xff] }
0x14b5   :  { %v2919_v3 = vld [vmem:[#allocation11 + $0x48] sm:$0xff] }
0x14b6   :  { %2752 = vmatprep.mubr.f32.mxu0 %v2687_v25  ;;  %v2934_v25 = vld [vmem:[#allocation11 + $0xc0] sm:$0xff] }
0x14b7   :  { %v3346_v63 = vpop.eup %3345 }
0x14b8   :  { %v2669_v16 = vmul.f32 %v3346_v63, %v2664_v46  ;;  %v2918_v63 = vld [vmem:[#allocation11 + $0x40] sm:$0xff]  ;;  %v2933_v46 = vld [vmem:[#allocation11 + $0xb8] sm:$0xff] }
0x14ba   :  { %2753 = vmatmul.mubr.f32.vlgmr.msra.gmra.mxu0 %v2669_v16  ;;  %v2917_v16 = vld [vmem:[#allocation11 + $0x38] sm:$0xff] }
0x14bb   :  { %3076 = vmatpush3.msra.mxu0 %v2925_v10 }
0x14bc   :  { %3077 = vmatprep.subr.mxu0 %v2940_v20 }
0x14bd   :  { %3078 = vmatpush3.msra.mxu0 %v2924_v2 }
0x14be   :  { %3079 = vmatprep.subr.mxu0 %v2939_v54 }
0x14bf   :  { %3080 = vmatpush3.msra.mxu0 %v2923_v42 }
0x14c0   :  { %3081 = vmatprep.subr.mxu0 %v2938_v7 }
0x14c1   :  { %3082 = vmatpush3.msra.mxu0 %v2922_v0 }
0x14c2   :  { %3083 = vmatprep.subr.mxu0 %v2937_v57 }
0x14c3   :  { %3084 = vmatpush3.msra.mxu0 %v2921_v53 }
0x14c4   :  { %3085 = vmatprep.subr.mxu0 %v2936_v26 }
0x157a   :  { %v2754_v29 = vpop.f32.mrf.mxu0 }
0x157b   :  { %v2760_v44 = vadd.f32 %v2754_v29, %v5885_v28  ;;  %v2932_v28 = vld [vmem:[#allocation11 + $0xb0] sm:$0xff] }
0x157c   :  { %v2756_v18 = vpop.f32.mrf.mxu0 }
0x157d   :  { %v3070_v35 = vmul.f32 -1.442695, %v2760_v44  ;;  %v2762_v33 = vadd.f32 %v2756_v18, %v5886_v41  ;;  %v2915_v41 = vld [vmem:[#allocation11 + $0x28] sm:$0xff] }
0x157f   :  { %3347 = vpow2.f32 %v3070_v35  ;;  %v3071_v62 = vmul.f32 -1.442695, %v2762_v33  ;;  %v2931_v35 = vld [vmem:[#allocation11 + $0xa8] sm:$0xff] }
0x1580   :  { %3349 = vtanh.f32 %v2762_v33  ;;  %v2930_v33 = vld [vmem:[#allocation11 + $0xa0] sm:$0xff] }
0x1581   :  { %3351 = vpow2.f32 %v3071_v62  ;;  %v2914_v62 = vld [vmem:[#allocation11 + $0x20] sm:$0xff] }
0x1582   :  { %3353 = vtanh.f32 %v2760_v44  ;;  %v2916_v44 = vld [vmem:[#allocation11 + $0x30] sm:$0xff] }
0x158c   :  { %v3348_v61 = vpop.eup %3347 }
0x158d   :  { %v3350_v48 = vpop.eup %3349  ;;  %v2766_v17 = vadd.f32 1.0, %v3348_v61  ;;  %v2929_v61 = vld [vmem:[#allocation11 + $0x98] sm:$0xff] }
0x158e   :  { %v3352_v36 = vpop.eup %3351  ;;  %2790 = vrot.lane.b32.xlu1 %v3350_v48, %s3562_s27  ;;  %v2913_v48 = vld [vmem:[#allocation11 + $0x18] sm:$0xff] }
0x158f   :  { %3355 = vrcp.f32 %v2766_v17  ;;  %v2784_v9 = vadd.f32 1.0, %v3352_v36  ;;  %v3354_v56 = vpop.eup %3353  ;;  %v2928_v17 = vld [vmem:[#allocation11 + $0x90] sm:$0xff] }
0x1590   :  { %v2912_v36 = vld [vmem:[#allocation11 + $0x10] sm:$0xff] }
0x1591   :  { %3357 = vrcp.f32 %v2784_v9  ;;  %v2927_v9 = vld [vmem:[#allocation11 + $0x88] sm:$0xff] }
0x1592   :  { %2772 = vrot.lane.b32.xlu1 %v3354_v56, %s3562_s27  ;;  %v2911_v56 = vld [vmem:[#allocation11 + $0x8] sm:$0xff] }
0x159c   :  { %v3356_v6 = vpop.eup %3355 }
0x159d   :  { %2774 = vrot.lane.b32.xlu1 %v3356_v6, %s3563_s28 }
0x159e   :  { %v3358_v21 = vpop.eup %3357 }
0x159f   :  { %2788 = vrot.lane.b32.xlu0 %v3358_v21, %s3561_s3 }
0x15a3   :  { %2770 = vrot.lane.b32.xlu0 %v3356_v6, %s3561_s3 }
0x15a7   :  { %2792 = vrot.lane.b32.xlu0 %v3358_v21, %s3563_s28 }
0x1600   :  { %v2791_v15 = vpop.permute.xlu1 %2790 }
0x1601   :  { %v2795_v47 = vmul.f32 %v3358_v21, %v2791_v15  ;;  %v2910_v21 = vld [vmem:[#allocation11] sm:$0xff] }
0x1604   :  { %v2773_v38 = vpop.permute.xlu1 %2772 }
0x1605   :  { %v2777_v59 = vmul.f32 %v3356_v6, %v2773_v38  ;;  %v2926_v6 = vld [vmem:[#allocation11 + $0x80] sm:$0xff] }
0x160f   :  { %v2775_v31 = vpop.permute.xlu1 %2774 }
0x1611   :  { %v2789_v14 = vpop.permute.xlu0 %2788 }
0x1612   :  { %v2794_v37 = vmul.f32 %v2789_v14, %v2685_v5 }
0x1614   :  { %v5486_v12 = vadd.f32 %v2795_v47, %v2794_v37 }
0x1615   :  { %v2771_v22 = vpop.permute.xlu0 %2770 }
0x1616   :  { %3359 = vtanh.f32 %v5486_v12  ;;  %v2776_v8 = vmul.f32 %v2771_v22, %v2667_v39  ;;  %v2920_v39 = vld [vmem:[#allocation11 + $0x50] sm:$0xff] }
0x1617   :  { %3086 = vmatpush3.msra.mxu0 %v2920_v39 }
0x1618   :  { %v5489_v4 = vadd.f32 %v2777_v59, %v2776_v8  ;;  %3087 = vmatprep.subr.mxu0 %v2935_v23 }
0x1619   :  { %v2793_v40 = vpop.permute.xlu0 %2792  ;;  %3088 = vmatpush3.msra.mxu0 %v2919_v3 }
0x161a   :  { %3361 = vtanh.f32 %v5489_v4  ;;  %3089 = vmatprep.subr.mxu0 %v2934_v25 }
0x161b   :  { %3090 = vmatpush3.msra.mxu0 %v2918_v63 }
0x161c   :  { %3091 = vmatprep.subr.mxu0 %v2933_v46 }
0x161d   :  { %3092 = vmatpush3.msra.mxu0 %v2917_v16 }
0x161e   :  { %3093 = vmatprep.subr.mxu0 %v2932_v28 }
0x161f   :  { %3094 = vmatpush3.msra.mxu0 %v2916_v44 }
0x1620   :  { %3095 = vmatprep.subr.mxu0 %v2931_v35 }
0x1621   :  { %3096 = vmatpush3.msra.mxu0 %v2915_v41 }
0x1622   :  { %3097 = vmatprep.subr.mxu0 %v2930_v33 }
0x1623   :  { %v3360_v24 = vpop.eup %3359  ;;  %3098 = vmatpush3.msra.mxu0 %v2914_v62 }
0x1624   :  { %v2798_v11 = vmul.f32 %v3360_v24, %v2793_v40  ;;  %3099 = vmatprep.subr.mxu0 %v2929_v61 }
0x1625   :  { %3100 = vmatpush3.msra.mxu0 %v2913_v48 }
0x1626   :  { %2863 = vmatprep.mubr.f32.mxu1 %v2798_v11  ;;  %3101 = vmatprep.subr.mxu0 %v2928_v17 }
0x1627   :  { %v3362_v19 = vpop.eup %3361  ;;  %3102 = vmatpush3.msra.mxu0 %v2912_v36 }
0x1628   :  { %v2780_v49 = vmul.f32 %v3362_v19, %v2775_v31  ;;  %3103 = vmatprep.subr.mxu0 %v2927_v9 }
0x1629   :  { %3104 = vmatpush3.msra.mxu0 %v2911_v56 }
0x162a   :  { %2864 = vmatmul.mubr.f32.vlgmr.msra.gmra.mxu1 %v2780_v49  ;;  %3105 = vmatprep.subr.mxu0 %v2926_v6 }
0x162b   :  { %3106 = vmatpush3.msra.mxu0 %v2910_v21 }
0x16ea   :  { %v2865_v60 = vpop.f32.mrf.mxu1 }
0x16eb   :  { %v2871_v58 = vadd.f32 %v2865_v60, %v5887_v27 }
0x16ec   :  { %v2867_v55 = vpop.f32.mrf.mxu1 }
0x16ed   :  { %v3072_v50 = vmul.f32 -1.442695, %v2871_v58  ;;  %v2873_v13 = vadd.f32 %v2867_v55, %v5888_v30 }
0x16ef   :  { %3363 = vpow2.f32 %v3072_v50  ;;  %v3073_v45 = vmul.f32 -1.442695, %v2873_v13 }
0x16f0   :  { %3365 = vtanh.f32 %v2873_v13 }
0x16f1   :  { %3367 = vpow2.f32 %v3073_v45 }
0x16f2   :  { %3369 = vtanh.f32 %v2871_v58 }
0x16fc   :  { %v3364_v32 = vpop.eup %3363 }
0x16fd   :  { %v3366_v1 = vpop.eup %3365  ;;  %v2877_v51 = vadd.f32 1.0, %v3364_v32 }
0x16fe   :  { %v3368_v43 = vpop.eup %3367  ;;  %2901 = vrot.lane.b32.xlu1 %v3366_v1, %s3562_s27 }
0x16ff   :  { %3371 = vrcp.f32 %v2877_v51  ;;  %v2895_v34 = vadd.f32 1.0, %v3368_v43  ;;  %v3370_v5 = vpop.eup %3369 }
0x1701   :  { %3373 = vrcp.f32 %v2895_v34 }
0x1702   :  { %2883 = vrot.lane.b32.xlu1 %v3370_v5, %s3562_s27 }
0x170c   :  { %v3372_v29 = vpop.eup %3371 }
0x170d   :  { %2885 = vrot.lane.b32.xlu1 %v3372_v29, %s3563_s28 }
0x170e   :  { %v3374_v18 = vpop.eup %3373 }
0x170f   :  { %2899 = vrot.lane.b32.xlu0 %v3374_v18, %s3561_s3 }
0x1713   :  { %2881 = vrot.lane.b32.xlu0 %v3372_v29, %s3561_s3 }
0x1717   :  { %2903 = vrot.lane.b32.xlu0 %v3374_v18, %s3563_s28 }
0x1770   :  { %v2902_v15 = vpop.permute.xlu1 %2901 }
0x1771   :  { %v2906_v47 = vmul.f32 %v3374_v18, %v2902_v15 }
0x1774   :  { %v2884_v38 = vpop.permute.xlu1 %2883 }
0x1775   :  { %v2888_v8 = vmul.f32 %v3372_v29, %v2884_v38 }
0x177f   :  { %v2886_v60 = vpop.permute.xlu1 %2885 }
0x1781   :  { %v2900_v14 = vpop.permute.xlu0 %2899 }
0x1782   :  { %v2905_v37 = vmul.f32 %v2900_v14, %v5486_v12  ;;  %v3074_v12 = vld [vmem:[%s5516_s8] ss:$0 sm:$0xff] }
0x1784   :  { %v2907_v22 = vadd.f32 %v2906_v47, %v2905_v37 }
0x1785   :  { %v2882_v59 = vpop.permute.xlu0 %2881 }
0x1786   :  { %3375 = vtanh.f32 %v2907_v22  ;;  %v2887_v24 = vmul.f32 %v2882_v59, %v5489_v4 }
0x1788   :  { %v2889_v40 = vadd.f32 %v2888_v8, %v2887_v24 }
0x1789   :  { %v2904_v19 = vpop.permute.xlu0 %2903 }
0x178a   :  { %3377 = vtanh.f32 %v2889_v40 }
0x1793   :  { %v3376_v11 = vpop.eup %3375 }
0x1794   :  { %v2909_v31 = vmul.f32 %v3376_v11, %v2904_v19 }
0x1796   :  { %3013 = vmatprep.mubr.f32.mxu0 %v2909_v31 }
0x1797   :  { %v3378_v49 = vpop.eup %3377 }
0x1798   :  { %v2891_v27 = vmul.f32 %v3378_v49, %v2886_v60 }
0x179a   :  { %3014 = vmatmul.mubr.f32.vlgmr.msra.gmra.mxu0 %v2891_v27 }
0x185a   :  { %v3107_v58 = vpop.f32.mrf.mxu0 }
0x185c   :  { %v3108_v55 = vpop.f32.mrf.mxu0 }
0x185d   :  { %v3109_v50 = vadd.f32 %v3108_v55, %v3107_v58 }
0x185f   :  { %v3016_v30 = vadd.f32 %v3109_v50, %v3074_v12 }
0x1861   :  { %3379 = vtanh.f32 %v3016_v30 }
0x186e   :  { %v3380_v4 = vpop.eup %3379 }
0x186f   :  { %3020 = vst [vmem:[%s5517_s9] sm:$0xff] %v3380_v4 }
0x1870   :  { %3025 = vsyncpa [#allocation5], 1 }
0x1871   :  { %3026 = vsyncpa [#allocation7], 1 }
0x1872   :  { %3027 = vsyncpa [#allocation10], 1 }

</bundles_post_ra>
